<compile_context>
chip_gen: v7x
topology: tpu7x:2x2x1
jax: 0.10.0
libtpu: 0.0.40
codegen_flags: <defaults>
</compile_context>

<pallas_src>
import jax
import jax.numpy as jnp
from jax import lax
from jax.experimental import pallas as pl
from jax.experimental.pallas import tpu as pltpu

# ---- synthetic SparseRCNN config (small) -----------------------------------
HIDDEN_DIM = 32      # cfg.MODEL.SparseRCNN.HIDDEN_DIM   (d_model)
DIM_DYNAMIC = 8      # cfg.MODEL.SparseRCNN.DIM_DYNAMIC
NUM_DYNAMIC = 2      # cfg.MODEL.SparseRCNN.NUM_DYNAMIC  (forward assumes 2)
POOLER_RES = 4       # cfg.MODEL.ROI_BOX_HEAD.POOLER_RESOLUTION -> S = 16
NUM_PARAMS = HIDDEN_DIM * DIM_DYNAMIC
LN_EPS = 1e-5        # torch.nn.LayerNorm default eps


def _layernorm(x, gamma, beta, eps=LN_EPS):
    mean = jnp.mean(x, axis=-1, keepdims=True)
    var = jnp.mean(jnp.square(x - mean), axis=-1, keepdims=True)
    return (x - mean) * jax.lax.rsqrt(var + eps) * gamma + beta


# --------------------------- fused kernel ------------------------------------
def _fused_dynconv_kernel(
        pro_ref, roi_ref, wdynT_ref, bdyn_ref,
        g1_ref, be1_ref, g2_ref, be2_ref,
        wout_ref, bout_ref, g3_ref, be3_ref,
        o_ref,
        params_scr, flat_scr):
    H, Bblk = pro_ref.shape            # (32, 128)  boxes on lanes
    SH = roi_ref.shape[0]              # 512
    S = SH // H                        # 16
    twoHD = params_scr.shape[0]        # 512
    HD = twoHD // 2                    # 256
    D = HD // H                        # 8

    # ---- stage A: dynamic_layer, produced directly as paramsT[k, box] -------
    # (512, 32) @ (32, 128) on the MXU, weights stay VMEM-resident.
    params_scr[...] = (
        jnp.dot(wdynT_ref[...], pro_ref[...],
                preferred_element_type=jnp.float32)
        + bdyn_ref[...])

    # ---- stage B1: features @ param1  ->  x1[d, s, box]  (VPU, lane-dense) --
    # roi_ref rows are h-major (row h*S + s), params rows h*D + d, so both
    # slices below are contiguous, 8/16-row aligned sublane loads.
    def b1_body(h, x1):
        p1_h = params_scr[pl.ds(pl.multiple_of(h * D, D), D), :]      # (D, B)
        f_h = roi_ref[pl.ds(pl.multiple_of(h * S, S), S), :]          # (S, B)
        return x1 + p1_h[:, None, :] * f_h[None, :, :].astype(jnp.float32)

    x1 = lax.fori_loop(0, H, b1_body,
                       jnp.zeros((D, S, Bblk), jnp.float32))

    # LayerNorm over d (leading axis) + ReLU; gamma/beta are SMEM scalars.
    mean1 = jnp.mean(x1, axis=0)                                       # (S, B)
    xc1 = x1 - mean1[None, :, :]
    rstd1 = lax.rsqrt(jnp.mean(xc1 * xc1, axis=0) + LN_EPS)            # (S, B)
    x1n = jnp.stack(
        [jnp.maximum(xc1[d] * rstd1 * g1_ref[d] + be1_ref[d], 0.0)
         for d in range(D)],
        axis=0)                                                        # (D,S,B)

    # ---- stage B2: x1n @ param2 -> flat_scr[h*S+s, box], LN2 stats online ---
    def b2_body(h, carry):
        s2, ss2 = carry
        p2_h = params_scr[pl.ds(pl.multiple_of(HD + h * D, D), D), :]  # (D, B)
        x2_h = jnp.sum(x1n * p2_h[:, None, :], axis=0)                 # (S, B)
        flat_scr[pl.ds(pl.multiple_of(h * S, S), S), :] = x2_h
        return (s2 + x2_h, ss2 + x2_h * x2_h)

    sum2, sumsq2 = lax.fori_loop(
        0, H, b2_body,
        (jnp.zeros((S, Bblk), jnp.float32),
         jnp.zeros((S, Bblk), jnp.float32)))

    mean2 = sum2 * (1.0 / H)
    var2 = sumsq2 * (1.0 / H) - mean2 * mean2
    rstd2 = lax.rsqrt(var2 + LN_EPS)

    # LayerNorm2 + ReLU applied in place on the lane-dense slab.
    @pl.loop(0, H)
    def _(h):
        rows = pl.ds(pl.multiple_of(h * S, S), S)
        v = (flat_scr[rows, :] - mean2) * rstd2 * g2_ref[h] + be2_ref[h]
        flat_scr[rows, :] = jnp.maximum(v, 0.0)

    # ---- stage C: out_layer + LayerNorm + ReLU (boxes back onto sublanes) ---
    # (512, 128)^T-contracted against (512, 32): single MXU matmul.
    y = lax.dot_general(flat_scr[...], wout_ref[...],
                        (((0,), (0,)), ((), ())),
                        preferred_element_type=jnp.float32)            # (B, H)
    y = y + bout_ref[...]
    mean3 = jnp.mean(y, axis=-1, keepdims=True)
    var3 = jnp.mean(jnp.square(y - mean3), axis=-1, keepdims=True)
    y = (y - mean3) * lax.rsqrt(var3 + LN_EPS) * g3_ref[...] + be3_ref[...]
    o_ref[...] = jnp.maximum(y, 0.0).astype(o_ref.dtype)


# --------------------------- wrapper ------------------------------------------
def dynamic_conv_forward(pro_features, roi_features, p, *,
                         block_boxes=128, use_bf16_operands=False):
    """pro_features: (1, B, H); roi_features: (S, B, H).  Returns (B, H)."""
    _, B, H = pro_features.shape
    S = roi_features.shape[0]
    D = DIM_DYNAMIC
    HD = H * D
    SH = S * H
    assert block_boxes % 128 == 0, "box block = whole lane groups (128)"

    Bblk = block_boxes
    Bp = ((B + Bblk - 1) // Bblk) * Bblk
    grid = (Bp // Bblk,)   # at production box counts this is >= 2 (v7x 2 TCs)

    # ---- one-time weight relayouts (pure JAX, weights only) -----------------
    # param2 columns: (d-major -> h-major) so the kernel slices param2[b,:,h]
    # as 8 contiguous, 8-row-aligned sublane rows of paramsT.
    w2 = p["w_dyn"][:, HD:].reshape(H, D, H).transpose(0, 2, 1).reshape(H, HD)
    b2 = p["b_dyn"][HD:].reshape(D, H).T.reshape(HD)
    wdynT = jnp.concatenate([p["w_dyn"][:, :HD], w2], axis=1).T        # (2HD,H)
    bdyn = jnp.concatenate([p["b_dyn"][:HD], b2]).reshape(2 * HD, 1)
    # out_layer rows reordered to the kernel's h-major flatten order.
    wout = p["w_out"].reshape(S, H, H).transpose(1, 0, 2).reshape(SH, H)

    # ---- activation relayout: boxes onto the lane (last) axis ---------------
    # One wrapper-side copy of roi (layout plumbing, fused by XLA with the pad
    # below); the tail pad is at most one box block.
    proT = pro_features.reshape(B, H).T                                # (H, B)
    roiT = jnp.transpose(roi_features, (2, 0, 1)).reshape(SH, B)       # (SH,B)
    if Bp != B:
        proT = jnp.pad(proT, ((0, 0), (0, Bp - B)))
        roiT = jnp.pad(roiT, ((0, 0), (0, Bp - B)))

    if use_bf16_operands:   # recommended on v6e/v7x; halves the roi HBM bytes
        proT = proT.astype(jnp.bfloat16)
        roiT = roiT.astype(jnp.bfloat16)
        wdynT = wdynT.astype(jnp.bfloat16)

    const = lambda i: (0, 0)
    smem = pl.BlockSpec(memory_space=pltpu.MemorySpace.SMEM)

    cost = pl.CostEstimate(
        flops=2 * Bp * (H * 2 * HD + 2 * S * D * H + SH * H),
        transcendentals=Bp * (2 * S + 1),
        bytes_accessed=4 * (Bp * (SH + 2 * H)
                            + 2 * HD * (H + 1) + SH * H + 5 * H + 2 * D))

    out = pl.pallas_call(
        _fused_dynconv_kernel,
        out_shape=jax.ShapeDtypeStruct((Bp, H), pro_features.dtype),
        grid=grid,
        in_specs=[
            pl.BlockSpec((H, Bblk), lambda i: (0, i)),       # proT block
            pl.BlockSpec((SH, Bblk), lambda i: (0, i)),      # roiT block (lane dense)
            pl.BlockSpec((2 * HD, H), const),                # w_dyn^T (resident)
            pl.BlockSpec((2 * HD, 1), const),                # b_dyn column
            smem, smem,                                      # norm1 gamma/beta (scalars)
            smem, smem,                                      # norm2 gamma/beta (scalars)
            pl.BlockSpec((SH, H), const),                    # w_out (resident)
            pl.BlockSpec((1, H), const),                     # b_out
            pl.BlockSpec((1, H), const),                     # norm3 gamma
            pl.BlockSpec((1, H), const),                     # norm3 beta
        ],
        out_specs=pl.BlockSpec((Bblk, H), lambda i: (i, 0)),
        scratch_shapes=[
            pltpu.VMEM((2 * HD, Bblk), jnp.float32),         # paramsT
            pltpu.VMEM((SH, Bblk), jnp.float32),             # flattened stage-B output
        ],
        compiler_params=pltpu.CompilerParams(
            dimension_semantics=("parallel",)),
        cost_estimate=cost,
    )(proT, roiT, wdynT, bdyn,
      p["g1"], p["be1"], p["g2"], p["be2"],
      wout, p["b_out"].reshape(1, H),
      p["g3"].reshape(1, H), p["be3"].reshape(1, H))

    return out[:B] if Bp != B else out


# --------------------------- pure-JAX reference ------------------------------
def dynamic_conv_reference(pro_features, roi_features, p):
    _, B, H = pro_features.shape
    S = roi_features.shape[0]
    D = DIM_DYNAMIC
    hp = lax.Precision.HIGHEST
    pro = pro_features.reshape(B, H)
    feat = jnp.transpose(roi_features, (1, 0, 2))            # (B, S, H)
    params = jnp.dot(pro, p["w_dyn"], precision=hp) + p["b_dyn"]
    param1 = params[:, :NUM_PARAMS].reshape(B, H, D)
    param2 = params[:, NUM_PARAMS:].reshape(B, D, H)
    x = jnp.einsum("bsh,bhd->bsd", feat, param1, precision=hp)
    x = jnp.maximum(_layernorm(x, p["g1"], p["be1"]), 0.0)
    x = jnp.einsum("bsd,bdh->bsh", x, param2, precision=hp)
    x = jnp.maximum(_layernorm(x, p["g2"], p["be2"]), 0.0)
    x = jnp.dot(x.reshape(B, S * H), p["w_out"], precision=hp) + p["b_out"]
    return jnp.maximum(_layernorm(x, p["g3"], p["be3"]), 0.0)


# ------------------------------------ main -----------------------------------
if __name__ == "__main__":
    key = jax.random.PRNGKey(0)
    ks = jax.random.split(key, 12)

    H, D, S = HIDDEN_DIM, DIM_DYNAMIC, POOLER_RES ** 2
    N_img, nr_boxes = 2, 8
    B = N_img * nr_boxes                                      # 16 boxes

    params = {
        "w_dyn": jax.random.normal(ks[0], (H, NUM_DYNAMIC * NUM_PARAMS),
                                   jnp.float32) * 0.05,
        "b_dyn": jax.random.normal(ks[1], (NUM_DYNAMIC * NUM_PARAMS,),
                                   jnp.float32) * 0.01,
        "g1": 1.0 + 0.1 * jax.random.normal(ks[2], (D,), jnp.float32),
        "be1": 0.1 * jax.random.normal(ks[3], (D,), jnp.float32),
        "g2": 1.0 + 0.1 * jax.random.normal(ks[4], (H,), jnp.float32),
        "be2": 0.1 * jax.random.normal(ks[5], (H,), jnp.float32),
        "w_out": jax.random.normal(ks[6], (S * H, H), jnp.float32) * 0.05,
        "b_out": 0.1 * jax.random.normal(ks[7], (H,), jnp.float32),
        "g3": 1.0 + 0.1 * jax.random.normal(ks[8], (H,), jnp.float32),
        "be3": 0.1 * jax.random.normal(ks[9], (H,), jnp.float32),
    }

    pro_features = jax.random.normal(ks[10], (1, B, H), jnp.float32)
    roi_features = jax.random.normal(ks[11], (S, B, H), jnp.float32)

    out = dynamic_conv_forward(pro_features, roi_features, params,
                               block_boxes=128)
    out = jax.block_until_ready(out)

    ref = dynamic_conv_reference(pro_features, roi_features, params)
    assert out.shape == (B, H), out.shape
    assert jnp.allclose(out, ref, atol=1e-3, rtol=1e-3), (
        float(jnp.max(jnp.abs(out - ref))))

    print("KERNEL_OK")
</pallas_src>

<mosaic_0001>
module attributes {stable_mosaic.version = 11 : i64} {
  func.func @_fused_dynconv_kernel(%arg0: i32, %arg1: memref<32x128xf32, #tpu.memory_space<vmem>>, %arg2: memref<512x128xf32, #tpu.memory_space<vmem>>, %arg3: memref<512x32xf32, #tpu.memory_space<vmem>>, %arg4: memref<512x1xf32, #tpu.memory_space<vmem>>, %arg5: memref<8xf32, #tpu.memory_space<smem>>, %arg6: memref<8xf32, #tpu.memory_space<smem>>, %arg7: memref<32xf32, #tpu.memory_space<smem>>, %arg8: memref<32xf32, #tpu.memory_space<smem>>, %arg9: memref<512x32xf32, #tpu.memory_space<vmem>>, %arg10: memref<1x32xf32, #tpu.memory_space<vmem>>, %arg11: memref<1x32xf32, #tpu.memory_space<vmem>>, %arg12: memref<1x32xf32, #tpu.memory_space<vmem>>, %arg13: memref<128x32xf32, #tpu.memory_space<vmem>>, %arg14: memref<512x128xf32, #tpu.memory_space<vmem>>, %arg15: memref<512x128xf32, #tpu.memory_space<vmem>>) attributes {dimension_semantics = [#tpu.dimension_semantics<parallel>], iteration_bounds = array<i64: 1>, scalar_prefetch = 0 : i64, scratch_operands = 2 : i64, tpu.core_type = #tpu.core_type<tc>, window_params = [{transform_indices = @transform_0, window_bounds = array<i64: 32, 128>}, {transform_indices = @transform_1, window_bounds = array<i64: 512, 128>}, {pipeline_mode = #tpu.pipeline_mode<synchronous>, transform_indices = @transform_2, window_bounds = array<i64: 512, 32>}, {pipeline_mode = #tpu.pipeline_mode<synchronous>, transform_indices = @transform_3, window_bounds = array<i64: 512, 1>}, {transform_indices = @transform_4, window_bounds = array<i64: 8>}, {transform_indices = @transform_5, window_bounds = array<i64: 8>}, {transform_indices = @transform_6, window_bounds = array<i64: 32>}, {transform_indices = @transform_7, window_bounds = array<i64: 32>}, {pipeline_mode = #tpu.pipeline_mode<synchronous>, transform_indices = @transform_8, window_bounds = array<i64: 512, 32>}, {pipeline_mode = #tpu.pipeline_mode<synchronous>, transform_indices = @transform_9, window_bounds = array<i64: 1, 32>}, {pipeline_mode = #tpu.pipeline_mode<synchronous>, transform_indices = @transform_10, window_bounds = array<i64: 1, 32>}, {pipeline_mode = #tpu.pipeline_mode<synchronous>, transform_indices = @transform_11, window_bounds = array<i64: 1, 32>}, {transform_indices = @transform_12, window_bounds = array<i64: 128, 32>}]} {
    %c0 = arith.constant 0 : index
    %c0_0 = arith.constant 0 : index
    %0 = vector.load %arg3[%c0, %c0_0] : memref<512x32xf32, #tpu.memory_space<vmem>>, vector<512x32xf32>
    %c0_1 = arith.constant 0 : index
    %c0_2 = arith.constant 0 : index
    %1 = vector.load %arg1[%c0_1, %c0_2] : memref<32x128xf32, #tpu.memory_space<vmem>>, vector<32x128xf32>
    %cst = arith.constant dense<0.000000e+00> : vector<512x128xf32>
    %2 = tpu.matmul %0, %1, %cst {dimension_numbers = #tpu.dot_dimension_numbers<[1], [0], [0], [1], [0, 0, 1, 1], [], []>} : vector<512x32xf32>, vector<32x128xf32>, vector<512x128xf32> -> vector<512x128xf32>
    %c0_3 = arith.constant 0 : index
    %c0_4 = arith.constant 0 : index
    %3 = vector.load %arg4[%c0_3, %c0_4] : memref<512x1xf32, #tpu.memory_space<vmem>>, vector<512x1xf32>
    %4 = vector.broadcast %3 : vector<512x1xf32> to vector<512x128xf32>
    %5 = arith.addf %2, %4 : vector<512x128xf32>
    %c0_5 = arith.constant 0 : index
    %c0_6 = arith.constant 0 : index
    %6 = vector.load %arg14[%c0_5, %c0_6] : memref<512x128xf32, #tpu.memory_space<vmem>>, vector<512x128xf32>
    tpu.vector_store %arg14[%c0_5, %c0_6], %5 {strides = array<i32>} : memref<512x128xf32, #tpu.memory_space<vmem>>, vector<512x128xf32>,
    %cst_7 = arith.constant 0.000000e+00 : f32
    %7 = vector.broadcast %cst_7 : f32 to vector<8x16x128xf32>
    %c0_i32 = arith.constant 0 : i32
    %c32_i32 = arith.constant 32 : i32
    %8 = arith.addi %c0_i32, %c32_i32 : i32
    %c1_i32 = arith.constant 1 : i32
    %9 = scf.for %arg16 = %c0_i32 to %8 step %c1_i32 iter_args(%arg17 = %7) -> (vector<8x16x128xf32>)  : i32 {
      %c8_i32 = arith.constant 8 : i32
      %167 = arith.muli %arg16, %c8_i32 : i32
      %168 = tpu.assume_multiple %167, 8 : i32
      %169 = arith.index_cast %168 : i32 to index
      %c0_63 = arith.constant 0 : index
      %170 = vector.load %arg14[%169, %c0_63] : memref<512x128xf32, #tpu.memory_space<vmem>>, vector<8x128xf32>
      %c16_i32 = arith.constant 16 : i32
      %171 = arith.muli %arg16, %c16_i32 : i32
      %172 = tpu.assume_multiple %171, 16 : i32
      %173 = arith.index_cast %172 : i32 to index
      %c0_64 = arith.constant 0 : index
      %174 = vector.load %arg2[%173, %c0_64] : memref<512x128xf32, #tpu.memory_space<vmem>>, vector<16x128xf32>
      %175 = vector.shape_cast %170 : vector<8x128xf32> to vector<8x1x128xf32>
      %176 = vector.shape_cast %174 : vector<16x128xf32> to vector<1x16x128xf32>
      %177 = vector.broadcast %175 : vector<8x1x128xf32> to vector<8x16x128xf32>
      %178 = vector.broadcast %176 : vector<1x16x128xf32> to vector<8x16x128xf32>
      %179 = arith.mulf %177, %178 : vector<8x16x128xf32>
      %180 = arith.addf %arg17, %179 : vector<8x16x128xf32>
      scf.yield %180 : vector<8x16x128xf32>
    }
    %c32_i32_8 = arith.constant 32 : i32
    %cst_9 = arith.constant dense<0.000000e+00> : vector<16x128xf32>
    %10 = vector.multi_reduction <add>, %9, %cst_9 [0] : vector<8x16x128xf32> to vector<16x128xf32>
    %cst_10 = arith.constant 8.000000e+00 : f32
    %11 = vector.broadcast %cst_10 : f32 to vector<16x128xf32>
    %12 = arith.divf %10, %11 : vector<16x128xf32>
    %13 = vector.shape_cast %12 : vector<16x128xf32> to vector<1x16x128xf32>
    %14 = vector.broadcast %13 : vector<1x16x128xf32> to vector<8x16x128xf32>
    %15 = arith.subf %9, %14 : vector<8x16x128xf32>
    %16 = arith.mulf %15, %15 : vector<8x16x128xf32>
    %cst_11 = arith.constant dense<0.000000e+00> : vector<16x128xf32>
    %17 = vector.multi_reduction <add>, %16, %cst_11 [0] : vector<8x16x128xf32> to vector<16x128xf32>
    %cst_12 = arith.constant 8.000000e+00 : f32
    %18 = vector.broadcast %cst_12 : f32 to vector<16x128xf32>
    %19 = arith.divf %17, %18 : vector<16x128xf32>
    %cst_13 = arith.constant 9.99999974E-6 : f32
    %20 = vector.broadcast %cst_13 : f32 to vector<16x128xf32>
    %21 = arith.addf %19, %20 : vector<16x128xf32>
    %22 = math.rsqrt %21 : vector<16x128xf32>
    %23 = vector.extract_strided_slice %15 {offsets = [0, 0, 0], sizes = [1, 16, 128], strides = [1, 1, 1]} : vector<8x16x128xf32> to vector<1x16x128xf32>
    %24 = vector.shape_cast %23 : vector<1x16x128xf32> to vector<16x128xf32>
    %25 = arith.mulf %24, %22 : vector<16x128xf32>
    %c0_14 = arith.constant 0 : index
    %26 = memref.load %arg5[%c0_14] : memref<8xf32, #tpu.memory_space<smem>>
    %27 = vector.broadcast %26 : f32 to vector<16x128xf32>
    %28 = arith.mulf %25, %27 : vector<16x128xf32>
    %c0_15 = arith.constant 0 : index
    %29 = memref.load %arg6[%c0_15] : memref<8xf32, #tpu.memory_space<smem>>
    %30 = vector.broadcast %29 : f32 to vector<16x128xf32>
    %31 = arith.addf %28, %30 : vector<16x128xf32>
    %cst_16 = arith.constant 0.000000e+00 : f32
    %32 = vector.broadcast %cst_16 : f32 to vector<16x128xf32>
    %33 = arith.maximumf %31, %32 : vector<16x128xf32>
    %34 = vector.extract_strided_slice %15 {offsets = [1, 0, 0], sizes = [1, 16, 128], strides = [1, 1, 1]} : vector<8x16x128xf32> to vector<1x16x128xf32>
    %35 = vector.shape_cast %34 : vector<1x16x128xf32> to vector<16x128xf32>
    %36 = arith.mulf %35, %22 : vector<16x128xf32>
    %c1 = arith.constant 1 : index
    %37 = memref.load %arg5[%c1] : memref<8xf32, #tpu.memory_space<smem>>
    %38 = vector.broadcast %37 : f32 to vector<16x128xf32>
    %39 = arith.mulf %36, %38 : vector<16x128xf32>
    %c1_17 = arith.constant 1 : index
    %40 = memref.load %arg6[%c1_17] : memref<8xf32, #tpu.memory_space<smem>>
    %41 = vector.broadcast %40 : f32 to vector<16x128xf32>
    %42 = arith.addf %39, %41 : vector<16x128xf32>
    %cst_18 = arith.constant 0.000000e+00 : f32
    %43 = vector.broadcast %cst_18 : f32 to vector<16x128xf32>
    %44 = arith.maximumf %42, %43 : vector<16x128xf32>
    %45 = vector.extract_strided_slice %15 {offsets = [2, 0, 0], sizes = [1, 16, 128], strides = [1, 1, 1]} : vector<8x16x128xf32> to vector<1x16x128xf32>
    %46 = vector.shape_cast %45 : vector<1x16x128xf32> to vector<16x128xf32>
    %47 = arith.mulf %46, %22 : vector<16x128xf32>
    %c2 = arith.constant 2 : index
    %48 = memref.load %arg5[%c2] : memref<8xf32, #tpu.memory_space<smem>>
    %49 = vector.broadcast %48 : f32 to vector<16x128xf32>
    %50 = arith.mulf %47, %49 : vector<16x128xf32>
    %c2_19 = arith.constant 2 : index
    %51 = memref.load %arg6[%c2_19] : memref<8xf32, #tpu.memory_space<smem>>
    %52 = vector.broadcast %51 : f32 to vector<16x128xf32>
    %53 = arith.addf %50, %52 : vector<16x128xf32>
    %cst_20 = arith.constant 0.000000e+00 : f32
    %54 = vector.broadcast %cst_20 : f32 to vector<16x128xf32>
    %55 = arith.maximumf %53, %54 : vector<16x128xf32>
    %56 = vector.extract_strided_slice %15 {offsets = [3, 0, 0], sizes = [1, 16, 128], strides = [1, 1, 1]} : vector<8x16x128xf32> to vector<1x16x128xf32>
    %57 = vector.shape_cast %56 : vector<1x16x128xf32> to vector<16x128xf32>
    %58 = arith.mulf %57, %22 : vector<16x128xf32>
    %c3 = arith.constant 3 : index
    %59 = memref.load %arg5[%c3] : memref<8xf32, #tpu.memory_space<smem>>
    %60 = vector.broadcast %59 : f32 to vector<16x128xf32>
    %61 = arith.mulf %58, %60 : vector<16x128xf32>
    %c3_21 = arith.constant 3 : index
    %62 = memref.load %arg6[%c3_21] : memref<8xf32, #tpu.memory_space<smem>>
    %63 = vector.broadcast %62 : f32 to vector<16x128xf32>
    %64 = arith.addf %61, %63 : vector<16x128xf32>
    %cst_22 = arith.constant 0.000000e+00 : f32
    %65 = vector.broadcast %cst_22 : f32 to vector<16x128xf32>
    %66 = arith.maximumf %64, %65 : vector<16x128xf32>
    %67 = vector.extract_strided_slice %15 {offsets = [4, 0, 0], sizes = [1, 16, 128], strides = [1, 1, 1]} : vector<8x16x128xf32> to vector<1x16x128xf32>
    %68 = vector.shape_cast %67 : vector<1x16x128xf32> to vector<16x128xf32>
    %69 = arith.mulf %68, %22 : vector<16x128xf32>
    %c4 = arith.constant 4 : index
    %70 = memref.load %arg5[%c4] : memref<8xf32, #tpu.memory_space<smem>>
    %71 = vector.broadcast %70 : f32 to vector<16x128xf32>
    %72 = arith.mulf %69, %71 : vector<16x128xf32>
    %c4_23 = arith.constant 4 : index
    %73 = memref.load %arg6[%c4_23] : memref<8xf32, #tpu.memory_space<smem>>
    %74 = vector.broadcast %73 : f32 to vector<16x128xf32>
    %75 = arith.addf %72, %74 : vector<16x128xf32>
    %cst_24 = arith.constant 0.000000e+00 : f32
    %76 = vector.broadcast %cst_24 : f32 to vector<16x128xf32>
    %77 = arith.maximumf %75, %76 : vector<16x128xf32>
    %78 = vector.extract_strided_slice %15 {offsets = [5, 0, 0], sizes = [1, 16, 128], strides = [1, 1, 1]} : vector<8x16x128xf32> to vector<1x16x128xf32>
    %79 = vector.shape_cast %78 : vector<1x16x128xf32> to vector<16x128xf32>
    %80 = arith.mulf %79, %22 : vector<16x128xf32>
    %c5 = arith.constant 5 : index
    %81 = memref.load %arg5[%c5] : memref<8xf32, #tpu.memory_space<smem>>
    %82 = vector.broadcast %81 : f32 to vector<16x128xf32>
    %83 = arith.mulf %80, %82 : vector<16x128xf32>
    %c5_25 = arith.constant 5 : index
    %84 = memref.load %arg6[%c5_25] : memref<8xf32, #tpu.memory_space<smem>>
    %85 = vector.broadcast %84 : f32 to vector<16x128xf32>
    %86 = arith.addf %83, %85 : vector<16x128xf32>
    %cst_26 = arith.constant 0.000000e+00 : f32
    %87 = vector.broadcast %cst_26 : f32 to vector<16x128xf32>
    %88 = arith.maximumf %86, %87 : vector<16x128xf32>
    %89 = vector.extract_strided_slice %15 {offsets = [6, 0, 0], sizes = [1, 16, 128], strides = [1, 1, 1]} : vector<8x16x128xf32> to vector<1x16x128xf32>
    %90 = vector.shape_cast %89 : vector<1x16x128xf32> to vector<16x128xf32>
    %91 = arith.mulf %90, %22 : vector<16x128xf32>
    %c6 = arith.constant 6 : index
    %92 = memref.load %arg5[%c6] : memref<8xf32, #tpu.memory_space<smem>>
    %93 = vector.broadcast %92 : f32 to vector<16x128xf32>
    %94 = arith.mulf %91, %93 : vector<16x128xf32>
    %c6_27 = arith.constant 6 : index
    %95 = memref.load %arg6[%c6_27] : memref<8xf32, #tpu.memory_space<smem>>
    %96 = vector.broadcast %95 : f32 to vector<16x128xf32>
    %97 = arith.addf %94, %96 : vector<16x128xf32>
    %cst_28 = arith.constant 0.000000e+00 : f32
    %98 = vector.broadcast %cst_28 : f32 to vector<16x128xf32>
    %99 = arith.maximumf %97, %98 : vector<16x128xf32>
    %100 = vector.extract_strided_slice %15 {offsets = [7, 0, 0], sizes = [1, 16, 128], strides = [1, 1, 1]} : vector<8x16x128xf32> to vector<1x16x128xf32>
    %101 = vector.shape_cast %100 : vector<1x16x128xf32> to vector<16x128xf32>
    %102 = arith.mulf %101, %22 : vector<16x128xf32>
    %c7 = arith.constant 7 : index
    %103 = memref.load %arg5[%c7] : memref<8xf32, #tpu.memory_space<smem>>
    %104 = vector.broadcast %103 : f32 to vector<16x128xf32>
    %105 = arith.mulf %102, %104 : vector<16x128xf32>
    %c7_29 = arith.constant 7 : index
    %106 = memref.load %arg6[%c7_29] : memref<8xf32, #tpu.memory_space<smem>>
    %107 = vector.broadcast %106 : f32 to vector<16x128xf32>
    %108 = arith.addf %105, %107 : vector<16x128xf32>
    %cst_30 = arith.constant 0.000000e+00 : f32
    %109 = vector.broadcast %cst_30 : f32 to vector<16x128xf32>
    %110 = arith.maximumf %108, %109 : vector<16x128xf32>
    %111 = vector.shape_cast %33 : vector<16x128xf32> to vector<1x16x128xf32>
    %112 = vector.shape_cast %44 : vector<16x128xf32> to vector<1x16x128xf32>
    %113 = vector.shape_cast %55 : vector<16x128xf32> to vector<1x16x128xf32>
    %114 = vector.shape_cast %66 : vector<16x128xf32> to vector<1x16x128xf32>
    %115 = vector.shape_cast %77 : vector<16x128xf32> to vector<1x16x128xf32>
    %116 = vector.shape_cast %88 : vector<16x128xf32> to vector<1x16x128xf32>
    %117 = vector.shape_cast %99 : vector<16x128xf32> to vector<1x16x128xf32>
    %118 = vector.shape_cast %110 : vector<16x128xf32> to vector<1x16x128xf32>
    %119 = tpu.concatenate %111, %112, %113, %114, %115, %116, %117, %118 in 0 : vector<1x16x128xf32>, vector<1x16x128xf32>, vector<1x16x128xf32>, vector<1x16x128xf32>, vector<1x16x128xf32>, vector<1x16x128xf32>, vector<1x16x128xf32>, vector<1x16x128xf32> -> vector<8x16x128xf32>
    %cst_31 = arith.constant 0.000000e+00 : f32
    %120 = vector.broadcast %cst_31 : f32 to vector<16x128xf32>
    %cst_32 = arith.constant 0.000000e+00 : f32
    %121 = vector.broadcast %cst_32 : f32 to vector<16x128xf32>
    %c0_i32_33 = arith.constant 0 : i32
    %c32_i32_34 = arith.constant 32 : i32
    %122 = arith.addi %c0_i32_33, %c32_i32_34 : i32
    %c1_i32_35 = arith.constant 1 : i32
    %123:2 = scf.for %arg16 = %c0_i32_33 to %122 step %c1_i32_35 iter_args(%arg17 = %120, %arg18 = %121) -> (vector<16x128xf32>, vector<16x128xf32>)  : i32 {
      %c8_i32 = arith.constant 8 : i32
      %167 = arith.muli %arg16, %c8_i32 : i32
      %c256_i32 = arith.constant 256 : i32
      %168 = arith.addi %c256_i32, %167 : i32
      %169 = tpu.assume_multiple %168, 8 : i32
      %170 = arith.index_cast %169 : i32 to index
      %c0_63 = arith.constant 0 : index
      %171 = vector.load %arg14[%170, %c0_63] : memref<512x128xf32, #tpu.memory_space<vmem>>, vector<8x128xf32>
      %172 = vector.shape_cast %171 : vector<8x128xf32> to vector<8x1x128xf32>
      %173 = vector.broadcast %172 : vector<8x1x128xf32> to vector<8x16x128xf32>
      %174 = arith.mulf %119, %173 : vector<8x16x128xf32>
      %cst_64 = arith.constant dense<0.000000e+00> : vector<16x128xf32>
      %175 = vector.multi_reduction <add>, %174, %cst_64 [0] : vector<8x16x128xf32> to vector<16x128xf32>
      %c16_i32 = arith.constant 16 : i32
      %176 = arith.muli %arg16, %c16_i32 : i32
      %177 = tpu.assume_multiple %176, 16 : i32
      %178 = arith.index_cast %177 : i32 to index
      %c0_65 = arith.constant 0 : index
      %179 = vector.load %arg15[%178, %c0_65] : memref<512x128xf32, #tpu.memory_space<vmem>>, vector<16x128xf32>
      tpu.vector_store %arg15[%178, %c0_65], %175 {strides = array<i32>} : memref<512x128xf32, #tpu.memory_space<vmem>>, vector<16x128xf32>,
      %180 = arith.addf %arg17, %175 : vector<16x128xf32>
      %181 = arith.mulf %175, %175 : vector<16x128xf32>
      %182 = arith.addf %arg18, %181 : vector<16x128xf32>
      scf.yield %180, %182 : vector<16x128xf32>, vector<16x128xf32>
    }
    %c32_i32_36 = arith.constant 32 : i32
    %cst_37 = arith.constant 3.125000e-02 : f32
    %124 = vector.broadcast %cst_37 : f32 to vector<16x128xf32>
    %125 = arith.mulf %123#0, %124 : vector<16x128xf32>
    %cst_38 = arith.constant 3.125000e-02 : f32
    %126 = vector.broadcast %cst_38 : f32 to vector<16x128xf32>
    %127 = arith.mulf %123#1, %126 : vector<16x128xf32>
    %128 = arith.mulf %125, %125 : vector<16x128xf32>
    %129 = arith.subf %127, %128 : vector<16x128xf32>
    %cst_39 = arith.constant 9.99999974E-6 : f32
    %130 = vector.broadcast %cst_39 : f32 to vector<16x128xf32>
    %131 = arith.addf %129, %130 : vector<16x128xf32>
    %132 = math.rsqrt %131 : vector<16x128xf32>
    %c0_i32_40 = arith.constant 0 : i32
    %c32_i32_41 = arith.constant 32 : i32
    %133 = arith.addi %c0_i32_40, %c32_i32_41 : i32
    %c1_i32_42 = arith.constant 1 : i32
    scf.for %arg16 = %c0_i32_40 to %133 step %c1_i32_42  : i32 {
      %c1_i32_63 = arith.constant 1 : i32
      %167 = arith.muli %arg16, %c1_i32_63 : i32
      %c0_i32_64 = arith.constant 0 : i32
      %168 = arith.addi %c0_i32_64, %167 : i32
      %c16_i32 = arith.constant 16 : i32
      %169 = arith.muli %168, %c16_i32 : i32
      %170 = tpu.assume_multiple %169, 16 : i32
      %171 = arith.index_cast %170 : i32 to index
      %c0_65 = arith.constant 0 : index
      %172 = vector.load %arg15[%171, %c0_65] : memref<512x128xf32, #tpu.memory_space<vmem>>, vector<16x128xf32>
      %173 = arith.subf %172, %125 : vector<16x128xf32>
      %174 = arith.mulf %173, %132 : vector<16x128xf32>
      %175 = arith.index_cast %168 : i32 to index
      %176 = memref.load %arg7[%175] : memref<32xf32, #tpu.memory_space<smem>>
      %177 = vector.broadcast %176 : f32 to vector<16x128xf32>
      %178 = arith.mulf %174, %177 : vector<16x128xf32>
      %179 = arith.index_cast %168 : i32 to index
      %180 = memref.load %arg8[%179] : memref<32xf32, #tpu.memory_space<smem>>
      %181 = vector.broadcast %180 : f32 to vector<16x128xf32>
      %182 = arith.addf %178, %181 : vector<16x128xf32>
      %cst_66 = arith.constant 0.000000e+00 : f32
      %183 = vector.broadcast %cst_66 : f32 to vector<16x128xf32>
      %184 = arith.maximumf %182, %183 : vector<16x128xf32>
      %185 = arith.index_cast %170 : i32 to index
      %c0_67 = arith.constant 0 : index
      %186 = vector.load %arg15[%185, %c0_67] : memref<512x128xf32, #tpu.memory_space<vmem>>, vector<16x128xf32>
      tpu.vector_store %arg15[%185, %c0_67], %184 {strides = array<i32>} : memref<512x128xf32, #tpu.memory_space<vmem>>, vector<16x128xf32>,
    }
    %c32_i32_43 = arith.constant 32 : i32
    %c0_44 = arith.constant 0 : index
    %c0_45 = arith.constant 0 : index
    %134 = vector.load %arg15[%c0_44, %c0_45] : memref<512x128xf32, #tpu.memory_space<vmem>>, vector<512x128xf32>
    %c0_46 = arith.constant 0 : index
    %c0_47 = arith.constant 0 : index
    %135 = vector.load %arg9[%c0_46, %c0_47] : memref<512x32xf32, #tpu.memory_space<vmem>>, vector<512x32xf32>
    %cst_48 = arith.constant dense<0.000000e+00> : vector<128x32xf32>
    %136 = tpu.matmul %134, %135, %cst_48 {dimension_numbers = #tpu.dot_dimension_numbers<[0], [0], [1], [1], [0, 1, 1, 1], [], []>} : vector<512x128xf32>, vector<512x32xf32>, vector<128x32xf32> -> vector<128x32xf32>
    %c0_49 = arith.constant 0 : index
    %c0_50 = arith.constant 0 : index
    %137 = vector.load %arg10[%c0_49, %c0_50] : memref<1x32xf32, #tpu.memory_space<vmem>>, vector<1x32xf32>
    %138 = vector.broadcast %137 : vector<1x32xf32> to vector<128x32xf32>
    %139 = arith.addf %136, %138 : vector<128x32xf32>
    %cst_51 = arith.constant dense<0.000000e+00> : vector<128xf32>
    %140 = vector.multi_reduction <add>, %139, %cst_51 [1] : vector<128x32xf32> to vector<128xf32>
    %141 = vector.shape_cast %140 : vector<128xf32> to vector<128x1xf32>
    %cst_52 = arith.constant 3.200000e+01 : f32
    %142 = vector.broadcast %cst_52 : f32 to vector<128x1xf32>
    %143 = arith.divf %141, %142 : vector<128x1xf32>
    %144 = vector.broadcast %143 : vector<128x1xf32> to vector<128x32xf32>
    %145 = arith.subf %139, %144 : vector<128x32xf32>
    %146 = arith.mulf %145, %145 : vector<128x32xf32>
    %cst_53 = arith.constant dense<0.000000e+00> : vector<128xf32>
    %147 = vector.multi_reduction <add>, %146, %cst_53 [1] : vector<128x32xf32> to vector<128xf32>
    %148 = vector.shape_cast %147 : vector<128xf32> to vector<128x1xf32>
    %cst_54 = arith.constant 3.200000e+01 : f32
    %149 = vector.broadcast %cst_54 : f32 to vector<128x1xf32>
    %150 = arith.divf %148, %149 : vector<128x1xf32>
    %151 = vector.broadcast %143 : vector<128x1xf32> to vector<128x32xf32>
    %152 = arith.subf %139, %151 : vector<128x32xf32>
    %cst_55 = arith.constant 9.99999974E-6 : f32
    %153 = vector.broadcast %cst_55 : f32 to vector<128x1xf32>
    %154 = arith.addf %150, %153 : vector<128x1xf32>
    %155 = math.rsqrt %154 : vector<128x1xf32>
    %156 = vector.broadcast %155 : vector<128x1xf32> to vector<128x32xf32>
    %157 = arith.mulf %152, %156 : vector<128x32xf32>
    %c0_56 = arith.constant 0 : index
    %c0_57 = arith.constant 0 : index
    %158 = vector.load %arg11[%c0_56, %c0_57] : memref<1x32xf32, #tpu.memory_space<vmem>>, vector<1x32xf32>
    %159 = vector.broadcast %158 : vector<1x32xf32> to vector<128x32xf32>
    %160 = arith.mulf %157, %159 : vector<128x32xf32>
    %c0_58 = arith.constant 0 : index
    %c0_59 = arith.constant 0 : index
    %161 = vector.load %arg12[%c0_58, %c0_59] : memref<1x32xf32, #tpu.memory_space<vmem>>, vector<1x32xf32>
    %162 = vector.broadcast %161 : vector<1x32xf32> to vector<128x32xf32>
    %163 = arith.addf %160, %162 : vector<128x32xf32>
    %cst_60 = arith.constant 0.000000e+00 : f32
    %164 = vector.broadcast %cst_60 : f32 to vector<128x32xf32>
    %165 = arith.maximumf %163, %164 : vector<128x32xf32>
    %c0_61 = arith.constant 0 : index
    %c0_62 = arith.constant 0 : index
    %166 = vector.load %arg13[%c0_61, %c0_62] : memref<128x32xf32, #tpu.memory_space<vmem>>, vector<128x32xf32>
    tpu.vector_store %arg13[%c0_61, %c0_62], %165 {strides = array<i32>} : memref<128x32xf32, #tpu.memory_space<vmem>>, vector<128x32xf32>,
    return
  }
  func.func @transform_0(%arg0: i32) -> (i32, i32) {
    %c0_i32 = arith.constant 0 : i32
    %c0_i32_0 = arith.constant 0 : i32
    return %c0_i32, %arg0 : i32, i32
  }
  func.func @transform_1(%arg0: i32) -> (i32, i32) {
    %c0_i32 = arith.constant 0 : i32
    %c0_i32_0 = arith.constant 0 : i32
    return %c0_i32, %arg0 : i32, i32
  }
  func.func @transform_2(%arg0: i32) -> (i32, i32) {
    %c0_i32 = arith.constant 0 : i32
    %c0_i32_0 = arith.constant 0 : i32
    %c0_i32_1 = arith.constant 0 : i32
    return %c0_i32, %c0_i32_0 : i32, i32
  }
  func.func @transform_3(%arg0: i32) -> (i32, i32) {
    %c0_i32 = arith.constant 0 : i32
    %c0_i32_0 = arith.constant 0 : i32
    %c0_i32_1 = arith.constant 0 : i32
    return %c0_i32, %c0_i32_0 : i32, i32
  }
  func.func @transform_4(%arg0: i32) -> i32 {
    %c0_i32 = arith.constant 0 : i32
    %c0_i32_0 = arith.constant 0 : i32
    return %c0_i32 : i32
  }
  func.func @transform_5(%arg0: i32) -> i32 {
    %c0_i32 = arith.constant 0 : i32
    %c0_i32_0 = arith.constant 0 : i32
    return %c0_i32 : i32
  }
  func.func @transform_6(%arg0: i32) -> i32 {
    %c0_i32 = arith.constant 0 : i32
    %c0_i32_0 = arith.constant 0 : i32
    return %c0_i32 : i32
  }
  func.func @transform_7(%arg0: i32) -> i32 {
    %c0_i32 = arith.constant 0 : i32
    %c0_i32_0 = arith.constant 0 : i32
    return %c0_i32 : i32
  }
  func.func @transform_8(%arg0: i32) -> (i32, i32) {
    %c0_i32 = arith.constant 0 : i32
    %c0_i32_0 = arith.constant 0 : i32
    %c0_i32_1 = arith.constant 0 : i32
    return %c0_i32, %c0_i32_0 : i32, i32
  }
  func.func @transform_9(%arg0: i32) -> (i32, i32) {
    %c0_i32 = arith.constant 0 : i32
    %c0_i32_0 = arith.constant 0 : i32
    %c0_i32_1 = arith.constant 0 : i32
    return %c0_i32, %c0_i32_0 : i32, i32
  }
  func.func @transform_10(%arg0: i32) -> (i32, i32) {
    %c0_i32 = arith.constant 0 : i32
    %c0_i32_0 = arith.constant 0 : i32
    %c0_i32_1 = arith.constant 0 : i32
    return %c0_i32, %c0_i32_0 : i32, i32
  }
  func.func @transform_11(%arg0: i32) -> (i32, i32) {
    %c0_i32 = arith.constant 0 : i32
    %c0_i32_0 = arith.constant 0 : i32
    %c0_i32_1 = arith.constant 0 : i32
    return %c0_i32, %c0_i32_0 : i32, i32
  }
  func.func @transform_12(%arg0: i32) -> (i32, i32) {
    %c0_i32 = arith.constant 0 : i32
    %c0_i32_0 = arith.constant 0 : i32
    return %arg0, %c0_i32 : i32, i32
  }
}

</mosaic_0001>

<bundles_post_ra>
// kernel: tpu_custom_call.1
= control target key start
LH: loop header
LB: loop body
LE: loop exit
PB: predicated region body
PF: predicated region fallthrough
CT: control target
= control target key end

     0   :  { %17 = vsyncpa [#allocation5], 0  ;;  %s5402_s0 = inlined_call_operand.vmem [shape: f32[32,128], index: 0, kind: input, shape index: {}]   ;;  %s5403_s1 = inlined_call_operand.vmem [shape: f32[512,128], index: 1, kind: input, shape index: {}]   ;;  %s5404_s2 = inlined_call_operand.vmem [shape: f32[512,32], index: 2, kind: input, shape index: {}]   ;;  %s5405_s3 = inlined_call_operand.vmem [shape: f32[512,1], index: 3, kind: input, shape index: {}]   ;;  %s5406_s4 = inlined_call_operand.vmem [shape: f32[8], index: 4, kind: input, shape index: {}]   ;;  %s5407_s5 = inlined_call_operand.vmem [shape: f32[8], index: 5, kind: input, shape index: {}]   ;;  %s5408_s6 = inlined_call_operand.vmem [shape: f32[32], index: 6, kind: input, shape index: {}]   ;;  %s5409_s7 = inlined_call_operand.vmem [shape: f32[32], index: 7, kind: input, shape index: {}]   ;;  %s5410_s8 = inlined_call_operand.vmem [shape: f32[512,32], index: 8, kind: input, shape index: {}]   ;;  %s5411_s9 = inlined_call_operand.vmem [shape: f32[1,32], index: 9, kind: input, shape index: {}]   ;;  %s5412_s10 = inlined_call_operand.vmem [shape: f32[1,32], index: 10, kind: input, shape index: {}]   ;;  %s5413_s11 = inlined_call_operand.vmem [shape: f32[1,32], index: 11, kind: input, shape index: {}]   ;;  %s5414_s12 = inlined_call_operand.vmem [shape: f32[128,32], index: 12, kind: output, shape index: {}]  }
   0x1   :  { %18 = vsyncpa [#allocation7], 0  ;;  %s44_s23 = sshll.u32 %s5407_s5, 4  ;;  %s45_s23 = int_to_ptr.vmem [resolvable:$true] %s44_s23 }
   0x2   :  { %19 = vsyncpa [#allocation10], 0  ;;  %s34_s26 = sshll.u32 %s5406_s4, 4  ;;  %s3579_s27 = scalar_lea.vmem %s45_s23, 16  ;;  %s35_s26 = int_to_ptr.vmem [resolvable:$true] %s34_s26 }
   0x3   :  { %p3580_p0 = scmp.ne.s32.totalorder %s45_s23, %s3579_s27  ;;  %p3584_p1 = scmp.lt.s32.totalorder %s45_s23, %s45_s23 }
   0x4   :  { %p3585_p2 = scmp.lt.s32.totalorder %s3579_s27, %s3579_s27 }
   0x6   :  { %p3586_p3 = por %p3585_p2, %p3584_p1 }
   0x8   :  { %p3587_p4 = pnand %p3586_p3, %p3580_p0 }
   0xa   :  { %3590 = shalt.err (!%p3587_p4)
}
   0xb   :  { %s3817_s28 = smov [#allocation6]   ;;  %s3591_s29 = scalar_lea.vmem %s35_s26, 16 }
   0xc   :  { %47 = dma.vmem_to_smem %s45_s23, 16, %s3817_s28, [#allocation7]  }
   0xd   :  { %p3592_p5 = scmp.ne.s32.totalorder %s35_s26, %s3591_s29  ;;  %p3596_p6 = scmp.lt.s32.totalorder %s35_s26, %s35_s26 }
   0xe   :  { %p3597_p7 = scmp.lt.s32.totalorder %s3591_s29, %s3591_s29 }
  0x10   :  { %p3598_p8 = por %p3597_p7, %p3596_p6 }
  0x12   :  { %p3599_p9 = pnand %p3598_p8, %p3592_p5 }
  0x14   :  { %3602 = shalt.err (!%p3599_p9)
}
  0x15   :  { %s3818_s5 = smov [#allocation4]   ;;  %s54_s13 = sshll.u32 %s5408_s6, 4  ;;  %s55_s13 = int_to_ptr.vmem [resolvable:$true] %s54_s13 }
  0x16   :  { %37 = dma.vmem_to_smem %s35_s26, 16, %s3818_s5, [#allocation5]  }
  0x17   :  { %s64_s16 = sshll.u32 %s5409_s7, 4  ;;  %s3603_s17 = scalar_lea.vmem %s55_s13, 16  ;;  %s65_s16 = int_to_ptr.vmem [resolvable:$true] %s64_s16 }
  0x18   :  { %p3604_p10 = scmp.ne.s32.totalorder %s55_s13, %s3603_s17  ;;  %p3608_p11 = scmp.lt.s32.totalorder %s55_s13, %s55_s13 }
  0x19   :  { %p3609_p12 = scmp.lt.s32.totalorder %s3603_s17, %s3603_s17 }
  0x1b   :  { %p3610_p13 = por %p3609_p12, %p3608_p11 }
  0x1d   :  { %p3611_p0 = pnand %p3610_p13, %p3604_p10 }
  0x1f   :  { %3614 = shalt.err (!%p3611_p0)
}
  0x20   :  { %s3819_s18 = smov [#allocation8]   ;;  %s3615_s19 = scalar_lea.vmem %s65_s16, 16 }
  0x21   :  { %57 = dma.vmem_to_smem %s55_s13, 16, %s3819_s18, [#allocation7]  }
  0x22   :  { %p3616_p1 = scmp.ne.s32.totalorder %s65_s16, %s3615_s19  ;;  %p3620_p2 = scmp.lt.s32.totalorder %s65_s16, %s65_s16 }
  0x23   :  { %p3621_p3 = scmp.lt.s32.totalorder %s3615_s19, %s3615_s19 }
  0x25   :  { %p3622_p4 = por %p3621_p3, %p3620_p2 }
  0x27   :  { %p3623_p5 = pnand %p3622_p4, %p3616_p1 }
  0x29   :  { %3626 = shalt.err (!%p3623_p5)
}
  0x2a   :  { %s3820_s6 = smov [#allocation9]  }
  0x2b   :  { %67 = dma.vmem_to_smem %s65_s16, 16, %s3820_s6, [#allocation10]  }
  0x2c   :  { %3719 = dma.done.wait [#allocation5], 16  }
  0x2d   :  { %3720 = vsyncadd [#allocation5], 4294967280 }
  0x2e   :  { %3721 = dma.done.wait [#allocation7], 32  }
  0x2f   :  { %3722 = vsyncadd [#allocation7], 4294967264 }
  0x30   :  { %3723 = dma.done.wait [#allocation10], 16  }
  0x31   :  { %3724 = vsyncadd [#allocation10], 4294967280 }
  0x32   :  { %88 = sfence }
  0x33   :  { %v159_v0 = vld [vmem:[%s5405_s3 + $0x10] sm:$0xff]  ;;  %v157_v1 = vld [vmem:[%s5405_s3] sm:$0xff]  ;;  %v3821_v3 = vmov 0   ;;  %v154_v4 = vld [vmem:[%s5402_s0 + $0x8] sm:$0xff]  ;;  %vm541_vm0 = vcmask 261120  }
  0x34   :  { %v153_v2 = vld [vmem:[%s5402_s0] sm:$0xff]  ;;  %3312 = vset.pattern.permute.xlu1 %v3821_v3  ;;  %3311 = vset.pattern.permute.xlu0 %v3821_v3  ;;  %v155_v6 = vld [vmem:[%s5402_s0 + $0x10] sm:$0xff]  ;;  %v156_v7 = vld [vmem:[%s5402_s0 + $0x18] sm:$0xff] }
  0x35   :  { %233 = vperm.xlu1 %3312, %v159_v0   ;;  %223 = vperm.xlu0 %3311, %v157_v1   ;;  %v3033_v5 = vpack.c.bf16 %v154_v4, %v153_v2  ;;  %v160_v8 = vld [vmem:[%s5405_s3 + $0x18] sm:$0xff]  ;;  %v158_v9 = vld [vmem:[%s5405_s3 + $0x8] sm:$0xff]  ;;  %v3037_v10 = vpack.c.bf16 %v156_v7, %v155_v6  ;;  %v89_v11 = vld [vmem:[%s5404_s2] sm:$0xff] }
  0x36   :  { %2937 = vmatprep.mubr.msk.f32.mxu0 %vm541_vm0, %v89_v11  ;;  %v162_v12 = vld [vmem:[%s5405_s3 + $0x28] sm:$0xff]  ;;  %v161_v13 = vld [vmem:[%s5405_s3 + $0x20] sm:$0xff]  ;;  %v91_v15 = vld [vmem:[%s5404_s2 + $0x10] sm:$0xff] }
  0x37   :  { %3034 = vmatprep.subr.bf16.mxu0 %v3033_v5  ;;  %v90_v14 = vld [vmem:[%s5404_s2 + $0x8] sm:$0xff]  ;;  %v164_v16 = vld [vmem:[%s5405_s3 + $0x38] sm:$0xff]  ;;  %v163_v17 = vld [vmem:[%s5405_s3 + $0x30] sm:$0xff] }
  0x38   :  { %3036 = vmatpush3.bf16.msra.mxu0 %v3033_v5  ;;  %v92_v18 = vld [vmem:[%s5404_s2 + $0x18] sm:$0xff]  ;;  %v93_v19 = vld [vmem:[%s5404_s2 + $0x20] sm:$0xff]  ;;  %v166_v20 = vld [vmem:[%s5405_s3 + $0x48] sm:$0xff] }
  0x39   :  { %238 = vperm.xlu1 %3312, %v160_v8   ;;  %228 = vperm.xlu0 %3311, %v158_v9   ;;  %v165_v21 = vld [vmem:[%s5405_s3 + $0x40] sm:$0xff]  ;;  %v94_v22 = vld [vmem:[%s5404_s2 + $0x28] sm:$0xff]  ;;  %v95_v23 = vld [vmem:[%s5404_s2 + $0x30] sm:$0xff] }
  0x3a   :  { %3038 = vmatprep.subr.bf16.mxu0 %v3037_v10  ;;  %v168_v24 = vld [vmem:[%s5405_s3 + $0x58] sm:$0xff]  ;;  %v167_v25 = vld [vmem:[%s5405_s3 + $0x50] sm:$0xff]  ;;  %v97_v27 = vld [vmem:[%s5404_s2 + $0x40] sm:$0xff] }
  0x3b   :  { %v96_v26 = vld [vmem:[%s5404_s2 + $0x38] sm:$0xff]  ;;  %v170_v28 = vld [vmem:[%s5405_s3 + $0x68] sm:$0xff]  ;;  %v169_v29 = vld [vmem:[%s5405_s3 + $0x60] sm:$0xff] }
  0x3c   :  { %3040 = vmatpush3.bf16.msra.mxu0 %v3037_v10  ;;  %v98_v30 = vld [vmem:[%s5404_s2 + $0x48] sm:$0xff]  ;;  %v99_v31 = vld [vmem:[%s5404_s2 + $0x50] sm:$0xff]  ;;  %v172_v32 = vld [vmem:[%s5405_s3 + $0x78] sm:$0xff] }
  0x3d   :  { %248 = vperm.xlu1 %3312, %v162_v12   ;;  %243 = vperm.xlu0 %3311, %v161_v13   ;;  %v171_v33 = vld [vmem:[%s5405_s3 + $0x70] sm:$0xff]  ;;  %v100_v34 = vld [vmem:[%s5404_s2 + $0x58] sm:$0xff]  ;;  %v101_v35 = vld [vmem:[%s5404_s2 + $0x60] sm:$0xff] }
  0x3e   :  { %v174_v36 = vld [vmem:[%s5405_s3 + $0x88] sm:$0xff]  ;;  %v173_v37 = vld [vmem:[%s5405_s3 + $0x80] sm:$0xff]  ;;  %v103_v39 = vld [vmem:[%s5404_s2 + $0x70] sm:$0xff] }
  0x3f   :  { %2938 = vmatmul.mubr.msk.f32.vlgmr.msra.gmra.mrb[0].mxu0 %vm541_vm0, %v90_v14  ;;  %v102_v38 = vld [vmem:[%s5404_s2 + $0x68] sm:$0xff]  ;;  %v176_v40 = vld [vmem:[%s5405_s3 + $0x98] sm:$0xff]  ;;  %v175_v41 = vld [vmem:[%s5405_s3 + $0x90] sm:$0xff] }
  0x40   :  { %2940 = vmatprep.mubr.msk.f32.mxu0 %vm541_vm0, %v91_v15  ;;  %v104_v42 = vld [vmem:[%s5404_s2 + $0x78] sm:$0xff]  ;;  %v105_v43 = vld [vmem:[%s5404_s2 + $0x80] sm:$0xff]  ;;  %v178_v44 = vld [vmem:[%s5405_s3 + $0xa8] sm:$0xff] }
  0x41   :  { %258 = vperm.xlu1 %3312, %v164_v16   ;;  %253 = vperm.xlu0 %3311, %v163_v17   ;;  %v177_v45 = vld [vmem:[%s5405_s3 + $0xa0] sm:$0xff]  ;;  %v106_v46 = vld [vmem:[%s5404_s2 + $0x88] sm:$0xff]  ;;  %v107_v47 = vld [vmem:[%s5404_s2 + $0x90] sm:$0xff] }
  0x42   :  { %v180_v48 = vld [vmem:[%s5405_s3 + $0xb8] sm:$0xff]  ;;  %v179_v49 = vld [vmem:[%s5405_s3 + $0xb0] sm:$0xff]  ;;  %v109_v51 = vld [vmem:[%s5404_s2 + $0xa0] sm:$0xff] }
  0x43   :  { %2941 = vmatmul.mubr.msk.f32.gmra.mrb[2].mxu0 %vm541_vm0, %v92_v18  ;;  %v108_v50 = vld [vmem:[%s5404_s2 + $0x98] sm:$0xff]  ;;  %v182_v52 = vld [vmem:[%s5405_s3 + $0xc8] sm:$0xff]  ;;  %v181_v53 = vld [vmem:[%s5405_s3 + $0xc0] sm:$0xff] }
  0x44   :  { %2943 = vmatprep.mubr.msk.f32.mxu0 %vm541_vm0, %v93_v19  ;;  %v110_v54 = vld [vmem:[%s5404_s2 + $0xa8] sm:$0xff]  ;;  %v111_v55 = vld [vmem:[%s5404_s2 + $0xb0] sm:$0xff]  ;;  %v184_v56 = vld [vmem:[%s5405_s3 + $0xd8] sm:$0xff] }
  0x45   :  { %268 = vperm.xlu1 %3312, %v166_v20   ;;  %263 = vperm.xlu0 %3311, %v165_v21   ;;  %v183_v57 = vld [vmem:[%s5405_s3 + $0xd0] sm:$0xff]  ;;  %v112_v58 = vld [vmem:[%s5404_s2 + $0xb8] sm:$0xff]  ;;  %v113_v59 = vld [vmem:[%s5404_s2 + $0xc0] sm:$0xff] }
  0x46   :  { %v186_v60 = vld [vmem:[%s5405_s3 + $0xe8] sm:$0xff]  ;;  %v185_v61 = vld [vmem:[%s5405_s3 + $0xe0] sm:$0xff]  ;;  %v115_v63 = vld [vmem:[%s5404_s2 + $0xd0] sm:$0xff] }
  0x47   :  { %2944 = vmatmul.mubr.msk.f32.gmra.mrb[4].mxu0 %vm541_vm0, %v94_v22  ;;  %v114_v62 = vld [vmem:[%s5404_s2 + $0xc8] sm:$0xff]  ;;  %v188_v0 = vld [vmem:[%s5405_s3 + $0xf8] sm:$0xff]  ;;  %v187_v1 = vld [vmem:[%s5405_s3 + $0xf0] sm:$0xff] }
  0x48   :  { %2946 = vmatprep.mubr.msk.f32.mxu0 %vm541_vm0, %v95_v23  ;;  %v116_v2 = vld [vmem:[%s5404_s2 + $0xd8] sm:$0xff]  ;;  %v117_v3 = vld [vmem:[%s5404_s2 + $0xe0] sm:$0xff]  ;;  %v190_v4 = vld [vmem:[%s5405_s3 + $0x108] sm:$0xff] }
  0x49   :  { %278 = vperm.xlu1 %3312, %v168_v24   ;;  %273 = vperm.xlu0 %3311, %v167_v25   ;;  %v189_v5 = vld [vmem:[%s5405_s3 + $0x100] sm:$0xff]  ;;  %v118_v6 = vld [vmem:[%s5404_s2 + $0xe8] sm:$0xff]  ;;  %v119_v7 = vld [vmem:[%s5404_s2 + $0xf0] sm:$0xff] }
  0x4a   :  { %v192_v8 = vld [vmem:[%s5405_s3 + $0x118] sm:$0xff]  ;;  %v191_v9 = vld [vmem:[%s5405_s3 + $0x110] sm:$0xff]  ;;  %v121_v11 = vld [vmem:[%s5404_s2 + $0x100] sm:$0xff] }
  0x4b   :  { %2947 = vmatmul.mubr.msk.f32.gmra.mrb[6].mxu0 %vm541_vm0, %v96_v26  ;;  %v120_v10 = vld [vmem:[%s5404_s2 + $0xf8] sm:$0xff]  ;;  %v194_v12 = vld [vmem:[%s5405_s3 + $0x128] sm:$0xff]  ;;  %v193_v13 = vld [vmem:[%s5405_s3 + $0x120] sm:$0xff] }
  0x4c   :  { %2949 = vmatprep.mubr.msk.f32.mxu0 %vm541_vm0, %v97_v27  ;;  %v122_v14 = vld [vmem:[%s5404_s2 + $0x108] sm:$0xff]  ;;  %v123_v15 = vld [vmem:[%s5404_s2 + $0x110] sm:$0xff]  ;;  %v196_v16 = vld [vmem:[%s5405_s3 + $0x138] sm:$0xff] }
  0x4d   :  { %288 = vperm.xlu1 %3312, %v170_v28   ;;  %283 = vperm.xlu0 %3311, %v169_v29   ;;  %v195_v17 = vld [vmem:[%s5405_s3 + $0x130] sm:$0xff]  ;;  %v124_v18 = vld [vmem:[%s5404_s2 + $0x118] sm:$0xff]  ;;  %v125_v19 = vld [vmem:[%s5404_s2 + $0x120] sm:$0xff] }
  0x4e   :  { %v198_v20 = vld [vmem:[%s5405_s3 + $0x148] sm:$0xff]  ;;  %v197_v21 = vld [vmem:[%s5405_s3 + $0x140] sm:$0xff]  ;;  %v127_v23 = vld [vmem:[%s5404_s2 + $0x130] sm:$0xff] }
  0x4f   :  { %2950 = vmatmul.mubr.msk.f32.gmra.mrb[8].mxu0 %vm541_vm0, %v98_v30  ;;  %v126_v22 = vld [vmem:[%s5404_s2 + $0x128] sm:$0xff]  ;;  %v200_v24 = vld [vmem:[%s5405_s3 + $0x158] sm:$0xff]  ;;  %v199_v25 = vld [vmem:[%s5405_s3 + $0x150] sm:$0xff] }
  0x50   :  { %2952 = vmatprep.mubr.msk.f32.mxu0 %vm541_vm0, %v99_v31  ;;  %v128_v26 = vld [vmem:[%s5404_s2 + $0x138] sm:$0xff]  ;;  %v129_v27 = vld [vmem:[%s5404_s2 + $0x140] sm:$0xff]  ;;  %v202_v28 = vld [vmem:[%s5405_s3 + $0x168] sm:$0xff] }
  0x51   :  { %298 = vperm.xlu1 %3312, %v172_v32   ;;  %293 = vperm.xlu0 %3311, %v171_v33   ;;  %v201_v29 = vld [vmem:[%s5405_s3 + $0x160] sm:$0xff]  ;;  %v130_v30 = vld [vmem:[%s5404_s2 + $0x148] sm:$0xff]  ;;  %v131_v31 = vld [vmem:[%s5404_s2 + $0x150] sm:$0xff] }
  0x52   :  { %v204_v32 = vld [vmem:[%s5405_s3 + $0x178] sm:$0xff]  ;;  %v203_v33 = vld [vmem:[%s5405_s3 + $0x170] sm:$0xff] }
  0x53   :  { %2953 = vmatmul.mubr.msk.f32.gmra.mrb[10].mxu0 %vm541_vm0, %v100_v34  ;;  %v132_v34 = vld [vmem:[%s5404_s2 + $0x158] sm:$0xff] }
  0x54   :  { %2955 = vmatprep.mubr.msk.f32.mxu0 %vm541_vm0, %v101_v35  ;;  %v133_v35 = vld [vmem:[%s5404_s2 + $0x160] sm:$0xff] }
  0x55   :  { %308 = vperm.xlu1 %3312, %v174_v36   ;;  %303 = vperm.xlu0 %3311, %v173_v37   ;;  %v206_v36 = vld [vmem:[%s5405_s3 + $0x188] sm:$0xff]  ;;  %v205_v37 = vld [vmem:[%s5405_s3 + $0x180] sm:$0xff] }
  0x57   :  { %2956 = vmatmul.mubr.msk.f32.gmra.mrb[12].mxu0 %vm541_vm0, %v102_v38  ;;  %v134_v38 = vld [vmem:[%s5404_s2 + $0x168] sm:$0xff] }
  0x58   :  { %2958 = vmatprep.mubr.msk.f32.mxu0 %vm541_vm0, %v103_v39  ;;  %v135_v39 = vld [vmem:[%s5404_s2 + $0x170] sm:$0xff] }
  0x59   :  { %318 = vperm.xlu1 %3312, %v176_v40   ;;  %313 = vperm.xlu0 %3311, %v175_v41   ;;  %v208_v40 = vld [vmem:[%s5405_s3 + $0x198] sm:$0xff]  ;;  %v207_v41 = vld [vmem:[%s5405_s3 + $0x190] sm:$0xff] }
  0x5b   :  { %2959 = vmatmul.mubr.msk.f32.gmra.mrb[14].mxu0 %vm541_vm0, %v104_v42  ;;  %v136_v42 = vld [vmem:[%s5404_s2 + $0x178] sm:$0xff] }
  0x5c   :  { %2961 = vmatprep.mubr.msk.f32.mxu0 %vm541_vm0, %v105_v43  ;;  %v137_v43 = vld [vmem:[%s5404_s2 + $0x180] sm:$0xff] }
  0x5d   :  { %328 = vperm.xlu1 %3312, %v178_v44   ;;  %323 = vperm.xlu0 %3311, %v177_v45   ;;  %v210_v44 = vld [vmem:[%s5405_s3 + $0x1a8] sm:$0xff]  ;;  %v209_v45 = vld [vmem:[%s5405_s3 + $0x1a0] sm:$0xff] }
  0x5f   :  { %2962 = vmatmul.mubr.msk.f32.gmra.mrb[16].mxu0 %vm541_vm0, %v106_v46  ;;  %v138_v46 = vld [vmem:[%s5404_s2 + $0x188] sm:$0xff] }
  0x60   :  { %2964 = vmatprep.mubr.msk.f32.mxu0 %vm541_vm0, %v107_v47  ;;  %v139_v47 = vld [vmem:[%s5404_s2 + $0x190] sm:$0xff] }
  0x61   :  { %338 = vperm.xlu1 %3312, %v180_v48   ;;  %333 = vperm.xlu0 %3311, %v179_v49   ;;  %v212_v48 = vld [vmem:[%s5405_s3 + $0x1b8] sm:$0xff]  ;;  %v211_v49 = vld [vmem:[%s5405_s3 + $0x1b0] sm:$0xff] }
  0x63   :  { %2965 = vmatmul.mubr.msk.f32.gmra.mrb[18].mxu0 %vm541_vm0, %v108_v50  ;;  %v140_v50 = vld [vmem:[%s5404_s2 + $0x198] sm:$0xff] }
  0x64   :  { %2967 = vmatprep.mubr.msk.f32.mxu0 %vm541_vm0, %v109_v51  ;;  %v141_v51 = vld [vmem:[%s5404_s2 + $0x1a0] sm:$0xff] }
  0x65   :  { %348 = vperm.xlu1 %3312, %v182_v52   ;;  %343 = vperm.xlu0 %3311, %v181_v53   ;;  %v214_v52 = vld [vmem:[%s5405_s3 + $0x1c8] sm:$0xff]  ;;  %v213_v53 = vld [vmem:[%s5405_s3 + $0x1c0] sm:$0xff] }
  0x67   :  { %2968 = vmatmul.mubr.msk.f32.gmra.mrb[20].mxu0 %vm541_vm0, %v110_v54  ;;  %v142_v54 = vld [vmem:[%s5404_s2 + $0x1a8] sm:$0xff] }
  0x68   :  { %2970 = vmatprep.mubr.msk.f32.mxu0 %vm541_vm0, %v111_v55  ;;  %v143_v55 = vld [vmem:[%s5404_s2 + $0x1b0] sm:$0xff] }
  0x69   :  { %358 = vperm.xlu1 %3312, %v184_v56   ;;  %353 = vperm.xlu0 %3311, %v183_v57   ;;  %v216_v56 = vld [vmem:[%s5405_s3 + $0x1d8] sm:$0xff]  ;;  %v215_v57 = vld [vmem:[%s5405_s3 + $0x1d0] sm:$0xff] }
  0x6b   :  { %2971 = vmatmul.mubr.msk.f32.gmra.mrb[22].mxu0 %vm541_vm0, %v112_v58  ;;  %v144_v58 = vld [vmem:[%s5404_s2 + $0x1b8] sm:$0xff] }
  0x6c   :  { %2973 = vmatprep.mubr.msk.f32.mxu0 %vm541_vm0, %v113_v59  ;;  %v145_v59 = vld [vmem:[%s5404_s2 + $0x1c0] sm:$0xff] }
  0x6d   :  { %368 = vperm.xlu1 %3312, %v186_v60   ;;  %363 = vperm.xlu0 %3311, %v185_v61   ;;  %v218_v60 = vld [vmem:[%s5405_s3 + $0x1e8] sm:$0xff]  ;;  %v217_v61 = vld [vmem:[%s5405_s3 + $0x1e0] sm:$0xff] }
  0x6f   :  { %2974 = vmatmul.mubr.msk.f32.gmra.mrb[24].mxu0 %vm541_vm0, %v114_v62  ;;  %v146_v62 = vld [vmem:[%s5404_s2 + $0x1c8] sm:$0xff] }
  0x70   :  { %2976 = vmatprep.mubr.msk.f32.mxu0 %vm541_vm0, %v115_v63  ;;  %v147_v63 = vld [vmem:[%s5404_s2 + $0x1d0] sm:$0xff] }
  0x71   :  { %378 = vperm.xlu1 %3312, %v188_v0   ;;  %373 = vperm.xlu0 %3311, %v187_v1   ;;  %v220_v0 = vld [vmem:[%s5405_s3 + $0x1f8] sm:$0xff]  ;;  %v219_v1 = vld [vmem:[%s5405_s3 + $0x1f0] sm:$0xff] }
  0x73   :  { %2977 = vmatmul.mubr.msk.f32.gmra.mrb[26].mxu0 %vm541_vm0, %v116_v2  ;;  %v148_v2 = vld [vmem:[%s5404_s2 + $0x1d8] sm:$0xff] }
  0x74   :  { %2979 = vmatprep.mubr.msk.f32.mxu0 %vm541_vm0, %v117_v3  ;;  %v149_v3 = vld [vmem:[%s5404_s2 + $0x1e0] sm:$0xff] }
  0x75   :  { %388 = vperm.xlu1 %3312, %v190_v4   ;;  %383 = vperm.xlu0 %3311, %v189_v5   ;;  %v150_v4 = vld [vmem:[%s5404_s2 + $0x1e8] sm:$0xff]  ;;  %v151_v5 = vld [vmem:[%s5404_s2 + $0x1f0] sm:$0xff] }
  0x77   :  { %2980 = vmatmul.mubr.msk.f32.gmra.mrb[28].mxu0 %vm541_vm0, %v118_v6  ;;  %v152_v6 = vld [vmem:[%s5404_s2 + $0x1f8] sm:$0xff]  ;;  %s4434_s2 = smov 0  }
  0x78   :  { %2982 = vmatprep.mubr.msk.f32.mxu0 %vm541_vm0, %v119_v7 }
  0x79   :  { %398 = vperm.xlu1 %3312, %v192_v8   ;;  %393 = vperm.xlu0 %3311, %v191_v9  }
  0x7b   :  { %2983 = vmatmul.mubr.msk.f32.gmra.mrb[30].mxu0 %vm541_vm0, %v120_v10 }
  0x7c   :  { %2985 = vmatprep.mubr.msk.f32.mxu0 %vm541_vm0, %v121_v11 }
  0x7d   :  { %408 = vperm.xlu1 %3312, %v194_v12   ;;  %403 = vperm.xlu0 %3311, %v193_v13  }
  0x7f   :  { %2986 = vmatmul.mubr.msk.f32.gmra.mrb[32].mxu0 %vm541_vm0, %v122_v14 }
  0x80   :  { %2988 = vmatprep.mubr.msk.f32.mxu0 %vm541_vm0, %v123_v15 }
  0x81   :  { %418 = vperm.xlu1 %3312, %v196_v16   ;;  %413 = vperm.xlu0 %3311, %v195_v17  }
  0x83   :  { %2989 = vmatmul.mubr.msk.f32.gmra.mrb[34].mxu0 %vm541_vm0, %v124_v18 }
  0x84   :  { %2991 = vmatprep.mubr.msk.f32.mxu0 %vm541_vm0, %v125_v19 }
  0x85   :  { %428 = vperm.xlu1 %3312, %v198_v20   ;;  %423 = vperm.xlu0 %3311, %v197_v21  }
  0x87   :  { %2992 = vmatmul.mubr.msk.f32.gmra.mrb[36].mxu0 %vm541_vm0, %v126_v22 }
  0x88   :  { %2994 = vmatprep.mubr.msk.f32.mxu0 %vm541_vm0, %v127_v23 }
  0x89   :  { %438 = vperm.xlu1 %3312, %v200_v24   ;;  %433 = vperm.xlu0 %3311, %v199_v25  }
  0x8b   :  { %2995 = vmatmul.mubr.msk.f32.gmra.mrb[38].mxu0 %vm541_vm0, %v128_v26 }
  0x8c   :  { %2997 = vmatprep.mubr.msk.f32.mxu0 %vm541_vm0, %v129_v27 }
  0x8d   :  { %448 = vperm.xlu1 %3312, %v202_v28   ;;  %443 = vperm.xlu0 %3311, %v201_v29  }
  0x8f   :  { %2998 = vmatmul.mubr.msk.f32.gmra.mrb[40].mxu0 %vm541_vm0, %v130_v30 }
  0x90   :  { %3000 = vmatprep.mubr.msk.f32.mxu0 %vm541_vm0, %v131_v31 }
  0x91   :  { %458 = vperm.xlu1 %3312, %v204_v32   ;;  %453 = vperm.xlu0 %3311, %v203_v33  }
  0x93   :  { %3001 = vmatmul.mubr.msk.f32.gmra.mrb[42].mxu0 %vm541_vm0, %v132_v34 }
  0x94   :  { %3003 = vmatprep.mubr.msk.f32.mxu0 %vm541_vm0, %v133_v35 }
  0x95   :  { %468 = vperm.xlu1 %3312, %v206_v36   ;;  %463 = vperm.xlu0 %3311, %v205_v37  }
  0x97   :  { %3004 = vmatmul.mubr.msk.f32.gmra.mrb[44].mxu0 %vm541_vm0, %v134_v38 }
  0x98   :  { %3006 = vmatprep.mubr.msk.f32.mxu0 %vm541_vm0, %v135_v39 }
  0x99   :  { %478 = vperm.xlu1 %3312, %v208_v40   ;;  %473 = vperm.xlu0 %3311, %v207_v41  }
  0x9b   :  { %3007 = vmatmul.mubr.msk.f32.gmra.mrb[46].mxu0 %vm541_vm0, %v136_v42 }
  0x9c   :  { %3009 = vmatprep.mubr.msk.f32.mxu0 %vm541_vm0, %v137_v43 }
  0x9d   :  { %488 = vperm.xlu1 %3312, %v210_v44   ;;  %483 = vperm.xlu0 %3311, %v209_v45  }
  0x9f   :  { %3010 = vmatmul.mubr.msk.f32.gmra.mrb[48].mxu0 %vm541_vm0, %v138_v46 }
  0xa0   :  { %3012 = vmatprep.mubr.msk.f32.mxu0 %vm541_vm0, %v139_v47 }
  0xa1   :  { %498 = vperm.xlu1 %3312, %v212_v48   ;;  %493 = vperm.xlu0 %3311, %v211_v49  }
  0xa3   :  { %3013 = vmatmul.mubr.msk.f32.gmra.mrb[50].mxu0 %vm541_vm0, %v140_v50 }
  0xa4   :  { %3015 = vmatprep.mubr.msk.f32.mxu0 %vm541_vm0, %v141_v51 }
  0xa5   :  { %508 = vperm.xlu1 %3312, %v214_v52   ;;  %503 = vperm.xlu0 %3311, %v213_v53  }
  0xa7   :  { %3016 = vmatmul.mubr.msk.f32.gmra.mrb[52].mxu0 %vm541_vm0, %v142_v54 }
  0xa8   :  { %3018 = vmatprep.mubr.msk.f32.mxu0 %vm541_vm0, %v143_v55 }
  0xa9   :  { %518 = vperm.xlu1 %3312, %v216_v56   ;;  %513 = vperm.xlu0 %3311, %v215_v57  }
  0xab   :  { %3019 = vmatmul.mubr.msk.f32.gmra.mrb[54].mxu0 %vm541_vm0, %v144_v58 }
  0xac   :  { %3021 = vmatprep.mubr.msk.f32.mxu0 %vm541_vm0, %v145_v59 }
  0xad   :  { %528 = vperm.xlu1 %3312, %v218_v60   ;;  %523 = vperm.xlu0 %3311, %v217_v61  }
  0xaf   :  { %3022 = vmatmul.mubr.msk.f32.gmra.mrb[56].mxu0 %vm541_vm0, %v146_v62 }
  0xb0   :  { %3024 = vmatprep.mubr.msk.f32.mxu0 %vm541_vm0, %v147_v63 }
  0xb1   :  { %538 = vperm.xlu1 %3312, %v220_v0   ;;  %533 = vperm.xlu0 %3311, %v219_v1  }
  0xb3   :  { %3025 = vmatmul.mubr.msk.f32.gmra.mrb[58].mxu0 %vm541_vm0, %v148_v2 }
  0xb4   :  { %3027 = vmatprep.mubr.msk.f32.mxu0 %vm541_vm0, %v149_v3  ;;  %v234_v7 = vpop.permute.xlu1 %233  ;;  %v224_v8 = vpop.permute.xlu0 %223 }
  0xb7   :  { %3028 = vmatmul.mubr.msk.f32.gmra.mrb[60].mxu0 %vm541_vm0, %v150_v4 }
  0xb8   :  { %3030 = vmatprep.mubr.msk.f32.mxu0 %vm541_vm0, %v151_v5  ;;  %v239_v9 = vpop.permute.xlu1 %238  ;;  %v229_v10 = vpop.permute.xlu0 %228 }
  0xbb   :  { %3031 = vmatmul.mubr.msk.f32.gmra.mrb[62].mxu0 %vm541_vm0, %v152_v6 }
  0xbc   :  { %v249_v11 = vpop.permute.xlu1 %248  ;;  %v244_v12 = vpop.permute.xlu0 %243 }
  0xc0   :  { %v259_v13 = vpop.permute.xlu1 %258  ;;  %v254_v14 = vpop.permute.xlu0 %253 }
  0xc4   :  { %v269_v15 = vpop.permute.xlu1 %268  ;;  %v264_v16 = vpop.permute.xlu0 %263 }
  0xc8   :  { %v279_v17 = vpop.permute.xlu1 %278  ;;  %v274_v18 = vpop.permute.xlu0 %273 }
  0xcc   :  { %v289_v19 = vpop.permute.xlu1 %288  ;;  %v284_v20 = vpop.permute.xlu0 %283 }
  0xd0   :  { %v299_v21 = vpop.permute.xlu1 %298  ;;  %v294_v22 = vpop.permute.xlu0 %293 }
  0xd4   :  { %v4360_v23 = vpop.permute.xlu1 %308  ;;  %v4362_v24 = vpop.permute.xlu0 %303 }
  0xd8   :  { %v4364_v25 = vpop.permute.xlu1 %318  ;;  %v4366_v26 = vpop.permute.xlu0 %313 }
  0xdc   :  { %v4368_v27 = vpop.permute.xlu1 %328  ;;  %v4370_v28 = vpop.permute.xlu0 %323 }
  0xe0   :  { %v4372_v33 = vpop.permute.xlu1 %338  ;;  %v4374_v35 = vpop.permute.xlu0 %333 }
  0xe4   :  { %v4376_v42 = vpop.permute.xlu1 %348  ;;  %v4378_v44 = vpop.permute.xlu0 %343 }
  0xe8   :  { %v4380_v49 = vpop.permute.xlu1 %358  ;;  %v4382_v51 = vpop.permute.xlu0 %353 }
  0xec   :  { %v4384_v58 = vpop.permute.xlu1 %368  ;;  %v4386_v60 = vpop.permute.xlu0 %363 }
  0xf0   :  { %v379_v1 = vpop.permute.xlu1 %378  ;;  %v374_v3 = vpop.permute.xlu0 %373 }
 0x112   :  { %v2939_v29 = vpop.f32.mrb[0].mxu0 }
 0x113   :  { %v806_v30 = vadd.f32 %v2939_v29, %v229_v10  ;;  %v800_v31 = vpop.f32.mrb[1].mxu0  ;;  %v389_v10 = vpop.permute.xlu1 %388 }
 0x114   :  { %v801_v32 = vadd.f32 %v800_v31, %v224_v8 }
 0x115   :  { %1120 = vst [vmem:[#allocation2 + $0x8] sm:$0xff] %v806_v30 }
 0x116   :  { %1119 = vst [vmem:[#allocation2] sm:$0xff] %v801_v32  ;;  %v2942_v34 = vpop.f32.mrb[2].mxu0 }
 0x117   :  { %v816_v36 = vadd.f32 %v2942_v34, %v239_v9  ;;  %v810_v37 = vpop.f32.mrb[3].mxu0 }
 0x118   :  { %v811_v38 = vadd.f32 %v810_v37, %v234_v7 }
 0x119   :  { %1122 = vst [vmem:[#allocation2 + $0x18] sm:$0xff] %v816_v36 }
 0x11a   :  { %1121 = vst [vmem:[#allocation2 + $0x10] sm:$0xff] %v811_v38  ;;  %v2945_v39 = vpop.f32.mrb[4].mxu0 }
 0x11b   :  { %v826_v40 = vadd.f32 %v2945_v39, %v249_v11  ;;  %v820_v41 = vpop.f32.mrb[5].mxu0 }
 0x11c   :  { %v821_v43 = vadd.f32 %v820_v41, %v244_v12  ;;  %v384_v12 = vpop.permute.xlu0 %383 }
 0x11d   :  { %1124 = vst [vmem:[#allocation2 + $0x28] sm:$0xff] %v826_v40 }
 0x11e   :  { %1123 = vst [vmem:[#allocation2 + $0x20] sm:$0xff] %v821_v43  ;;  %v2948_v45 = vpop.f32.mrb[6].mxu0 }
 0x11f   :  { %v836_v46 = vadd.f32 %v2948_v45, %v259_v13  ;;  %v830_v47 = vpop.f32.mrb[7].mxu0 }
 0x120   :  { %v831_v48 = vadd.f32 %v830_v47, %v254_v14 }
 0x121   :  { %1126 = vst [vmem:[#allocation2 + $0x38] sm:$0xff] %v836_v46 }
 0x122   :  { %1125 = vst [vmem:[#allocation2 + $0x30] sm:$0xff] %v831_v48  ;;  %v2951_v50 = vpop.f32.mrb[8].mxu0 }
 0x123   :  { %v846_v52 = vadd.f32 %v2951_v50, %v269_v15  ;;  %v840_v53 = vpop.f32.mrb[9].mxu0 }
 0x124   :  { %v841_v54 = vadd.f32 %v840_v53, %v264_v16 }
 0x125   :  { %1128 = vst [vmem:[#allocation2 + $0x48] sm:$0xff] %v846_v52 }
 0x126   :  { %1127 = vst [vmem:[#allocation2 + $0x40] sm:$0xff] %v841_v54  ;;  %v2954_v55 = vpop.f32.mrb[10].mxu0 }
 0x127   :  { %v856_v56 = vadd.f32 %v2954_v55, %v279_v17  ;;  %v850_v57 = vpop.f32.mrb[11].mxu0  ;;  %v399_v17 = vpop.permute.xlu1 %398 }
 0x128   :  { %v851_v59 = vadd.f32 %v850_v57, %v274_v18 }
 0x129   :  { %1130 = vst [vmem:[#allocation2 + $0x58] sm:$0xff] %v856_v56 }
 0x12a   :  { %1129 = vst [vmem:[#allocation2 + $0x50] sm:$0xff] %v851_v59  ;;  %v2957_v61 = vpop.f32.mrb[12].mxu0 }
 0x12b   :  { %v866_v62 = vadd.f32 %v2957_v61, %v289_v19  ;;  %v860_v63 = vpop.f32.mrb[13].mxu0  ;;  %v394_v19 = vpop.permute.xlu0 %393 }
 0x12c   :  { %v861_v0 = vadd.f32 %v860_v63, %v284_v20 }
 0x12d   :  { %1132 = vst [vmem:[#allocation2 + $0x68] sm:$0xff] %v866_v62 }
 0x12e   :  { %1131 = vst [vmem:[#allocation2 + $0x60] sm:$0xff] %v861_v0  ;;  %v2960_v2 = vpop.f32.mrb[14].mxu0 }
 0x12f   :  { %v876_v4 = vadd.f32 %v2960_v2, %v299_v21  ;;  %v870_v5 = vpop.f32.mrb[15].mxu0 }
 0x130   :  { %v871_v6 = vadd.f32 %v870_v5, %v294_v22 }
 0x131   :  { %1134 = vst [vmem:[#allocation2 + $0x78] sm:$0xff] %v876_v4 }
 0x132   :  { %1133 = vst [vmem:[#allocation2 + $0x70] sm:$0xff] %v871_v6  ;;  %v2963_v7 = vpop.f32.mrb[16].mxu0 }
 0x133   :  { %v886_v8 = vadd.f32 %v2963_v7, %v4360_v23  ;;  %v880_v9 = vpop.f32.mrb[17].mxu0 }
 0x134   :  { %v881_v11 = vadd.f32 %v880_v9, %v4362_v24 }
 0x135   :  { %1136 = vst [vmem:[#allocation2 + $0x88] sm:$0xff] %v886_v8 }
 0x136   :  { %1135 = vst [vmem:[#allocation2 + $0x80] sm:$0xff] %v881_v11  ;;  %v2966_v13 = vpop.f32.mrb[18].mxu0 }
 0x137   :  { %v896_v14 = vadd.f32 %v2966_v13, %v4364_v25  ;;  %v890_v15 = vpop.f32.mrb[19].mxu0  ;;  %v409_v25 = vpop.permute.xlu1 %408 }
 0x138   :  { %v891_v16 = vadd.f32 %v890_v15, %v4366_v26  ;;  %v404_v26 = vpop.permute.xlu0 %403 }
 0x139   :  { %1138 = vst [vmem:[#allocation2 + $0x98] sm:$0xff] %v896_v14 }
 0x13a   :  { %1137 = vst [vmem:[#allocation2 + $0x90] sm:$0xff] %v891_v16  ;;  %v2969_v18 = vpop.f32.mrb[20].mxu0 }
 0x13b   :  { %v906_v20 = vadd.f32 %v2969_v18, %v4368_v27  ;;  %v900_v21 = vpop.f32.mrb[21].mxu0 }
 0x13c   :  { %v901_v22 = vadd.f32 %v900_v21, %v4370_v28  ;;  %v419_v28 = vpop.permute.xlu1 %418  ;;  %v414_v37 = vpop.permute.xlu0 %413 }
 0x13d   :  { %1140 = vst [vmem:[#allocation2 + $0xa8] sm:$0xff] %v906_v20 }
 0x13e   :  { %1139 = vst [vmem:[#allocation2 + $0xa0] sm:$0xff] %v901_v22  ;;  %v2972_v23 = vpop.f32.mrb[22].mxu0 }
 0x13f   :  { %v916_v24 = vadd.f32 %v2972_v23, %v4372_v33  ;;  %v910_v29 = vpop.f32.mrb[23].mxu0 }
 0x140   :  { %v911_v30 = vadd.f32 %v910_v29, %v4374_v35 }
 0x141   :  { %1142 = vst [vmem:[#allocation2 + $0xb8] sm:$0xff] %v916_v24 }
 0x142   :  { %1141 = vst [vmem:[#allocation2 + $0xb0] sm:$0xff] %v911_v30  ;;  %v2975_v31 = vpop.f32.mrb[24].mxu0 }
 0x143   :  { %v926_v32 = vadd.f32 %v2975_v31, %v4376_v42  ;;  %v920_v34 = vpop.f32.mrb[25].mxu0  ;;  %v429_v42 = vpop.permute.xlu1 %428 }
 0x144   :  { %v921_v27 = vadd.f32 %v920_v34, %v4378_v44  ;;  %v424_v44 = vpop.permute.xlu0 %423 }
 0x145   :  { %1144 = vst [vmem:[#allocation2 + $0xc8] sm:$0xff] %v926_v32 }
 0x146   :  { %1143 = vst [vmem:[#allocation2 + $0xc0] sm:$0xff] %v921_v27  ;;  %v2978_v36 = vpop.f32.mrb[26].mxu0 }
 0x147   :  { %v936_v33 = vadd.f32 %v2978_v36, %v4380_v49  ;;  %v930_v38 = vpop.f32.mrb[27].mxu0  ;;  %v439_v49 = vpop.permute.xlu1 %438 }
 0x148   :  { %v931_v39 = vadd.f32 %v930_v38, %v4382_v51  ;;  %v434_v51 = vpop.permute.xlu0 %433 }
 0x149   :  { %1146 = vst [vmem:[#allocation2 + $0xd8] sm:$0xff] %v936_v33 }
 0x14a   :  { %1145 = vst [vmem:[#allocation2 + $0xd0] sm:$0xff] %v931_v39  ;;  %v2981_v35 = vpop.f32.mrb[28].mxu0 }
 0x14b   :  { %v946_v40 = vadd.f32 %v2981_v35, %v4384_v58  ;;  %v940_v41 = vpop.f32.mrb[29].mxu0  ;;  %v449_v58 = vpop.permute.xlu1 %448 }
 0x14c   :  { %v941_v43 = vadd.f32 %v940_v41, %v4386_v60  ;;  %v444_v60 = vpop.permute.xlu0 %443 }
 0x14d   :  { %1148 = vst [vmem:[#allocation2 + $0xe8] sm:$0xff] %v946_v40 }
 0x14e   :  { %1147 = vst [vmem:[#allocation2 + $0xe0] sm:$0xff] %v941_v43  ;;  %v2984_v45 = vpop.f32.mrb[30].mxu0 }
 0x14f   :  { %v956_v46 = vadd.f32 %v2984_v45, %v379_v1  ;;  %v950_v47 = vpop.f32.mrb[31].mxu0  ;;  %v459_v1 = vpop.permute.xlu1 %458 }
 0x150   :  { %v951_v48 = vadd.f32 %v950_v47, %v374_v3  ;;  %v454_v3 = vpop.permute.xlu0 %453 }
 0x151   :  { %1150 = vst [vmem:[#allocation2 + $0xf8] sm:$0xff] %v956_v46 }
 0x152   :  { %1149 = vst [vmem:[#allocation2 + $0xf0] sm:$0xff] %v951_v48  ;;  %v2987_v50 = vpop.f32.mrb[32].mxu0 }
 0x153   :  { %v966_v52 = vadd.f32 %v2987_v50, %v389_v10  ;;  %v960_v53 = vpop.f32.mrb[33].mxu0  ;;  %v469_v10 = vpop.permute.xlu1 %468 }
 0x154   :  { %v961_v54 = vadd.f32 %v960_v53, %v384_v12  ;;  %v464_v12 = vpop.permute.xlu0 %463 }
 0x155   :  { %1152 = vst [vmem:[#allocation2 + $0x108] sm:$0xff] %v966_v52 }
 0x156   :  { %1151 = vst [vmem:[#allocation2 + $0x100] sm:$0xff] %v961_v54  ;;  %v2990_v55 = vpop.f32.mrb[34].mxu0 }
 0x157   :  { %v976_v56 = vadd.f32 %v2990_v55, %v399_v17  ;;  %v970_v57 = vpop.f32.mrb[35].mxu0  ;;  %v479_v17 = vpop.permute.xlu1 %478 }
 0x158   :  { %v971_v59 = vadd.f32 %v970_v57, %v394_v19  ;;  %v474_v19 = vpop.permute.xlu0 %473 }
 0x159   :  { %1154 = vst [vmem:[#allocation2 + $0x118] sm:$0xff] %v976_v56 }
 0x15a   :  { %1153 = vst [vmem:[#allocation2 + $0x110] sm:$0xff] %v971_v59  ;;  %v2993_v61 = vpop.f32.mrb[36].mxu0 }
 0x15b   :  { %v986_v62 = vadd.f32 %v2993_v61, %v409_v25  ;;  %v980_v63 = vpop.f32.mrb[37].mxu0  ;;  %v489_v25 = vpop.permute.xlu1 %488 }
 0x15c   :  { %v981_v0 = vadd.f32 %v980_v63, %v404_v26  ;;  %v484_v26 = vpop.permute.xlu0 %483 }
 0x15d   :  { %1156 = vst [vmem:[#allocation2 + $0x128] sm:$0xff] %v986_v62 }
 0x15e   :  { %1155 = vst [vmem:[#allocation2 + $0x120] sm:$0xff] %v981_v0  ;;  %v2996_v2 = vpop.f32.mrb[38].mxu0 }
 0x15f   :  { %v996_v4 = vadd.f32 %v2996_v2, %v419_v28  ;;  %v990_v5 = vpop.f32.mrb[39].mxu0  ;;  %v499_v28 = vpop.permute.xlu1 %498 }
 0x160   :  { %v991_v6 = vadd.f32 %v990_v5, %v414_v37  ;;  %v494_v37 = vpop.permute.xlu0 %493 }
 0x161   :  { %1158 = vst [vmem:[#allocation2 + $0x138] sm:$0xff] %v996_v4 }
 0x162   :  { %1157 = vst [vmem:[#allocation2 + $0x130] sm:$0xff] %v991_v6  ;;  %v2999_v7 = vpop.f32.mrb[40].mxu0 }
 0x163   :  { %v1006_v8 = vadd.f32 %v2999_v7, %v429_v42  ;;  %v1000_v9 = vpop.f32.mrb[41].mxu0  ;;  %v509_v42 = vpop.permute.xlu1 %508  ;;  %v4402_v7 = vmov 0.0  }
 0x164   :  { %v1001_v11 = vadd.f32 %v1000_v9, %v424_v44  ;;  %v504_v44 = vpop.permute.xlu0 %503  ;;  %v4406_v9 = vmov 0.0  }
 0x165   :  { %1160 = vst [vmem:[#allocation2 + $0x148] sm:$0xff] %v1006_v8  ;;  %v4404_v8 = vmov 0.0  }
 0x166   :  { %1159 = vst [vmem:[#allocation2 + $0x140] sm:$0xff] %v1001_v11  ;;  %v3002_v13 = vpop.f32.mrb[42].mxu0  ;;  %v4410_v11 = vmov 0.0  }
 0x167   :  { %v1016_v14 = vadd.f32 %v3002_v13, %v439_v49  ;;  %v1010_v15 = vpop.f32.mrb[43].mxu0  ;;  %v519_v49 = vpop.permute.xlu1 %518  ;;  %v4414_v13 = vmov 0.0  }
 0x168   :  { %v1011_v16 = vadd.f32 %v1010_v15, %v434_v51  ;;  %v514_v51 = vpop.permute.xlu0 %513  ;;  %v4418_v15 = vmov 0.0  }
 0x169   :  { %1162 = vst [vmem:[#allocation2 + $0x158] sm:$0xff] %v1016_v14  ;;  %v4416_v14 = vmov 0.0  }
 0x16a   :  { %1161 = vst [vmem:[#allocation2 + $0x150] sm:$0xff] %v1011_v16  ;;  %v3005_v18 = vpop.f32.mrb[44].mxu0  ;;  %v4420_v16 = vmov 0.0  }
 0x16b   :  { %v1026_v20 = vadd.f32 %v3005_v18, %v449_v58  ;;  %v1020_v21 = vpop.f32.mrb[45].mxu0  ;;  %v529_v58 = vpop.permute.xlu1 %528  ;;  %v4424_v18 = vmov 0.0  }
 0x16c   :  { %v1021_v22 = vadd.f32 %v1020_v21, %v444_v60  ;;  %v524_v60 = vpop.permute.xlu0 %523  ;;  %v4430_v21 = vmov 0.0  }
 0x16d   :  { %1164 = vst [vmem:[#allocation2 + $0x168] sm:$0xff] %v1026_v20  ;;  %v4428_v20 = vmov 0.0  }
 0x16e   :  { %1163 = vst [vmem:[#allocation2 + $0x160] sm:$0xff] %v1021_v22  ;;  %v3008_v23 = vpop.f32.mrb[46].mxu0  ;;  %v4432_v22 = vmov 0.0  }
 0x16f   :  { %v1036_v24 = vadd.f32 %v3008_v23, %v459_v1  ;;  %v1030_v29 = vpop.f32.mrb[47].mxu0  ;;  %v539_v1 = vpop.permute.xlu1 %538 }
 0x170   :  { %v1031_v30 = vadd.f32 %v1030_v29, %v454_v3  ;;  %v534_v3 = vpop.permute.xlu0 %533 }
 0x171   :  { %1166 = vst [vmem:[#allocation2 + $0x178] sm:$0xff] %v1036_v24 }
 0x172   :  { %1165 = vst [vmem:[#allocation2 + $0x170] sm:$0xff] %v1031_v30  ;;  %v3011_v31 = vpop.f32.mrb[48].mxu0 }
 0x173   :  { %v1046_v32 = vadd.f32 %v3011_v31, %v469_v10  ;;  %v1040_v34 = vpop.f32.mrb[49].mxu0  ;;  %v4408_v10 = vmov 0.0  }
 0x174   :  { %v1041_v27 = vadd.f32 %v1040_v34, %v464_v12  ;;  %v4412_v12 = vmov 0.0  }
 0x175   :  { %1168 = vst [vmem:[#allocation2 + $0x188] sm:$0xff] %v1046_v32 }
 0x176   :  { %1167 = vst [vmem:[#allocation2 + $0x180] sm:$0xff] %v1041_v27  ;;  %v3014_v36 = vpop.f32.mrb[50].mxu0 }
 0x177   :  { %v1056_v33 = vadd.f32 %v3014_v36, %v479_v17  ;;  %v1050_v38 = vpop.f32.mrb[51].mxu0  ;;  %v4422_v17 = vmov 0.0  }
 0x178   :  { %v1051_v39 = vadd.f32 %v1050_v38, %v474_v19  ;;  %v4426_v19 = vmov 0.0  }
 0x179   :  { %1170 = vst [vmem:[#allocation2 + $0x198] sm:$0xff] %v1056_v33 }
 0x17a   :  { %1169 = vst [vmem:[#allocation2 + $0x190] sm:$0xff] %v1051_v39  ;;  %v3017_v35 = vpop.f32.mrb[52].mxu0 }
 0x17b   :  { %v1066_v40 = vadd.f32 %v3017_v35, %v489_v25  ;;  %v1060_v41 = vpop.f32.mrb[53].mxu0 }
 0x17c   :  { %v1061_v43 = vadd.f32 %v1060_v41, %v484_v26 }
 0x17d   :  { %1172 = vst [vmem:[#allocation2 + $0x1a8] sm:$0xff] %v1066_v40 }
 0x17e   :  { %1171 = vst [vmem:[#allocation2 + $0x1a0] sm:$0xff] %v1061_v43  ;;  %v3020_v45 = vpop.f32.mrb[54].mxu0 }
 0x17f   :  { %v1076_v46 = vadd.f32 %v3020_v45, %v499_v28  ;;  %v1070_v47 = vpop.f32.mrb[55].mxu0 }
 0x180   :  { %v1071_v48 = vadd.f32 %v1070_v47, %v494_v37 }
 0x181   :  { %1174 = vst [vmem:[#allocation2 + $0x1b8] sm:$0xff] %v1076_v46 }
 0x182   :  { %1173 = vst [vmem:[#allocation2 + $0x1b0] sm:$0xff] %v1071_v48  ;;  %v3023_v50 = vpop.f32.mrb[56].mxu0 }
 0x183   :  { %v1086_v52 = vadd.f32 %v3023_v50, %v509_v42  ;;  %v1080_v53 = vpop.f32.mrb[57].mxu0 }
 0x184   :  { %v1081_v54 = vadd.f32 %v1080_v53, %v504_v44 }
 0x185   :  { %1176 = vst [vmem:[#allocation2 + $0x1c8] sm:$0xff] %v1086_v52 }
 0x186   :  { %1175 = vst [vmem:[#allocation2 + $0x1c0] sm:$0xff] %v1081_v54  ;;  %v3026_v55 = vpop.f32.mrb[58].mxu0 }
 0x187   :  { %v1096_v56 = vadd.f32 %v3026_v55, %v519_v49  ;;  %v1090_v57 = vpop.f32.mrb[59].mxu0 }
 0x188   :  { %v1091_v59 = vadd.f32 %v1090_v57, %v514_v51 }
 0x189   :  { %1178 = vst [vmem:[#allocation2 + $0x1d8] sm:$0xff] %v1096_v56 }
 0x18a   :  { %1177 = vst [vmem:[#allocation2 + $0x1d0] sm:$0xff] %v1091_v59  ;;  %v3029_v61 = vpop.f32.mrb[60].mxu0 }
 0x18b   :  { %v1106_v62 = vadd.f32 %v3029_v61, %v529_v58  ;;  %v1100_v63 = vpop.f32.mrb[61].mxu0 }
 0x18c   :  { %v1101_v0 = vadd.f32 %v1100_v63, %v524_v60 }
 0x18d   :  { %1180 = vst [vmem:[#allocation2 + $0x1e8] sm:$0xff] %v1106_v62 }
 0x18e   :  { %1179 = vst [vmem:[#allocation2 + $0x1e0] sm:$0xff] %v1101_v0  ;;  %v3032_v2 = vpop.f32.mrb[62].mxu0 }
 0x18f   :  { %v1116_v4 = vadd.f32 %v3032_v2, %v539_v1  ;;  %v1110_v5 = vpop.f32.mrb[63].mxu0 }
 0x190   :  { %v1111_v6 = vadd.f32 %v1110_v5, %v534_v3 }
 0x191   :  { %1182 = vst [vmem:[#allocation2 + $0x1f8] sm:$0xff] %v1116_v4 }
 0x192   :  { %1181 = vst [vmem:[#allocation2 + $0x1f0] sm:$0xff] %v1111_v6 }
 0x193 LB: > { %s2678_s29 = sshll.u32 %s3791_s2, 3  ;;  %v1217_v24 = vlaneseq  ;;  %v3822_v29 = vmov 1966171168   ;;  %s2679_s4 = sshll.u32 %s3791_s2, 4  ;;  %s3791_s2 = sphi %s4434_s2, %s1188_s2   ;;  %v3787_v22 = vphi %v4432_v22, %v5433_v22   ;;  %v3783_v21 = vphi %v4430_v21, %v5432_v21   ;;  %v3779_v20 = vphi %v4428_v20, %v5431_v20   ;;  %v3775_v19 = vphi %v4426_v19, %v5430_v19   ;;  %v3771_v18 = vphi %v4424_v18, %v5429_v18   ;;  %v3767_v17 = vphi %v4422_v17, %v5428_v17   ;;  %v3763_v16 = vphi %v4420_v16, %v5427_v16   ;;  %v3759_v15 = vphi %v4418_v15, %v5426_v15   ;;  %v3755_v14 = vphi %v4416_v14, %v5425_v14   ;;  %v3751_v13 = vphi %v4414_v13, %v5424_v13   ;;  %v3747_v12 = vphi %v4412_v12, %v5423_v12   ;;  %v3743_v11 = vphi %v4410_v11, %v5422_v11   ;;  %v3739_v10 = vphi %v4408_v10, %v5421_v10   ;;  %v3735_v9 = vphi %v4406_v9, %v5420_v9   ;;  %v3731_v8 = vphi %v4404_v8, %v5419_v8   ;;  %v3727_v7 = vphi %v4402_v7, %v5418_v7  }
 0x194   : > { %s1206_s5 = scalar_lea.vmem [#allocation2], %s2678_s29  ;;  %v1215_v25 = vunpack.c.l.s4 %v3822_v29  ;;  %s1209_s14 = scalar_lea.vmem %s5403_s1, %s2679_s4 }
 0x195   : > { %v1218_v30 = vshrl.u32 %v1217_v24, 7  ;;  %v1210_v39 = vld [vmem:[%s1209_s14] sm:$0xff]  ;;  %v1211_v35 = vld [vmem:[%s1209_s14 + $0x8] sm:$0xff]  ;;  %s1188_s2 = sadd.s32 1, %s3791_s2  }
 0x196   : > { %v1216_v31 = vunpack.c.0.s8 %v1215_v25  ;;  %p4516_p6 = scmp.ge.s32.totalorder %s1188_s2, 32  }
 0x197   : > { %v4486_v28 = vsub.s32 0, %v1218_v30  ;;  %s4626_s1 = sld [smem:[#allocation4]] (%p4516_p6)  ;;  %s4630_s0 = sld [smem:[#allocation4 + $0x1]] (%p4516_p6) }
 0x198   : > { %v4479_v32 = vsub.s32 %v1216_v31, %v1218_v30  ;;  %s4628_s16 = sld [smem:[#allocation6]] (%p4516_p6)  ;;  %s4632_s17 = sld [smem:[#allocation6 + $0x1]] (%p4516_p6) }
 0x199   : > { %v1207_v23 = vld [vmem:[%s1206_s5] sm:$0xff]  ;;  %s4634_s18 = sld [smem:[#allocation4 + $0x2]] (%p4516_p6)  ;;  %s4638_s6 = sld [smem:[#allocation4 + $0x3]] (%p4516_p6) }
 0x19a   : > { %v1213_v26 = vcombine.high %v1207_v23, %v1207_v23  ;;  %v1220_v34 = vrot.slane %v1207_v23, %v4479_v32  ;;  %s4636_s19 = sld [smem:[#allocation6 + $0x2]] (%p4516_p6)  ;;  %s4640_s7 = sld [smem:[#allocation6 + $0x3]] (%p4516_p6) }
 0x19b   :  { %s4642_s20 = sld [smem:[#allocation4 + $0x4]] (%p4516_p6)  ;;  %s4646_s22 = sld [smem:[#allocation4 + $0x5]] (%p4516_p6) }
 0x19c   : > { %v1227_v27 = vrot.slane %v1213_v26, %v4479_v32  ;;  %v1228_v36 = vcombine.high %v1220_v34, %v1220_v34  ;;  %v1236_v33 = vrot.slane %v1220_v34, %v4479_v32  ;;  %s4644_s21 = sld [smem:[#allocation6 + $0x4]] (%p4516_p6)  ;;  %s4648_s23 = sld [smem:[#allocation6 + $0x5]] (%p4516_p6) }
 0x19d   :  { %s4650_s24 = sld [smem:[#allocation4 + $0x6]] (%p4516_p6)  ;;  %s4654_s25 = sld [smem:[#allocation4 + $0x7]] (%p4516_p6) }
 0x19e   : > { %v1229_v37 = vcombine.high %v1227_v27, %v1227_v27  ;;  %v1243_v38 = vrot.slane %v1227_v27, %v4479_v32  ;;  %v1250_v40 = vrot.slane %v1228_v36, %v4479_v32  ;;  %v1258_v42 = vcombine.high %v1236_v33, %v1236_v33  ;;  %s4652_s3 = sld [smem:[#allocation6 + $0x6]] (%p4516_p6)  ;;  %s4656_s26 = sld [smem:[#allocation6 + $0x7]] (%p4516_p6) }
 0x19f   : > { %v1265_v44 = vrot.slane %v1236_v33, %v4486_v28  ;;  %s4746_s27 = smov (%p4516_p6), 0  }
 0x1a0   : > { %v1257_v41 = vrot.slane %v1229_v37, %v4479_v32  ;;  %v1259_v43 = vcombine.high %v1243_v38, %v1243_v38  ;;  %v1281_v45 = vrot.slane %v1243_v38, %v4486_v28  ;;  %v1260_v46 = vcombine.high %v1250_v40, %v1250_v40 }
 0x1a1   : > { %v1269_v48 = vrot.slane %v1250_v40, %v4486_v28  ;;  %v1273_v49 = vrot.slane %v1258_v42, %v4486_v28  ;;  %v1302_v52 = vmul.f32 %v1265_v44, %v1210_v39  ;;  %v1303_v53 = vmul.f32 %v1265_v44, %v1211_v35 }
 0x1a2   : > { %v1261_v47 = vcombine.high %v1257_v41, %v1257_v41  ;;  %v1285_v50 = vrot.slane %v1257_v41, %v4486_v28  ;;  %v1289_v51 = vrot.slane %v1259_v43, %v4486_v28  ;;  %v1277_v54 = vrot.slane %v1260_v46, %v4486_v28 }
 0x1a3   : > { %v1304_v56 = vmul.f32 %v1269_v48, %v1210_v39  ;;  %v1305_v57 = vmul.f32 %v1269_v48, %v1211_v35  ;;  %v1306_v58 = vmul.f32 %v1273_v49, %v1210_v39  ;;  %v1307_v59 = vmul.f32 %v1273_v49, %v1211_v35 }
 0x1a4   : > { %v1293_v55 = vrot.slane %v1261_v47, %v4486_v28  ;;  %v1310_v60 = vmul.f32 %v1281_v45, %v1210_v39  ;;  %v1311_v61 = vmul.f32 %v1281_v45, %v1211_v35  ;;  %v1308_v62 = vmul.f32 %v1277_v54, %v1210_v39 }
 0x1a5   : > { %v1309_v63 = vmul.f32 %v1277_v54, %v1211_v35  ;;  %v1312_v0 = vmul.f32 %v1285_v50, %v1210_v39  ;;  %v1313_v1 = vmul.f32 %v1285_v50, %v1211_v35  ;;  %v1314_v2 = vmul.f32 %v1289_v51, %v1210_v39 }
 0x1a6   : > { %v1315_v3 = vmul.f32 %v1289_v51, %v1211_v35  ;;  %v1316_v4 = vmul.f32 %v1293_v55, %v1210_v39  ;;  %v1317_v5 = vmul.f32 %v1293_v55, %v1211_v35  ;;  %v1318_v6 = vadd.f32 %v3787_v22, %v1302_v52  }
 0x1a7   : > { %v1319_v23 = vadd.f32 %v3783_v21, %v1303_v53   ;;  %v1320_v24 = vadd.f32 %v3779_v20, %v1304_v56   ;;  %v1321_v29 = vadd.f32 %v3775_v19, %v1305_v57   ;;  %v1322_v25 = vadd.f32 %v3771_v18, %v1306_v58  }
 0x1a8   : > { %v1323_v30 = vadd.f32 %v3767_v17, %v1307_v59   ;;  %v1324_v26 = vadd.f32 %v3763_v16, %v1308_v62   ;;  %v1325_v31 = vadd.f32 %v3759_v15, %v1309_v63   ;;  %v1326_v34 = vadd.f32 %v3755_v14, %v1310_v60  }
 0x1a9   : > { %v1327_v27 = vadd.f32 %v3751_v13, %v1311_v61   ;;  %v1328_v36 = vadd.f32 %v3747_v12, %v1312_v0   ;;  %v1329_v37 = vadd.f32 %v3743_v11, %v1313_v1   ;;  %v1330_v33 = vadd.f32 %v3739_v10, %v1314_v2   ;;  %1187 = sbr.rel (!%p4516_p6) target bundleno = 403 (0x193), region = 110 }
 0x1aa   : > { %v1331_v38 = vadd.f32 %v3735_v9, %v1315_v3   ;;  %v4510_v8 = vadd.f32 %v3731_v8, %v1316_v4   ;;  %v4513_v7 = vadd.f32 %v3727_v7, %v1317_v5   ;;  %v5425_v14 = vmov %v1326_v34 }
 0x1ab   : > { %v5421_v10 = vmov %v1330_v33  ;;  %v5422_v11 = vmov %v1329_v37  ;;  %v5423_v12 = vmov %v1328_v36  ;;  %v5424_v13 = vmov %v1327_v27 }
 0x1ac   : > { %v5415_v39 = vmov %v4510_v8  ;;  %v5416_v35 = vmov %v4513_v7  ;;  %v5420_v9 = vmov %v1331_v38  ;;  %v5426_v15 = vmov %v1325_v31 }
 0x1ad   : > { %v5418_v7 = vmov %v5416_v35  ;;  %v5419_v8 = vmov %v5415_v39  ;;  %v5427_v16 = vmov %v1324_v26  ;;  %v5428_v17 = vmov %v1323_v30 }
 0x1ae   : > { %v5429_v18 = vmov %v1322_v25  ;;  %v5430_v19 = vmov %v1321_v29  ;;  %v5431_v20 = vmov %v1320_v24  ;;  %v5432_v21 = vmov %v1319_v23 }
 0x1af   : > { %v5433_v22 = vmov %v1318_v6  ;;  %v1341_v40 = vadd.f32 (%p4516_p6), %v1321_v29, %v1319_v23 }
 0x1b0   :  { %v1334_v22 = vadd.f32 %v1320_v24, %v1318_v6 }
 0x1b1   :  { %v1342_v42 = vadd.f32 %v1341_v40, %v1323_v30 }
 0x1b2   :  { %v1335_v41 = vadd.f32 %v1334_v22, %v1322_v25 }
 0x1b3   :  { %v1343_v44 = vadd.f32 %v1342_v42, %v1325_v31 }
 0x1b4   :  { %v1336_v43 = vadd.f32 %v1335_v41, %v1324_v26 }
 0x1b5   :  { %v1344_v46 = vadd.f32 %v1343_v44, %v1327_v27  ;;  %v1410_v44 = vstv %s4628_s16 }
 0x1b6   :  { %v1337_v45 = vadd.f32 %v1336_v43, %v1326_v34  ;;  %v1406_v43 = vstv %s4626_s1 }
 0x1b7   :  { %v1345_v48 = vadd.f32 %v1344_v46, %v1329_v37  ;;  %v1422_v46 = vstv %s4632_s17 }
 0x1b8   :  { %v1338_v47 = vadd.f32 %v1337_v45, %v1328_v36  ;;  %v1418_v45 = vstv %s4630_s0 }
 0x1b9   :  { %v1346_v50 = vadd.f32 %v1345_v48, %v1331_v38  ;;  %v1434_v48 = vstv %s4636_s19 }
 0x1ba   :  { %v1339_v49 = vadd.f32 %v1338_v47, %v1330_v33  ;;  %v1430_v47 = vstv %s4634_s18 }
 0x1bb   :  { %v1347_v52 = vadd.f32 %v1346_v50, %v5416_v35  ;;  %v1446_v50 = vstv %s4640_s7 }
 0x1bc   :  { %v1340_v51 = vadd.f32 %v1339_v49, %v5415_v39  ;;  %v1442_v49 = vstv %s4638_s6 }
 0x1bd   :  { %v1350_v54 = vmul.f32 0.125, %v1347_v52  ;;  %v1458_v52 = vstv %s4644_s21 }
 0x1be   :  { %v1349_v53 = vmul.f32 0.125, %v1340_v51  ;;  %v1454_v51 = vstv %s4642_s20 }
 0x1bf   :  { %v4562_v7 = vsub.f32 %v1319_v23, %v1350_v54  ;;  %v4566_v9 = vsub.f32 %v1321_v29, %v1350_v54  ;;  %v4570_v11 = vsub.f32 %v1323_v30, %v1350_v54  ;;  %v4574_v13 = vsub.f32 %v1325_v31, %v1350_v54 }
 0x1c0   :  { %v4560_v55 = vsub.f32 %v1318_v6, %v1349_v53  ;;  %v4564_v8 = vsub.f32 %v1320_v24, %v1349_v53  ;;  %v4568_v10 = vsub.f32 %v1322_v25, %v1349_v53  ;;  %v4572_v12 = vsub.f32 %v1324_v26, %v1349_v53 }
 0x1c1   :  { %v1368_v15 = vmul.f32 %v4562_v7, %v4562_v7  ;;  %v1370_v17 = vmul.f32 %v4566_v9, %v4566_v9  ;;  %v4584_v18 = vsub.f32 %v1326_v34, %v1349_v53  ;;  %v4586_v19 = vsub.f32 %v1327_v27, %v1350_v54 }
 0x1c2   :  { %v1367_v14 = vmul.f32 %v4560_v55, %v4560_v55  ;;  %v1369_v16 = vmul.f32 %v4564_v8, %v4564_v8  ;;  %v1371_v20 = vmul.f32 %v4568_v10, %v4568_v10  ;;  %v1372_v21 = vmul.f32 %v4570_v11, %v4570_v11 }
 0x1c3   :  { %v4592_v56 = vsub.f32 %v1328_v36, %v1349_v53  ;;  %v4594_v57 = vsub.f32 %v1329_v37, %v1350_v54  ;;  %v1373_v58 = vmul.f32 %v4572_v12, %v4572_v12  ;;  %v1374_v59 = vmul.f32 %v4574_v13, %v4574_v13 }
 0x1c4   :  { %v1383_v60 = vadd.f32 %v1369_v16, %v1367_v14  ;;  %v1390_v61 = vadd.f32 %v1370_v17, %v1368_v15  ;;  %v4600_v62 = vsub.f32 %v1330_v33, %v1349_v53  ;;  %v4602_v63 = vsub.f32 %v1331_v38, %v1350_v54 }
 0x1c5   :  { %v1375_v0 = vmul.f32 %v4584_v18, %v4584_v18  ;;  %v1376_v1 = vmul.f32 %v4586_v19, %v4586_v19  ;;  %v4609_v4 = vsub.f32 %v5415_v39, %v1349_v53  ;;  %v4612_v5 = vsub.f32 %v5416_v35, %v1350_v54 }
 0x1c6   :  { %v1384_v2 = vadd.f32 %v1383_v60, %v1371_v20  ;;  %v1391_v3 = vadd.f32 %v1390_v61, %v1372_v21  ;;  %v1377_v6 = vmul.f32 %v4592_v56, %v4592_v56  ;;  %v1378_v23 = vmul.f32 %v4594_v57, %v4594_v57 }
 0x1c7   :  { %v1379_v25 = vmul.f32 %v4600_v62, %v4600_v62  ;;  %v1380_v30 = vmul.f32 %v4602_v63, %v4602_v63  ;;  %v1381_v34 = vmul.f32 %v4609_v4, %v4609_v4  ;;  %v1382_v27 = vmul.f32 %v4612_v5, %v4612_v5 }
 0x1c8   :  { %v1385_v24 = vadd.f32 %v1384_v2, %v1373_v58  ;;  %v1392_v29 = vadd.f32 %v1391_v3, %v1374_v59  ;;  %v1466_v53 = vstv %s4646_s22  ;;  %v1470_v54 = vstv %s4648_s23 }
 0x1c9   :  { %v1478_v15 = vstv %s4650_s24  ;;  %v1482_v16 = vstv %s4652_s3  ;;  %v1490_v17 = vstv %s4654_s25  ;;  %v1494_v20 = vstv %s4656_s26 }
 0x1ca   :  { %v1386_v26 = vadd.f32 %v1385_v24, %v1375_v0  ;;  %v1393_v31 = vadd.f32 %v1392_v29, %v1376_v1 }
 0x1cc   :  { %v1387_v36 = vadd.f32 %v1386_v26, %v1377_v6  ;;  %v1394_v37 = vadd.f32 %v1393_v31, %v1378_v23 }
 0x1ce   :  { %v1388_v33 = vadd.f32 %v1387_v36, %v1379_v25  ;;  %v1395_v38 = vadd.f32 %v1394_v37, %v1380_v30 }
 0x1d0   :  { %v1389_v39 = vadd.f32 %v1388_v33, %v1381_v34  ;;  %v1396_v35 = vadd.f32 %v1395_v38, %v1382_v27 }
 0x1d2   :  { %v1397_v22 = vmul.f32 0.125, %v1389_v39  ;;  %v1398_v40 = vmul.f32 0.125, %v1396_v35 }
 0x1d4   :  { %v1399_v41 = vadd.f32 1e-05, %v1397_v22  ;;  %v1400_v42 = vadd.f32 1e-05, %v1398_v40 }
 0x1d6   :  { %3314 = vrsqrt.f32 %v1399_v41 }
 0x1d7   :  { %3316 = vrsqrt.f32 %v1400_v42 }
 0x1e0   :  { %v3315_v14 = vpop.eup %3314 }
 0x1e1   :  { %v3317_v21 = vpop.eup %3316  ;;  %v1403_v58 = vmul.f32 %v3315_v14, %v4560_v55  ;;  %v1415_v59 = vmul.f32 %v3315_v14, %v4564_v8  ;;  %v1427_v60 = vmul.f32 %v3315_v14, %v4568_v10  ;;  %v1439_v61 = vmul.f32 %v3315_v14, %v4572_v12 }
 0x1e2   :  { %v1404_v0 = vmul.f32 %v3317_v21, %v4562_v7  ;;  %v1416_v1 = vmul.f32 %v3317_v21, %v4566_v9  ;;  %v1428_v2 = vmul.f32 %v3317_v21, %v4570_v11  ;;  %v1440_v3 = vmul.f32 %v3317_v21, %v4574_v13 }
 0x1e3   :  { %v1407_v6 = vmul.f32 %v1406_v43, %v1403_v58  ;;  %v1419_v23 = vmul.f32 %v1418_v45, %v1415_v59  ;;  %v1431_v24 = vmul.f32 %v1430_v47, %v1427_v60  ;;  %v1443_v29 = vmul.f32 %v1442_v49, %v1439_v61 }
 0x1e4   :  { %v1408_v25 = vmul.f32 %v1406_v43, %v1404_v0  ;;  %v1420_v55 = vmul.f32 %v1418_v45, %v1416_v1  ;;  %v1432_v30 = vmul.f32 %v1430_v47, %v1428_v2  ;;  %v1444_v8 = vmul.f32 %v1442_v49, %v1440_v3 }
 0x1e5   :  { %v4682_v26 = vadd.f32 %v1410_v44, %v1407_v6  ;;  %v4684_v10 = vadd.f32 %v1422_v46, %v1419_v23  ;;  %v4686_v12 = vadd.f32 %v1434_v48, %v1431_v24  ;;  %v4688_v7 = vadd.f32 %v1446_v50, %v1443_v29 }
 0x1e6   :  { %v4690_v9 = vadd.f32 %v1410_v44, %v1408_v25  ;;  %v4692_v11 = vadd.f32 %v1422_v46, %v1420_v55  ;;  %v4694_v13 = vadd.f32 %v1434_v48, %v1432_v30  ;;  %v4696_v31 = vadd.f32 %v1446_v50, %v1444_v8 }
 0x1e7   :  { %v1413_v34 = vmax.f32 %v4682_v26, 0.0  ;;  %v1425_v27 = vmax.f32 %v4684_v10, 0.0  ;;  %v1437_v36 = vmax.f32 %v4686_v12, 0.0  ;;  %v1449_v37 = vmax.f32 %v4688_v7, 0.0 }
 0x1e8   :  { %v1414_v33 = vmax.f32 %v4690_v9, 0.0  ;;  %v1426_v38 = vmax.f32 %v4692_v11, 0.0  ;;  %v1438_v39 = vmax.f32 %v4694_v13, 0.0  ;;  %v1450_v35 = vmax.f32 %v4696_v31, 0.0 }
 0x1e9   :  { %v1451_v22 = vmul.f32 %v3315_v14, %v4584_v18  ;;  %v1452_v40 = vmul.f32 %v3317_v21, %v4586_v19  ;;  %v1463_v41 = vmul.f32 %v3315_v14, %v4592_v56  ;;  %v1464_v42 = vmul.f32 %v3317_v21, %v4594_v57 }
 0x1ea   :  { %v1475_v43 = vmul.f32 %v3315_v14, %v4600_v62  ;;  %v1476_v44 = vmul.f32 %v3317_v21, %v4602_v63  ;;  %v1487_v45 = vmul.f32 %v3315_v14, %v4609_v4  ;;  %v1488_v46 = vmul.f32 %v3317_v21, %v4612_v5 }
 0x1eb   :  { %v1455_v47 = vmul.f32 %v1454_v51, %v1451_v22  ;;  %v1456_v48 = vmul.f32 %v1454_v51, %v1452_v40  ;;  %v1467_v49 = vmul.f32 %v1466_v53, %v1463_v41  ;;  %v1468_v50 = vmul.f32 %v1466_v53, %v1464_v42 }
 0x1ec   :  { %v1479_v58 = vmul.f32 %v1478_v15, %v1475_v43  ;;  %v1480_v18 = vmul.f32 %v1478_v15, %v1476_v44  ;;  %v1491_v59 = vmul.f32 %v1490_v17, %v1487_v45  ;;  %v1492_v19 = vmul.f32 %v1490_v17, %v1488_v46 }
 0x1ed   :  { %v4714_v60 = vadd.f32 %v1458_v52, %v1455_v47  ;;  %v4716_v56 = vadd.f32 %v1458_v52, %v1456_v48  ;;  %v4718_v57 = vadd.f32 %v1470_v54, %v1467_v49  ;;  %v4720_v62 = vadd.f32 %v1470_v54, %v1468_v50 }
 0x1ee   :  { %v4722_v63 = vadd.f32 %v1482_v16, %v1479_v58  ;;  %v4724_v4 = vadd.f32 %v1482_v16, %v1480_v18  ;;  %v4726_v5 = vadd.f32 %v1494_v20, %v1491_v59  ;;  %v4728_v51 = vadd.f32 %v1494_v20, %v1492_v19 }
 0x1ef   :  { %v1461_v53 = vmax.f32 %v4714_v60, 0.0  ;;  %v1462_v14 = vmax.f32 %v4716_v56, 0.0  ;;  %v1473_v15 = vmax.f32 %v4718_v57, 0.0  ;;  %v1474_v52 = vmax.f32 %v4720_v62, 0.0 }
 0x1f0   :  { %v1485_v17 = vmax.f32 %v4722_v63, 0.0  ;;  %v1486_v54 = vmax.f32 %v4724_v4, 0.0  ;;  %v1497_v21 = vmax.f32 %v4726_v5, 0.0  ;;  %v1498_v16 = vmax.f32 %v4728_v51, 0.0 }
 0x1f1   :  { %v4738_v61 = vmov 0.0   ;;  %v4740_v20 = vmov 0.0   ;;  %v4742_v0 = vmov 0.0   ;;  %v4744_v1 = vmov 0.0  }
 0x1f2 LB: > { %s2694_s28 = sshll.u32 %s3811_s27, 3  ;;  %s2696_s29 = sshll.u32 %s3811_s27, 4  ;;  %s3811_s27 = sphi %s4746_s27, %s1504_s27   ;;  %v3807_v1 = vphi %v4744_v1, %v5437_v1   ;;  %v3803_v0 = vphi %v4742_v0, %v5436_v0   ;;  %v3799_v20 = vphi %v4740_v20, %v5435_v20   ;;  %v3795_v61 = vphi %v4738_v61, %v5434_v61  }
 0x1f3   : > { %s2533_s2 = scalar_lea.vmem [#allocation2], %s2694_s28  ;;  %s1634_s5 = scalar_lea.vmem [#allocation3], %s2696_s29 }
 0x1f4   : > { %v2695_v2 = vld [vmem:[%s2533_s2 + $0x100] sm:$0xff]  ;;  %s1504_s27 = sadd.s32 1, %s3811_s27  }
 0x1f5   : > { %v1514_v3 = vcombine.high %v2695_v2, %v2695_v2  ;;  %v1521_v6 = vrot.slane %v2695_v2, %v4479_v32  ;;  %p1501_p7 = scmp.ge.s32.totalorder %s1504_s27, 32  }
 0x1f6   :  { %s3813_s4 = smov (%p1501_p7), 0  }
 0x1f7   : > { %v1528_v23 = vrot.slane %v1514_v3, %v4479_v32  ;;  %v1529_v24 = vcombine.high %v1521_v6, %v1521_v6  ;;  %v1537_v29 = vrot.slane %v1521_v6, %v4479_v32 }
 0x1f9   : > { %v1530_v25 = vcombine.high %v1528_v23, %v1528_v23  ;;  %v1551_v55 = vrot.slane %v1529_v24, %v4479_v32  ;;  %v1559_v30 = vcombine.high %v1537_v29, %v1537_v29  ;;  %v1544_v8 = vrot.slane %v1528_v23, %v4479_v32 }
 0x1fa   : > { %v1566_v22 = vrot.slane %v1537_v29, %v4486_v28 }
 0x1fb   : > { %v1561_v40 = vcombine.high %v1551_v55, %v1551_v55  ;;  %v1570_v41 = vrot.slane %v1551_v55, %v4486_v28  ;;  %v1558_v42 = vrot.slane %v1530_v25, %v4479_v32  ;;  %v1574_v43 = vrot.slane %v1559_v30, %v4486_v28 }
 0x1fc   : > { %v1603_v44 = vmul.f32 %v1566_v22, %v1413_v34  ;;  %v1560_v45 = vcombine.high %v1544_v8, %v1544_v8  ;;  %v1604_v47 = vmul.f32 %v1566_v22, %v1414_v33  ;;  %v1582_v48 = vrot.slane %v1544_v8, %v4486_v28 }
 0x1fd   : > { %v1578_v46 = vrot.slane %v1561_v40, %v4486_v28  ;;  %v1605_v49 = vmul.f32 %v1570_v41, %v1425_v27  ;;  %v1606_v50 = vmul.f32 %v1570_v41, %v1426_v38  ;;  %v1607_v58 = vmul.f32 %v1574_v43, %v1437_v36 }
 0x1fe   : > { %v1608_v18 = vmul.f32 %v1574_v43, %v1438_v39  ;;  %v1562_v59 = vcombine.high %v1558_v42, %v1558_v42  ;;  %v1586_v19 = vrot.slane %v1558_v42, %v4486_v28  ;;  %v1590_v24 = vrot.slane %v1560_v45, %v4486_v28 }
 0x1ff   : > { %v1609_v2 = vmul.f32 %v1578_v46, %v1449_v37  ;;  %v1619_v3 = vadd.f32 %v1605_v49, %v1603_v44  ;;  %v1610_v6 = vmul.f32 %v1578_v46, %v1450_v35  ;;  %v1626_v23 = vadd.f32 %v1606_v50, %v1604_v47 }
 0x200   : > { %v1611_v29 = vmul.f32 %v1582_v48, %v1461_v53  ;;  %v1612_v55 = vmul.f32 %v1582_v48, %v1462_v14  ;;  %v1594_v8 = vrot.slane %v1562_v59, %v4486_v28  ;;  %v1613_v22 = vmul.f32 %v1586_v19, %v1473_v15 }
 0x201   : > { %v1620_v25 = vadd.f32 %v1619_v3, %v1607_v58  ;;  %v1627_v30 = vadd.f32 %v1626_v23, %v1608_v18  ;;  %v1614_v41 = vmul.f32 %v1586_v19, %v1474_v52  ;;  %v1615_v43 = vmul.f32 %v1590_v24, %v1485_v17 }
 0x202   : > { %v1616_v45 = vmul.f32 %v1590_v24, %v1486_v54  ;;  %v1617_v47 = vmul.f32 %v1594_v8, %v1497_v21  ;;  %v1618_v49 = vmul.f32 %v1594_v8, %v1498_v16 }
 0x203   : > { %v1621_v40 = vadd.f32 %v1620_v25, %v1609_v2  ;;  %v1628_v42 = vadd.f32 %v1627_v30, %v1610_v6 }
 0x205   : > { %v1622_v44 = vadd.f32 %v1621_v40, %v1611_v29  ;;  %v1629_v46 = vadd.f32 %v1628_v42, %v1612_v55 }
 0x207   : > { %v1623_v48 = vadd.f32 %v1622_v44, %v1613_v22  ;;  %v1630_v50 = vadd.f32 %v1629_v46, %v1614_v41 }
 0x209   : > { %v1624_v58 = vadd.f32 %v1623_v48, %v1615_v43  ;;  %v1631_v18 = vadd.f32 %v1630_v50, %v1616_v45 }
 0x20b   : > { %v1625_v59 = vadd.f32 %v1624_v58, %v1617_v47  ;;  %v1632_v19 = vadd.f32 %v1631_v18, %v1618_v49 }
 0x20c   :  { %1503 = sbr.rel (!%p1501_p7) target bundleno = 498 (0x1f2), region = 121 }
 0x20d   : > { %1635 = vst [vmem:[%s1634_s5] sm:$0xff] %v1625_v59  ;;  %v1637_v2 = vadd.f32 %v3807_v1, %v1625_v59   ;;  %v1639_v3 = vmul.f32 %v1625_v59, %v1625_v59  ;;  %1636 = vst [vmem:[%s1634_s5 + $0x8] sm:$0xff] %v1632_v19  ;;  %v1638_v6 = vadd.f32 %v3803_v0, %v1632_v19  }
 0x20e   : > { %v1640_v23 = vmul.f32 %v1632_v19, %v1632_v19 }
 0x20f   : > { %v1641_v24 = vadd.f32 %v3799_v20, %v1639_v3   ;;  %v5436_v0 = vmov %v1638_v6  ;;  %v5437_v1 = vmov %v1637_v2  ;;  %v1644_v25 = vmul.f32 (%p1501_p7), 0.03125, %v1638_v6 }
 0x210   : > { %v1642_v29 = vadd.f32 %v3795_v61, %v1640_v23   ;;  %v1643_v1 = vmul.f32 (%p1501_p7), 0.03125, %v1637_v2 }
 0x211   : > { %v5435_v20 = vmov %v1641_v24  ;;  %v1645_v55 = vmul.f32 (%p1501_p7), 0.03125, %v1641_v24  ;;  %v1648_v22 = vmul.f32 (%p1501_p7), %v1644_v25, %v1644_v25 }
 0x212   : > { %v5434_v61 = vmov %v1642_v29  ;;  %v1646_v30 = vmul.f32 (%p1501_p7), 0.03125, %v1642_v29  ;;  %v1647_v8 = vmul.f32 (%p1501_p7), %v1643_v1, %v1643_v1 }
 0x214   :  { %v1649_v40 = vsub.f32 %v1645_v55, %v1647_v8  ;;  %v1650_v41 = vsub.f32 %v1646_v30, %v1648_v22 }
 0x216   :  { %v1651_v42 = vadd.f32 1e-05, %v1649_v40  ;;  %v1652_v43 = vadd.f32 1e-05, %v1650_v41 }
 0x218   :  { %3319 = vrsqrt.f32 %v1651_v42 }
 0x219   :  { %3321 = vrsqrt.f32 %v1652_v43 }
 0x222   :  { %v3320_v44 = vpop.eup %3319 }
 0x223   :  { %v3322_v45 = vpop.eup %3321 }
 0x224 LB: > { %s2697_s30 = sshll.u32 %s3815_s4, 4  ;;  %s1669_s13 = sld [smem:[#allocation8 + %s3815_s4]]  ;;  %s3815_s4 = sphi %s3813_s4, %s1660_s4  }
 0x225   : > { %s1673_s14 = sld [smem:[#allocation9 + %s3815_s4]]  ;;  %s1662_s15 = scalar_lea.vmem [#allocation3], %s2697_s30 }
 0x226   : > { %v1663_v32 = vld [vmem:[%s1662_s15] sm:$0xff]  ;;  %v1664_v28 = vld [vmem:[%s1662_s15 + $0x8] sm:$0xff]  ;;  %s1660_s4 = sadd.s32 1, %s3815_s4  }
 0x227   : > { %v1665_v26 = vsub.f32 %v1663_v32, %v1643_v1  ;;  %v1666_v10 = vsub.f32 %v1664_v28, %v1644_v25  ;;  %p1657_p8 = scmp.ge.s32.totalorder %s1660_s4, 32  }
 0x228   :  { %v1761_v48 = vld [vmem:[%s5410_s8 + $0x80] sm:$0xff] (%p1657_p8)  ;;  %v1762_v49 = vld [vmem:[%s5410_s8 + $0x88] sm:$0xff] (%p1657_p8)  ;;  %v1763_v3 = vld [vmem:[%s5410_s8 + $0x90] sm:$0xff] (%p1657_p8) }
 0x229   : > { %v1667_v12 = vmul.f32 %v3320_v44, %v1665_v26  ;;  %v1668_v7 = vmul.f32 %v3322_v45, %v1666_v10  ;;  %v3041_v59 = vpack.c.bf16 (%p1657_p8), %v1762_v49, %v1761_v48  ;;  %v1745_v19 = vld [vmem:[%s5410_s8] sm:$0xff] (%p1657_p8)  ;;  %v1746_v2 = vld [vmem:[%s5410_s8 + $0x8] sm:$0xff] (%p1657_p8)  ;;  %v1764_v1 = vld [vmem:[%s5410_s8 + $0x98] sm:$0xff] (%p1657_p8) }
 0x22a   : > { %v1670_v9 = vstv %s1669_s13  ;;  %v3043_v29 = vpack.c.bf16 (%p1657_p8), %v1746_v2, %v1745_v19  ;;  %v3045_v25 = vpack.c.bf16 (%p1657_p8), %v1764_v1, %v1763_v3  ;;  %v1747_v55 = vld [vmem:[%s5410_s8 + $0x10] sm:$0xff] (%p1657_p8)  ;;  %v1748_v30 = vld [vmem:[%s5410_s8 + $0x18] sm:$0xff] (%p1657_p8)  ;;  %v1765_v8 = vld [vmem:[%s5410_s8 + $0xa0] sm:$0xff] (%p1657_p8) }
 0x22b   : > { %v1671_v11 = vmul.f32 %v1670_v9, %v1667_v12  ;;  %v1674_v13 = vstv %s1673_s14  ;;  %v1672_v31 = vmul.f32 %v1670_v9, %v1668_v7  ;;  %1659 = sbr.rel (!%p1657_p8) target bundleno = 548 (0x224), region = 132  ;;  %3042 = vmatprep.subr.bf16.mxu0 (%p1657_p8), %v3041_v59  ;;  %3105 = vmatprep.subr.bf16.mxu1 (%p1657_p8), %v3041_v59  ;;  %v3047_v22 = vpack.c.bf16 (%p1657_p8), %v1748_v30, %v1747_v55  ;;  %v1766_v40 = vld [vmem:[%s5410_s8 + $0xa8] sm:$0xff] (%p1657_p8)  ;;  %v1749_v44 = vld [vmem:[%s5410_s8 + $0x20] sm:$0xff] (%p1657_p8)  ;;  %v1767_v26 = vld [vmem:[%s5410_s8 + $0xb0] sm:$0xff] (%p1657_p8) }
 0x22c   :  { %3044 = vmatpush3.bf16.msra.mxu0 (%p1657_p8), %v3043_v29  ;;  %3113 = vmatpush3.bf16.msra.mxu1 (%p1657_p8), %v3043_v29  ;;  %v3049_v43 = vpack.c.bf16 (%p1657_p8), %v1766_v40, %v1765_v8  ;;  %v1750_v45 = vld [vmem:[%s5410_s8 + $0x28] sm:$0xff] (%p1657_p8)  ;;  %v1768_v10 = vld [vmem:[%s5410_s8 + $0xb8] sm:$0xff] (%p1657_p8)  ;;  %v1757_v2 = vld [vmem:[%s5410_s8 + $0x60] sm:$0xff] (%p1657_p8) }
 0x22d   : > { %v1675_v34 = vadd.f32 %v1674_v13, %v1671_v11  ;;  %v1676_v27 = vadd.f32 %v1674_v13, %v1672_v31  ;;  %3046 = vmatprep.subr.bf16.mxu0 (%p1657_p8), %v3045_v25  ;;  %3106 = vmatprep.subr.bf16.mxu1 (%p1657_p8), %v3045_v25  ;;  %v3051_v9 = vpack.c.bf16 (%p1657_p8), %v1750_v45, %v1749_v44  ;;  %v1774_v48 = vld [vmem:[%s5410_s8 + $0xe8] sm:$0xff] (%p1657_p8)  ;;  %v1776_v29 = vld [vmem:[%s5410_s8 + $0xf8] sm:$0xff] (%p1657_p8)  ;;  %v1759_v40 = vld [vmem:[%s5410_s8 + $0x70] sm:$0xff] (%p1657_p8) }
 0x22e   :  { %v3053_v31 = vpack.c.bf16 (%p1657_p8), %v1768_v10, %v1767_v26  ;;  %v1758_v3 = vld [vmem:[%s5410_s8 + $0x68] sm:$0xff] (%p1657_p8)  ;;  %v1793_v44 = vld [vmem:[%s5410_s8 + $0x180] sm:$0xff] (%p1657_p8) }
 0x22f   : > { %v1677_v36 = vmax.f32 %v1675_v34, 0.0  ;;  %v1678_v37 = vmax.f32 %v1676_v27, 0.0  ;;  %v1751_v34 = vld [vmem:[%s5410_s8 + $0x30] sm:$0xff] (%p1657_p8)  ;;  %v1752_v27 = vld [vmem:[%s5410_s8 + $0x38] sm:$0xff] (%p1657_p8)  ;;  %v3067_v55 = vpack.c.bf16 (%p1657_p8), %v1758_v3, %v1757_v2  ;;  %v1794_v45 = vld [vmem:[%s5410_s8 + $0x188] sm:$0xff] (%p1657_p8) }
 0x230   :  { %3048 = vmatpush3.bf16.msra.mxu0 (%p1657_p8), %v3047_v22  ;;  %3114 = vmatpush3.bf16.msra.mxu1 (%p1657_p8), %v3047_v22 }
 0x231   : > { %1679 = vst [vmem:[%s1662_s15] sm:$0xff] %v1677_v36  ;;  %1680 = vst [vmem:[%s1662_s15 + $0x8] sm:$0xff] %v1678_v37  ;;  %3050 = vmatprep.subr.bf16.mxu0 (%p1657_p8), %v3049_v43  ;;  %3107 = vmatprep.subr.bf16.mxu1 (%p1657_p8), %v3049_v43 }
 0x234   :  { %3052 = vmatpush3.bf16.msra.mxu0 %v3051_v9  ;;  %3115 = vmatpush3.bf16.msra.mxu1 %v3051_v9 }
 0x235   :  { %3054 = vmatprep.subr.bf16.mxu0 %v3053_v31  ;;  %3108 = vmatprep.subr.bf16.mxu1 %v3053_v31 }
 0x238   :  { %v1681_v33 = vld [vmem:[#allocation3] sm:$0xff]  ;;  %v1682_v39 = vld [vmem:[#allocation3 + $0x8] sm:$0xff]  ;;  %v1683_v57 = vld [vmem:[#allocation3 + $0x10] sm:$0xff] }
 0x239   :  { %v1697_v38 = vld [vmem:[#allocation3 + $0x80] sm:$0xff]  ;;  %v1698_v60 = vld [vmem:[#allocation3 + $0x88] sm:$0xff]  ;;  %v1699_v62 = vld [vmem:[#allocation3 + $0x90] sm:$0xff] }
 0x23a   :  { %v3323_v35 = vpack.i.bf16 %v1681_v33, %v1697_v38  ;;  %v3325_v56 = vpack.i.bf16 %v1682_v39, %v1698_v60  ;;  %v3327_v63 = vpack.i.bf16 %v1683_v57, %v1699_v62  ;;  %v1684_v4 = vld [vmem:[#allocation3 + $0x18] sm:$0xff]  ;;  %v1713_v51 = vld [vmem:[#allocation3 + $0x100] sm:$0xff]  ;;  %v1714_v15 = vld [vmem:[#allocation3 + $0x108] sm:$0xff]  ;;  %v3055_v60 = vpack.c.bf16 %v1752_v27, %v1751_v34 }
 0x23b   :  { %v1700_v5 = vld [vmem:[#allocation3 + $0x98] sm:$0xff]  ;;  %v1729_v14 = vld [vmem:[#allocation3 + $0x180] sm:$0xff]  ;;  %v1730_v52 = vld [vmem:[#allocation3 + $0x188] sm:$0xff] }
 0x23c   :  { %3324 = vxpose.xlu0.b32.start [1/16] %v3323_v35, 128  ;;  %v3329_v53 = vpack.i.bf16 %v1684_v4, %v1700_v5  ;;  %v1685_v17 = vld [vmem:[#allocation3 + $0x20] sm:$0xff]  ;;  %v3435_v21 = vpack.i.bf16 %v1713_v51, %v1729_v14  ;;  %v3437_v16 = vpack.i.bf16 %v1714_v15, %v1730_v52  ;;  %v1715_v20 = vld [vmem:[#allocation3 + $0x110] sm:$0xff]  ;;  %v1686_v46 = vld [vmem:[#allocation3 + $0x28] sm:$0xff]  ;;  %3056 = vmatpush3.bf16.msra.mxu0 %v3055_v60 }
 0x23d   :  { %v1701_v54 = vld [vmem:[#allocation3 + $0xa0] sm:$0xff]  ;;  %v1731_v0 = vld [vmem:[#allocation3 + $0x190] sm:$0xff]  ;;  %v1702_v47 = vld [vmem:[#allocation3 + $0xa8] sm:$0xff]  ;;  %3116 = vmatpush3.bf16.msra.mxu1 %v3055_v60 }
 0x23e   :  { %3436 = vxpose.xlu1.b32.start [1/16] %v3435_v21, 128  ;;  %v3331_v61 = vpack.i.bf16 %v1685_v17, %v1701_v54  ;;  %v1687_v50 = vld [vmem:[#allocation3 + $0x30] sm:$0xff]  ;;  %v3439_v18 = vpack.i.bf16 %v1715_v20, %v1731_v0  ;;  %v3333_v6 = vpack.i.bf16 %v1686_v46, %v1702_v47  ;;  %v1716_v23 = vld [vmem:[#allocation3 + $0x118] sm:$0xff]  ;;  %v1717_v42 = vld [vmem:[#allocation3 + $0x120] sm:$0xff] }
 0x23f   :  { %v1703_v58 = vld [vmem:[#allocation3 + $0xb0] sm:$0xff]  ;;  %v1732_v24 = vld [vmem:[#allocation3 + $0x198] sm:$0xff]  ;;  %v1733_v28 = vld [vmem:[#allocation3 + $0x1a0] sm:$0xff] }
 0x240   :  { %3326 = vxpose.xlu0.b32.cont [2/16] %v3325_v56, 128  ;;  %v3441_v41 = vpack.i.bf16 %v1716_v23, %v1732_v24  ;;  %v3335_v32 = vpack.i.bf16 %v1687_v50, %v1703_v58  ;;  %v1688_v12 = vld [vmem:[#allocation3 + $0x38] sm:$0xff]  ;;  %v3443_v11 = vpack.i.bf16 %v1717_v42, %v1733_v28  ;;  %v1718_v13 = vld [vmem:[#allocation3 + $0x128] sm:$0xff]  ;;  %v1769_v33 = vld [vmem:[%s5410_s8 + $0xc0] sm:$0xff] }
 0x241   :  { %v1704_v7 = vld [vmem:[#allocation3 + $0xb8] sm:$0xff]  ;;  %v1734_v37 = vld [vmem:[#allocation3 + $0x1a8] sm:$0xff]  ;;  %v1689_v39 = vld [vmem:[#allocation3 + $0x40] sm:$0xff] }
 0x242   :  { %3438 = vxpose.xlu1.b32.cont [2/16] %v3437_v16, 128  ;;  %v3337_v36 = vpack.i.bf16 %v1688_v12, %v1704_v7  ;;  %v1770_v38 = vld [vmem:[%s5410_s8 + $0xc8] sm:$0xff]  ;;  %v1705_v35 = vld [vmem:[#allocation3 + $0xc0] sm:$0xff]  ;;  %v3445_v56 = vpack.i.bf16 %v1718_v13, %v1734_v37  ;;  %v1719_v57 = vld [vmem:[#allocation3 + $0x130] sm:$0xff]  ;;  %v3073_v12 = vpack.c.bf16 %v1794_v45, %v1793_v44 }
 0x243   :  { %v3057_v62 = vpack.c.bf16 %v1770_v38, %v1769_v33  ;;  %v1754_v4 = vld [vmem:[%s5410_s8 + $0x48] sm:$0xff]  ;;  %v3339_v5 = vpack.i.bf16 %v1689_v39, %v1705_v35  ;;  %v1735_v51 = vld [vmem:[#allocation3 + $0x1b0] sm:$0xff]  ;;  %v1772_v14 = vld [vmem:[%s5410_s8 + $0xd8] sm:$0xff] }
 0x244   :  { %3328 = vxpose.xlu0.b32.cont [3/16] %v3327_v63, 128  ;;  %v1753_v63 = vld [vmem:[%s5410_s8 + $0x40] sm:$0xff]  ;;  %v1690_v15 = vld [vmem:[#allocation3 + $0x48] sm:$0xff]  ;;  %v3447_v54 = vpack.i.bf16 %v1719_v57, %v1735_v51  ;;  %v1720_v21 = vld [vmem:[#allocation3 + $0x138] sm:$0xff] }
 0x245   :  { %v1706_v52 = vld [vmem:[#allocation3 + $0xc8] sm:$0xff]  ;;  %v3059_v17 = vpack.c.bf16 %v1754_v4, %v1753_v63  ;;  %3058 = vmatprep.subr.bf16.mxu0 %v3057_v62  ;;  %v1756_v20 = vld [vmem:[%s5410_s8 + $0x58] sm:$0xff]  ;;  %v1773_v47 = vld [vmem:[%s5410_s8 + $0xe0] sm:$0xff]  ;;  %3109 = vmatprep.subr.bf16.mxu1 %v3057_v62 }
 0x246   :  { %3440 = vxpose.xlu1.b32.cont [3/16] %v3439_v18, 128  ;;  %v3341_v0 = vpack.i.bf16 %v1690_v15, %v1706_v52  ;;  %v1736_v46 = vld [vmem:[#allocation3 + $0x1b8] sm:$0xff]  ;;  %v1691_v49 = vld [vmem:[#allocation3 + $0x50] sm:$0xff]  ;;  %v1721_v59 = vld [vmem:[#allocation3 + $0x140] sm:$0xff]  ;;  %v3065_v19 = vpack.c.bf16 %v1774_v48, %v1773_v47 }
 0x247   :  { %v1707_v50 = vld [vmem:[#allocation3 + $0xd0] sm:$0xff]  ;;  %3060 = vmatpush3.bf16.msra.mxu0 %v3059_v17  ;;  %3117 = vmatpush3.bf16.msra.mxu1 %v3059_v17  ;;  %v3449_v18 = vpack.i.bf16 %v1720_v21, %v1736_v46  ;;  %v1737_v23 = vld [vmem:[#allocation3 + $0x1c0] sm:$0xff]  ;;  %v1692_v1 = vld [vmem:[#allocation3 + $0x58] sm:$0xff] }
 0x248   :  { %3330 = vxpose.xlu0.b32.cont [4/16] %v3329_v53, 128  ;;  %v1771_v53 = vld [vmem:[%s5410_s8 + $0xd0] sm:$0xff]  ;;  %v1708_v25 = vld [vmem:[#allocation3 + $0xd8] sm:$0xff]  ;;  %v3451_v30 = vpack.i.bf16 %v1721_v59, %v1737_v23  ;;  %v1722_v8 = vld [vmem:[#allocation3 + $0x148] sm:$0xff] }
 0x249   :  { %v3061_v16 = vpack.c.bf16 %v1772_v14, %v1771_v53  ;;  %v1775_v24 = vld [vmem:[%s5410_s8 + $0xf0] sm:$0xff]  ;;  %v3345_v42 = vpack.i.bf16 %v1692_v1, %v1708_v25  ;;  %v1738_v43 = vld [vmem:[#allocation3 + $0x1c8] sm:$0xff]  ;;  %v1709_v28 = vld [vmem:[#allocation3 + $0xe0] sm:$0xff] }
 0x24a   :  { %3442 = vxpose.xlu1.b32.cont [4/16] %v3441_v41, 128  ;;  %v3069_v22 = vpack.c.bf16 %v1776_v29, %v1775_v24  ;;  %v1760_v41 = vld [vmem:[%s5410_s8 + $0x78] sm:$0xff]  ;;  %v3453_v10 = vpack.i.bf16 %v1722_v8, %v1738_v43  ;;  %v1723_v9 = vld [vmem:[#allocation3 + $0x150] sm:$0xff]  ;;  %v1694_v13 = vld [vmem:[#allocation3 + $0x68] sm:$0xff] }
 0x24b   :  { %3062 = vmatprep.subr.bf16.mxu0 %v3061_v16  ;;  %3110 = vmatprep.subr.bf16.mxu1 %v3061_v16  ;;  %v3071_v26 = vpack.c.bf16 %v1760_v41, %v1759_v40  ;;  %v1710_v31 = vld [vmem:[#allocation3 + $0xe8] sm:$0xff]  ;;  %v1740_v37 = vld [vmem:[#allocation3 + $0x1d8] sm:$0xff]  ;;  %v1695_v33 = vld [vmem:[#allocation3 + $0x70] sm:$0xff] }
 0x24c   :  { %3332 = vxpose.xlu0.b32.cont [5/16] %v3331_v61, 128  ;;  %v1755_v61 = vld [vmem:[%s5410_s8 + $0x50] sm:$0xff]  ;;  %v3349_v27 = vpack.i.bf16 %v1694_v13, %v1710_v31  ;;  %v1725_v60 = vld [vmem:[#allocation3 + $0x160] sm:$0xff]  ;;  %v1696_v57 = vld [vmem:[#allocation3 + $0x78] sm:$0xff] }
 0x24d   :  { %v3063_v58 = vpack.c.bf16 %v1756_v20, %v1755_v61  ;;  %v1711_v38 = vld [vmem:[#allocation3 + $0xf0] sm:$0xff]  ;;  %v1712_v62 = vld [vmem:[#allocation3 + $0xf8] sm:$0xff]  ;;  %v1742_v51 = vld [vmem:[#allocation3 + $0x1e8] sm:$0xff] }
 0x24e   :  { %3444 = vxpose.xlu1.b32.cont [5/16] %v3443_v11, 128  ;;  %v1739_v11 = vld [vmem:[#allocation3 + $0x1d0] sm:$0xff]  ;;  %v3351_v35 = vpack.i.bf16 %v1695_v33, %v1711_v38  ;;  %v3353_v4 = vpack.i.bf16 %v1696_v57, %v1712_v62  ;;  %v1728_v17 = vld [vmem:[#allocation3 + $0x178] sm:$0xff]  ;;  %v1781_v43 = vld [vmem:[%s5410_s8 + $0x120] sm:$0xff] }
 0x24f   :  { %3064 = vmatpush3.bf16.msra.mxu0 %v3063_v58  ;;  %3118 = vmatpush3.bf16.msra.mxu1 %v3063_v58  ;;  %v3455_v34 = vpack.i.bf16 %v1723_v9, %v1739_v11  ;;  %v1727_v14 = vld [vmem:[#allocation3 + $0x170] sm:$0xff]  ;;  %v1777_v58 = vld [vmem:[%s5410_s8 + $0x100] sm:$0xff]  ;;  %v1780_v1 = vld [vmem:[%s5410_s8 + $0x118] sm:$0xff] }
 0x250   :  { %3334 = vxpose.xlu0.b32.cont [6/16] %v3333_v6, 128  ;;  %v3343_v6 = vpack.i.bf16 %v1691_v49, %v1707_v50  ;;  %3066 = vmatprep.subr.bf16.mxu0 %v3065_v19  ;;  %v1743_v15 = vld [vmem:[#allocation3 + $0x1f0] sm:$0xff]  ;;  %v1782_v44 = vld [vmem:[%s5410_s8 + $0x128] sm:$0xff]  ;;  %v1784_v13 = vld [vmem:[%s5410_s8 + $0x138] sm:$0xff] }
 0x251   :  { %3111 = vmatprep.subr.bf16.mxu1 %v3065_v19  ;;  %v3463_v52 = vpack.i.bf16 %v1727_v14, %v1743_v15  ;;  %v1795_v59 = vld [vmem:[%s5410_s8 + $0x190] sm:$0xff]  ;;  %v1796_v19 = vld [vmem:[%s5410_s8 + $0x198] sm:$0xff] }
 0x252   :  { %3446 = vxpose.xlu1.b32.cont [6/16] %v3445_v56, 128  ;;  %v1741_v56 = vld [vmem:[#allocation3 + $0x1e0] sm:$0xff]  ;;  %v1779_v29 = vld [vmem:[%s5410_s8 + $0x110] sm:$0xff]  ;;  %v3077_v25 = vpack.c.bf16 %v1796_v19, %v1795_v59  ;;  %v1804_v62 = vld [vmem:[%s5410_s8 + $0x1d8] sm:$0xff] }
 0x253   :  { %3068 = vmatpush3.bf16.msra.mxu0 %v3067_v55  ;;  %3119 = vmatpush3.bf16.msra.mxu1 %v3067_v55  ;;  %v3459_v63 = vpack.i.bf16 %v1725_v60, %v1741_v56  ;;  %v1797_v55 = vld [vmem:[%s5410_s8 + $0x1a0] sm:$0xff]  ;;  %v3079_v40 = vpack.c.bf16 %v1780_v1, %v1779_v29  ;;  %v1783_v11 = vld [vmem:[%s5410_s8 + $0x130] sm:$0xff]  ;;  %v1786_v60 = vld [vmem:[%s5410_s8 + $0x148] sm:$0xff] }
 0x254   :  { %3336 = vxpose.xlu0.b32.cont [7/16] %v3335_v32, 128  ;;  %v1693_v32 = vld [vmem:[#allocation3 + $0x60] sm:$0xff]  ;;  %3070 = vmatprep.subr.bf16.mxu0 %v3069_v22  ;;  %v3087_v33 = vpack.c.bf16 %v1784_v13, %v1783_v11  ;;  %v1803_v57 = vld [vmem:[%s5410_s8 + $0x1d0] sm:$0xff]  ;;  %v1788_v15 = vld [vmem:[%s5410_s8 + $0x158] sm:$0xff] }
 0x255   :  { %v3347_v7 = vpack.i.bf16 %v1693_v32, %v1709_v28  ;;  %3112 = vmatprep.subr.bf16.mxu1 %v3069_v22  ;;  %v1799_v32 = vld [vmem:[%s5410_s8 + $0x1b0] sm:$0xff]  ;;  %v1800_v28 = vld [vmem:[%s5410_s8 + $0x1b8] sm:$0xff] }
 0x256   :  { %3448 = vxpose.xlu1.b32.cont [7/16] %v3447_v54, 128  ;;  %v1744_v54 = vld [vmem:[#allocation3 + $0x1f8] sm:$0xff]  ;;  %v3085_v31 = vpack.c.bf16 %v1800_v28, %v1799_v32  ;;  %v1787_v14 = vld [vmem:[%s5410_s8 + $0x150] sm:$0xff] }
 0x257   :  { %3072 = vmatpush3.bf16.msra.mxu0 %v3071_v26  ;;  %3120 = vmatpush3.bf16.msra.mxu1 %v3071_v26  ;;  %v3465_v21 = vpack.i.bf16 %v1728_v17, %v1744_v54  ;;  %v1805_v17 = vld [vmem:[%s5410_s8 + $0x1e0] sm:$0xff]  ;;  %v1806_v54 = vld [vmem:[%s5410_s8 + $0x1e8] sm:$0xff] }
 0x258   :  { %3338 = vxpose.xlu0.b32.cont [8/16] %v3337_v36, 128  ;;  %3074 = vmatprep.subr.bf16.mxu1 %v3073_v12  ;;  %v1724_v36 = vld [vmem:[#allocation3 + $0x158] sm:$0xff]  ;;  %v3083_v12 = vpack.c.bf16 %v1782_v44, %v1781_v43 }
 0x259   :  { %v3457_v39 = vpack.i.bf16 %v1724_v36, %v1740_v37 }
 0x25a   :  { %3450 = vxpose.xlu1.b32.cont [8/16] %v3449_v18, 128  ;;  %v1778_v18 = vld [vmem:[%s5410_s8 + $0x108] sm:$0xff] }
 0x25c   :  { %3340 = vxpose.xlu0.b32.cont [9/16] %v3339_v5, 128  ;;  %v1726_v5 = vld [vmem:[#allocation3 + $0x168] sm:$0xff] }
 0x25d   :  { %v3461_v53 = vpack.i.bf16 %v1726_v5, %v1742_v51 }
 0x25e   :  { %3452 = vxpose.xlu1.b32.cont [9/16] %v3451_v30, 128  ;;  %v1798_v30 = vld [vmem:[%s5410_s8 + $0x1a8] sm:$0xff] }
 0x25f   :  { %v3081_v45 = vpack.c.bf16 %v1798_v30, %v1797_v55 }
 0x260   :  { %3342 = vxpose.xlu0.b32.cont [10/16] %v3341_v0, 128 }
 0x262   :  { %3454 = vxpose.xlu1.b32.cont [10/16] %v3453_v10, 128 }
 0x264   :  { %3344 = vxpose.xlu0.b32.cont [11/16] %v3343_v6, 128  ;;  %v3075_v6 = vpack.c.bf16 %v1778_v18, %v1777_v58 }
 0x266   :  { %3456 = vxpose.xlu1.b32.cont [11/16] %v3455_v34, 128  ;;  %v1801_v34 = vld [vmem:[%s5410_s8 + $0x1c0] sm:$0xff] }
 0x268   :  { %3346 = vxpose.xlu0.b32.cont [12/16] %v3345_v42, 128 }
 0x26a   :  { %3458 = vxpose.xlu1.b32.cont [12/16] %v3457_v39, 128 }
 0x26c   :  { %3348 = vxpose.xlu0.b32.cont [13/16] %v3347_v7, 128 }
 0x26e   :  { %3460 = vxpose.xlu1.b32.cont [13/16] %v3459_v63, 128 }
 0x270   :  { %3350 = vxpose.xlu0.b32.cont [14/16] %v3349_v27, 128  ;;  %v1802_v27 = vld [vmem:[%s5410_s8 + $0x1c8] sm:$0xff] }
 0x271   :  { %v3089_v56 = vpack.c.bf16 %v1802_v27, %v1801_v34 }
 0x272   :  { %3462 = vxpose.xlu1.b32.cont [14/16] %v3461_v53, 128 }
 0x274   :  { %3352 = vxpose.xlu0.b32.cont [15/16] %v3351_v35, 128  ;;  %v1785_v35 = vld [vmem:[%s5410_s8 + $0x140] sm:$0xff] }
 0x275   :  { %v3091_v5 = vpack.c.bf16 %v1786_v60, %v1785_v35 }
 0x276   :  { %3464 = vxpose.xlu1.b32.cont [15/16] %v3463_v52, 128  ;;  %v3093_v52 = vpack.c.bf16 %v1804_v62, %v1803_v57 }
 0x278   :  { %3354 = vxpose.xlu0.b32.end [16/16] %v3353_v4, 128 }
 0x27a   :  { %3466 = vxpose.xlu1.b32.end [16/16] %v3465_v21, 128 }
 0x2bc   :  { %v3355_v16 = vpop.trf.xlu0 }
 0x2bd   :  { %v3356_v61 = vunpack.i.l.bf16 %v3355_v16  ;;  %v3359_v20 = vunpack.i.h.bf16 %v3355_v16 }
 0x2be   :  { %v4937_v2 = vpop.trf.xlu1 }
 0x2bf   :  { %2008 = vmatprep.mubr.f32.mxu0 %v3356_v61  ;;  %v3095_v61 = vpack.c.bf16 %v1788_v15, %v1787_v14  ;;  %v3471_v35 = vunpack.i.h.bf16 %v4937_v2 }
 0x2c0   :  { %v3360_v0 = vpop.trf.xlu0  ;;  %2009 = vmatmul.mubr.f32.vlgmr.msra.gmra.mrb[64].mxu0 %v3359_v20 }
 0x2c1   :  { %v3361_v46 = vunpack.i.l.bf16 %v3360_v0  ;;  %v3364_v47 = vunpack.i.h.bf16 %v3360_v0 }
 0x2c2   :  { %v4951_v8 = vpop.trf.xlu1 }
 0x2c3   :  { %2013 = vmatprep.mubr.f32.mxu0 %v3361_v46  ;;  %v1789_v46 = vld [vmem:[%s5410_s8 + $0x160] sm:$0xff]  ;;  %v3473_v60 = vunpack.i.l.bf16 %v4951_v8  ;;  %v3476_v57 = vunpack.i.h.bf16 %v4951_v8 }
 0x2c4   :  { %v3365_v48 = vpop.trf.xlu0  ;;  %2014 = vmatmul.mubr.f32.gmra.mrb[66].mxu0 %v3364_v47  ;;  %v1790_v47 = vld [vmem:[%s5410_s8 + $0x168] sm:$0xff] }
 0x2c5   :  { %v3366_v49 = vunpack.i.l.bf16 %v3365_v48  ;;  %v3369_v50 = vunpack.i.h.bf16 %v3365_v48  ;;  %v3097_v48 = vpack.c.bf16 %v1806_v54, %v1805_v17  ;;  %v3099_v59 = vpack.c.bf16 %v1790_v47, %v1789_v46 }
 0x2c6   :  { %v4965_v26 = vpop.trf.xlu1 }
 0x2c7   :  { %2018 = vmatprep.mubr.f32.mxu0 %v3366_v49  ;;  %v1807_v49 = vld [vmem:[%s5410_s8 + $0x1f0] sm:$0xff]  ;;  %v3478_v62 = vunpack.i.l.bf16 %v4965_v26 }
 0x2c8   :  { %v3370_v3 = vpop.trf.xlu0  ;;  %2019 = vmatmul.mubr.f32.gmra.mrb[68].mxu0 %v3369_v50  ;;  %v1808_v50 = vld [vmem:[%s5410_s8 + $0x1f8] sm:$0xff] }
 0x2c9   :  { %v3371_v23 = vunpack.i.l.bf16 %v3370_v3  ;;  %v3374_v24 = vunpack.i.h.bf16 %v3370_v3 }
 0x2ca   :  { %v4979_v36 = vpop.trf.xlu1 }
 0x2cb   :  { %2023 = vmatprep.mubr.f32.mxu1 %v3371_v23  ;;  %v1792_v23 = vld [vmem:[%s5410_s8 + $0x178] sm:$0xff] }
 0x2cc   :  { %v3375_v22 = vpop.trf.xlu0  ;;  %2024 = vmatmul.mubr.f32.vlgmr.msra.gmra.mrb[0].mxu1 %v3374_v24  ;;  %v3101_v24 = vpack.c.bf16 %v1808_v50, %v1807_v49 }
 0x2cd   :  { %3076 = vmatpush3.bf16.msra.mxu1 %v3075_v6  ;;  %v3376_v41 = vunpack.i.l.bf16 %v3375_v22  ;;  %v3379_v42 = vunpack.i.h.bf16 %v3375_v22  ;;  %v1791_v6 = vld [vmem:[%s5410_s8 + $0x170] sm:$0xff] }
 0x2ce   :  { %3078 = vmatprep.subr.bf16.mxu1 %v3077_v25  ;;  %v4993_v63 = vpop.trf.xlu1  ;;  %v3103_v25 = vpack.c.bf16 %v1792_v23, %v1791_v6 }
 0x2cf   :  { %2028 = vmatprep.mubr.f32.mxu1 %v3376_v41  ;;  %v3491_v14 = vunpack.i.h.bf16 %v4993_v63 }
 0x2d0   :  { %v3380_v10 = vpop.trf.xlu0  ;;  %2029 = vmatmul.mubr.f32.gmra.mrb[2].mxu1 %v3379_v42 }
 0x2d1   :  { %v3381_v7 = vunpack.i.l.bf16 %v3380_v10  ;;  %3080 = vmatpush3.bf16.msra.mxu1 %v3079_v40  ;;  %v3384_v9 = vunpack.i.h.bf16 %v3380_v10 }
 0x2d2   :  { %3082 = vmatprep.subr.bf16.mxu1 %v3081_v45  ;;  %v5007_v21 = vpop.trf.xlu1 }
 0x2d3   :  { %2033 = vmatprep.mubr.f32.mxu1 %v3381_v7  ;;  %v3493_v8 = vunpack.i.l.bf16 %v5007_v21  ;;  %v3496_v15 = vunpack.i.h.bf16 %v5007_v21 }
 0x2d4   :  { %v3385_v37 = vpop.trf.xlu0  ;;  %2034 = vmatmul.mubr.f32.gmra.mrb[4].mxu1 %v3384_v9 }
 0x2d5   :  { %v3386_v38 = vunpack.i.l.bf16 %v3385_v37  ;;  %v3389_v39 = vunpack.i.h.bf16 %v3385_v37  ;;  %3084 = vmatpush3.bf16.msra.mxu1 %v3083_v12  ;;  %v3468_v37 = vunpack.i.l.bf16 %v4937_v2  ;;  %v3486_v2 = vunpack.i.h.bf16 %v4979_v36 }
 0x2d6   :  { %3086 = vmatprep.subr.bf16.mxu1 %v3085_v31  ;;  %v5021_v58 = vpop.trf.xlu1 }
 0x2d7   :  { %2038 = vmatprep.mubr.f32.mxu1 %v3386_v38 }
 0x2d8   :  { %v3390_v4 = vpop.trf.xlu0  ;;  %2039 = vmatmul.mubr.f32.gmra.mrb[6].mxu1 %v3389_v39 }
 0x2d9   :  { %v3391_v51 = vunpack.i.l.bf16 %v3390_v4  ;;  %v3394_v53 = vunpack.i.h.bf16 %v3390_v4  ;;  %3088 = vmatpush3.bf16.msra.mxu1 %v3087_v33 }
 0x2da   :  { %3090 = vmatprep.subr.bf16.mxu1 %v3089_v56  ;;  %v5029_v29 = vpop.trf.xlu1 }
 0x2db   :  { %2043 = vmatprep.mubr.f32.mxu1 %v3391_v51  ;;  %v3483_v51 = vunpack.i.l.bf16 %v4979_v36  ;;  %v3503_v36 = vunpack.i.l.bf16 %v5029_v29  ;;  %v3506_v17 = vunpack.i.h.bf16 %v5029_v29 }
 0x2dc   :  { %v3395_v16 = vpop.trf.xlu0  ;;  %2044 = vmatmul.mubr.f32.gmra.mrb[8].mxu1 %v3394_v53  ;;  %v3488_v53 = vunpack.i.l.bf16 %v4993_v63 }
 0x2dd   :  { %v3396_v20 = vunpack.i.l.bf16 %v3395_v16  ;;  %v3399_v0 = vunpack.i.h.bf16 %v3395_v16  ;;  %3092 = vmatpush3.bf16.msra.mxu1 %v3091_v5  ;;  %v3481_v5 = vunpack.i.h.bf16 %v4965_v26  ;;  %v3498_v26 = vunpack.i.l.bf16 %v5021_v58 }
 0x2de   :  { %3094 = vmatprep.subr.bf16.mxu1 %v3093_v52  ;;  %v5031_v22 = vpop.trf.xlu1  ;;  %v3501_v52 = vunpack.i.h.bf16 %v5021_v58 }
 0x2df   :  { %2048 = vmatprep.mubr.f32.mxu1 %v3396_v20  ;;  %v3508_v63 = vunpack.i.l.bf16 %v5031_v22  ;;  %v3511_v54 = vunpack.i.h.bf16 %v5031_v22 }
 0x2e0   :  { %v3400_v18 = vpop.trf.xlu0  ;;  %2049 = vmatmul.mubr.f32.gmra.mrb[10].mxu1 %v3399_v0 }
 0x2e1   :  { %v3401_v19 = vunpack.i.l.bf16 %v3400_v18  ;;  %v3404_v3 = vunpack.i.h.bf16 %v3400_v18  ;;  %3096 = vmatpush3.bf16.msra.mxu1 %v3095_v61 }
 0x2e2   :  { %3098 = vmatprep.subr.bf16.mxu1 %v3097_v48  ;;  %v5033_v43 = vpop.trf.xlu1 }
 0x2e3   :  { %2053 = vmatprep.mubr.f32.mxu1 %v3401_v19  ;;  %v3513_v21 = vunpack.i.l.bf16 %v5033_v43  ;;  %v3516_v16 = vunpack.i.h.bf16 %v5033_v43 }
 0x2e4   :  { %v3405_v1 = vpop.trf.xlu0  ;;  %2054 = vmatmul.mubr.f32.gmra.mrb[12].mxu1 %v3404_v3 }
 0x2e5   :  { %v3406_v55 = vunpack.i.l.bf16 %v3405_v1  ;;  %v3409_v30 = vunpack.i.h.bf16 %v3405_v1  ;;  %3100 = vmatpush3.bf16.msra.mxu1 %v3099_v59 }
 0x2e6   :  { %3102 = vmatprep.subr.bf16.mxu1 %v3101_v24  ;;  %v5035_v28 = vpop.trf.xlu1 }
 0x2e7   :  { %2058 = vmatprep.mubr.f32.mxu1 %v3406_v55  ;;  %v3518_v61 = vunpack.i.l.bf16 %v5035_v28  ;;  %v3521_v20 = vunpack.i.h.bf16 %v5035_v28 }
 0x2e8   :  { %v3410_v40 = vpop.trf.xlu0  ;;  %2059 = vmatmul.mubr.f32.gmra.mrb[14].mxu1 %v3409_v30 }
 0x2e9   :  { %v3411_v41 = vunpack.i.l.bf16 %v3410_v40  ;;  %v3414_v42 = vunpack.i.h.bf16 %v3410_v40  ;;  %3104 = vmatpush3.bf16.msra.mxu1 %v3103_v25 }
 0x2ea   :  { %v5037_v9 = vpop.trf.xlu1 }
 0x2eb   :  { %2063 = vmatprep.mubr.f32.mxu1 %v3411_v41  ;;  %v3523_v0 = vunpack.i.l.bf16 %v5037_v9  ;;  %v3526_v46 = vunpack.i.h.bf16 %v5037_v9 }
 0x2ec   :  { %v3415_v44 = vpop.trf.xlu0  ;;  %2064 = vmatmul.mubr.f32.gmra.mrb[16].mxu1 %v3414_v42 }
 0x2ed   :  { %v3416_v45 = vunpack.i.l.bf16 %v3415_v44  ;;  %v3419_v32 = vunpack.i.h.bf16 %v3415_v44 }
 0x2ee   :  { %v3527_v34 = vpop.trf.xlu1 }
 0x2ef   :  { %2068 = vmatprep.mubr.f32.mxu1 %v3416_v45  ;;  %v3528_v47 = vunpack.i.l.bf16 %v3527_v34  ;;  %v3531_v48 = vunpack.i.h.bf16 %v3527_v34 }
 0x2f0   :  { %v3420_v10 = vpop.trf.xlu0  ;;  %2069 = vmatmul.mubr.f32.gmra.mrb[18].mxu1 %v3419_v32 }
 0x2f1   :  { %v3421_v12 = vunpack.i.l.bf16 %v3420_v10  ;;  %v3424_v7 = vunpack.i.h.bf16 %v3420_v10 }
 0x2f2   :  { %v3532_v39 = vpop.trf.xlu1 }
 0x2f3   :  { %2073 = vmatprep.mubr.f32.mxu1 %v3421_v12  ;;  %v3533_v49 = vunpack.i.l.bf16 %v3532_v39  ;;  %v3536_v50 = vunpack.i.h.bf16 %v3532_v39 }
 0x2f4   :  { %v3425_v11 = vpop.trf.xlu0  ;;  %2074 = vmatmul.mubr.f32.gmra.mrb[20].mxu1 %v3424_v7 }
 0x2f5   :  { %v3426_v13 = vunpack.i.l.bf16 %v3425_v11  ;;  %v3429_v31 = vunpack.i.h.bf16 %v3425_v11 }
 0x2f6   :  { %v3537_v56 = vpop.trf.xlu1 }
 0x2f7   :  { %2078 = vmatprep.mubr.f32.mxu1 %v3426_v13  ;;  %v3538_v58 = vunpack.i.l.bf16 %v3537_v56  ;;  %v3541_v18 = vunpack.i.h.bf16 %v3537_v56 }
 0x2f8   :  { %v3430_v27 = vpop.trf.xlu0  ;;  %2079 = vmatmul.mubr.f32.gmra.mrb[22].mxu1 %v3429_v31 }
 0x2f9   :  { %v3431_v33 = vunpack.i.l.bf16 %v3430_v27  ;;  %v3434_v38 = vunpack.i.h.bf16 %v3430_v27 }
 0x2fa   :  { %v3542_v4 = vpop.trf.xlu1 }
 0x2fb   :  { %2083 = vmatprep.mubr.f32.mxu1 %v3431_v33  ;;  %v3543_v59 = vunpack.i.l.bf16 %v3542_v4  ;;  %v3546_v19 = vunpack.i.h.bf16 %v3542_v4 }
 0x2fc   :  { %2084 = vmatmul.mubr.f32.gmra.mrb[24].mxu1 %v3434_v38 }
 0x2fd   :  { %2153 = vmatprep.mubr.f32.mxu1 %v3468_v37 }
 0x300   :  { %2154 = vmatmul.mubr.f32.vlgmr.msra.gmra.mrb[26].mxu1 %v3471_v35 }
 0x301   :  { %2158 = vmatprep.mubr.f32.mxu1 %v3473_v60 }
 0x304   :  { %2159 = vmatmul.mubr.f32.gmra.mrb[28].mxu1 %v3476_v57 }
 0x305   :  { %2163 = vmatprep.mubr.f32.mxu1 %v3478_v62 }
 0x308   :  { %2164 = vmatmul.mubr.f32.gmra.mrb[30].mxu1 %v3481_v5 }
 0x309   :  { %2168 = vmatprep.mubr.f32.mxu1 %v3483_v51 }
 0x30c   :  { %2169 = vmatmul.mubr.f32.gmra.mrb[32].mxu1 %v3486_v2 }
 0x30d   :  { %2173 = vmatprep.mubr.f32.mxu1 %v3488_v53 }
 0x310   :  { %2174 = vmatmul.mubr.f32.gmra.mrb[34].mxu1 %v3491_v14 }
 0x311   :  { %2178 = vmatprep.mubr.f32.mxu1 %v3493_v8 }
 0x314   :  { %2179 = vmatmul.mubr.f32.gmra.mrb[36].mxu1 %v3496_v15 }
 0x315   :  { %2183 = vmatprep.mubr.f32.mxu1 %v3498_v26 }
 0x318   :  { %2184 = vmatmul.mubr.f32.gmra.mrb[38].mxu1 %v3501_v52 }
 0x319   :  { %2188 = vmatprep.mubr.f32.mxu1 %v3503_v36 }
 0x31c   :  { %2189 = vmatmul.mubr.f32.gmra.mrb[40].mxu1 %v3506_v17 }
 0x31d   :  { %2193 = vmatprep.mubr.f32.mxu1 %v3508_v63  ;;  %v5090_v63 = vld [vmem:[%s5411_s9] ss:$0 sm:$0xff] }
 0x320   :  { %2194 = vmatmul.mubr.f32.gmra.mrb[42].mxu1 %v3511_v54 }
 0x321   :  { %2198 = vmatprep.mubr.f32.mxu1 %v3513_v21 }
 0x324   :  { %2199 = vmatmul.mubr.f32.gmra.mrb[44].mxu1 %v3516_v16 }
 0x325   :  { %2203 = vmatprep.mubr.f32.mxu1 %v3518_v61 }
 0x328   :  { %2204 = vmatmul.mubr.f32.gmra.mrb[46].mxu1 %v3521_v20 }
 0x329   :  { %2208 = vmatprep.mubr.f32.mxu1 %v3523_v0 }
 0x32c   :  { %2209 = vmatmul.mubr.f32.gmra.mrb[48].mxu1 %v3526_v46 }
 0x32d   :  { %2213 = vmatprep.mubr.f32.mxu1 %v3528_v47 }
 0x330   :  { %2214 = vmatmul.mubr.f32.gmra.mrb[50].mxu1 %v3531_v48 }
 0x331   :  { %2218 = vmatprep.mubr.f32.mxu1 %v3533_v49 }
 0x334   :  { %2219 = vmatmul.mubr.f32.gmra.mrb[52].mxu1 %v3536_v50 }
 0x335   :  { %2223 = vmatprep.mubr.f32.mxu1 %v3538_v58 }
 0x338   :  { %2224 = vmatmul.mubr.f32.gmra.mrb[54].mxu1 %v3541_v18 }
 0x339   :  { %2228 = vmatprep.mubr.f32.mxu1 %v3543_v59 }
 0x33c   :  { %2229 = vmatmul.mubr.f32.gmra.mrb[56].mxu1 %v3546_v19 }
 0x393   :  { %v2801_v3 = vpop.f32.mrb[64].mxu0 }
 0x394   :  { %v2802_v6 = vpop.f32.mrb[65].mxu0 }
 0x395   :  { %v2803_v23 = vadd.f32 %v2802_v6, %v2801_v3 }
 0x397   :  { %v2804_v24 = vpop.f32.mrb[66].mxu0  ;;  %v2011_v16 = vadd.f32 %v2803_v23, %v5090_v63 }
 0x398   :  { %v2805_v29 = vpop.f32.mrb[67].mxu0 }
 0x399   :  { %v2806_v1 = vadd.f32 %v2805_v29, %v2804_v24 }
 0x39b   :  { %v2807_v25 = vpop.f32.mrb[68].mxu0  ;;  %v2016_v47 = vadd.f32 %v2806_v1, %v5090_v63 }
 0x39c   :  { %v2808_v55 = vpop.f32.mrb[69].mxu0 }
 0x39d   :  { %v2809_v30 = vadd.f32 %v2808_v55, %v2807_v25 }
 0x39f   :  { %v2810_v22 = vpop.f32.mrb[0].mxu1  ;;  %v2021_v59 = vadd.f32 %v2809_v30, %v5090_v63 }
 0x3a0   :  { %v2811_v40 = vpop.f32.mrb[1].mxu1 }
 0x3a1   :  { %v2812_v41 = vadd.f32 %v2811_v40, %v2810_v22 }
 0x3a3   :  { %v2813_v42 = vpop.f32.mrb[2].mxu1  ;;  %v2026_v29 = vadd.f32 %v2812_v41, %v5090_v63 }
 0x3a4   :  { %v2814_v43 = vpop.f32.mrb[3].mxu1 }
 0x3a5   :  { %v5063_v44 = vadd.f32 %v2814_v43, %v2813_v42 }
 0x3a7   :  { %v2816_v45 = vpop.f32.mrb[4].mxu1  ;;  %v2031_v40 = vadd.f32 %v5063_v44, %v5090_v63 }
 0x3a8   :  { %v2817_v32 = vpop.f32.mrb[5].mxu1 }
 0x3a9   :  { %v5065_v28 = vadd.f32 %v2817_v32, %v2816_v45 }
 0x3ab   :  { %v2819_v10 = vpop.f32.mrb[6].mxu1 }
 0x3ac   :  { %v2820_v12 = vpop.f32.mrb[7].mxu1 }
 0x3ad   :  { %v5067_v7 = vadd.f32 %v2820_v12, %v2819_v10  ;;  %v2036_v10 = vadd.f32 %v5065_v28, %v5090_v63 }
 0x3af   :  { %v2822_v9 = vpop.f32.mrb[8].mxu1 }
 0x3b0   :  { %v2823_v11 = vpop.f32.mrb[9].mxu1 }
 0x3b1   :  { %v5069_v13 = vadd.f32 %v2823_v11, %v2822_v9 }
 0x3b3   :  { %v2825_v31 = vpop.f32.mrb[10].mxu1 }
 0x3b4   :  { %v2826_v34 = vpop.f32.mrb[11].mxu1 }
 0x3b5   :  { %v5071_v27 = vadd.f32 %v2826_v34, %v2825_v31  ;;  %v2041_v34 = vadd.f32 %v5067_v7, %v5090_v63 }
 0x3b7   :  { %v2828_v37 = vpop.f32.mrb[12].mxu1 }
 0x3b8   :  { %v2829_v33 = vpop.f32.mrb[13].mxu1 }
 0x3b9   :  { %v5073_v38 = vadd.f32 %v2829_v33, %v2828_v37 }
 0x3bb   :  { %v2831_v39 = vpop.f32.mrb[14].mxu1 }
 0x3bc   :  { %v2832_v35 = vpop.f32.mrb[15].mxu1 }
 0x3bd   :  { %v5075_v60 = vadd.f32 %v2832_v35, %v2831_v39 }
 0x3bf   :  { %v2834_v56 = vpop.f32.mrb[16].mxu1 }
 0x3c0   :  { %v2835_v57 = vpop.f32.mrb[17].mxu1 }
 0x3c1   :  { %v5077_v62 = vadd.f32 %v2835_v57, %v2834_v56  ;;  %v2046_v56 = vadd.f32 %v5069_v13, %v5090_v63 }
 0x3c3   :  { %v2837_v4 = vpop.f32.mrb[18].mxu1 }
 0x3c4   :  { %v2838_v5 = vpop.f32.mrb[19].mxu1 }
 0x3c5   :  { %v5079_v51 = vadd.f32 %v2838_v5, %v2837_v4 }
 0x3c7   :  { %v2840_v2 = vpop.f32.mrb[20].mxu1 }
 0x3c8   :  { %v2841_v53 = vpop.f32.mrb[21].mxu1 }
 0x3c9   :  { %v5081_v14 = vadd.f32 %v2841_v53, %v2840_v2  ;;  %v2051_v53 = vadd.f32 %v5071_v27, %v5090_v63 }
 0x3cb   :  { %v2843_v8 = vpop.f32.mrb[22].mxu1 }
 0x3cc   :  { %v2844_v15 = vpop.f32.mrb[23].mxu1 }
 0x3cd   :  { %v5083_v26 = vadd.f32 %v2844_v15, %v2843_v8 }
 0x3cf   :  { %v2846_v52 = vpop.f32.mrb[24].mxu1 }
 0x3d0   :  { %v2847_v36 = vpop.f32.mrb[25].mxu1 }
 0x3d1   :  { %v5085_v17 = vadd.f32 %v2847_v36, %v2846_v52 }
 0x3d3   :  { %v2881_v54 = vpop.f32.mrb[26].mxu1 }
 0x3d4   :  { %v2882_v21 = vpop.f32.mrb[27].mxu1 }
 0x3d5   :  { %v2883_v61 = vadd.f32 %v2882_v21, %v2881_v54  ;;  %v2056_v54 = vadd.f32 %v5073_v38, %v5090_v63 }
 0x3d7   :  { %v2884_v20 = vpop.f32.mrb[28].mxu1  ;;  %v5093_v0 = vadd.f32 %v2883_v61, %v2011_v16 }
 0x3d8   :  { %v2885_v46 = vpop.f32.mrb[29].mxu1 }
 0x3d9   :  { %v2886_v48 = vadd.f32 %v2885_v46, %v2884_v20  ;;  %v2234_v49 = vsel %vm541_vm0, %v5093_v0, 0.0  ;;  %v2061_v46 = vadd.f32 %v5075_v60, %v5090_v63 }
 0x3da   :  { %2235 = vadd.xlane.f32.xlu0 %v2234_v49 }
 0x3db   :  { %v2887_v50 = vpop.f32.mrb[30].mxu1  ;;  %v5098_v58 = vadd.f32 %v2886_v48, %v2016_v47 }
 0x3dc   :  { %v2888_v18 = vpop.f32.mrb[31].mxu1 }
 0x3dd   :  { %v2889_v19 = vadd.f32 %v2888_v18, %v2887_v50  ;;  %v2237_v3 = vsel %vm541_vm0, %v5098_v58, 0.0  ;;  %v2066_v18 = vadd.f32 %v5077_v62, %v5090_v63 }
 0x3de   :  { %2238 = vadd.xlane.f32.xlu1 %v2237_v3 }
 0x3df   :  { %v2890_v6 = vpop.f32.mrb[32].mxu1  ;;  %v5103_v23 = vadd.f32 %v2889_v19, %v2021_v59 }
 0x3e0   :  { %v2891_v24 = vpop.f32.mrb[33].mxu1 }
 0x3e1   :  { %v2892_v1 = vadd.f32 %v2891_v24, %v2890_v6  ;;  %v2240_v25 = vsel %vm541_vm0, %v5103_v23, 0.0  ;;  %v2071_v24 = vadd.f32 %v5079_v51, %v5090_v63 }
 0x3e2   :  { %2241 = vadd.xlane.f32.xlu1 %v2240_v25 }
 0x3e3   :  { %v2893_v55 = vpop.f32.mrb[34].mxu1  ;;  %v5108_v22 = vadd.f32 %v2892_v1, %v2026_v29 }
 0x3e4   :  { %v2894_v30 = vpop.f32.mrb[35].mxu1 }
 0x3e5   :  { %v2895_v42 = vadd.f32 %v2894_v30, %v2893_v55  ;;  %v2243_v43 = vsel %vm541_vm0, %v5108_v22, 0.0  ;;  %v2076_v30 = vadd.f32 %v5081_v14, %v5090_v63 }
 0x3e6   :  { %2244 = vadd.xlane.f32.xlu1 %v2243_v43 }
 0x3e7   :  { %v2896_v45 = vpop.f32.mrb[36].mxu1  ;;  %v5114_v32 = vadd.f32 %v2895_v42, %v2031_v40 }
 0x3e8   :  { %v2897_v41 = vpop.f32.mrb[37].mxu1 }
 0x3e9   :  { %v2898_v12 = vadd.f32 %v2897_v41, %v2896_v45  ;;  %v2246_v9 = vsel %vm541_vm0, %v5114_v32, 0.0  ;;  %v2081_v41 = vadd.f32 %v5083_v26, %v5090_v63 }
 0x3ea   :  { %2247 = vadd.xlane.f32.xlu0 %v2246_v9 }
 0x3eb   :  { %v2899_v11 = vpop.f32.mrb[38].mxu1  ;;  %v5120_v31 = vadd.f32 %v2898_v12, %v2036_v10 }
 0x3ec   :  { %v2900_v44 = vpop.f32.mrb[39].mxu1 }
 0x3ed   :  { %v2901_v37 = vadd.f32 %v2900_v44, %v2899_v11  ;;  %v2249_v33 = vsel %vm541_vm0, %v5120_v31, 0.0  ;;  %v2086_v44 = vadd.f32 %v5085_v17, %v5090_v63 }
 0x3ee   :  { %2250 = vadd.xlane.f32.xlu1 %v2249_v33 }
 0x3ef   :  { %v2902_v39 = vpop.f32.mrb[40].mxu1  ;;  %v5126_v35 = vadd.f32 %v2901_v37, %v2041_v34 }
 0x3f0   :  { %v2903_v28 = vpop.f32.mrb[41].mxu1 }
 0x3f1   :  { %v2904_v57 = vadd.f32 %v2903_v28, %v2902_v39  ;;  %v2252_v4 = vsel %vm541_vm0, %v5126_v35, 0.0 }
 0x3f2   :  { %2253 = vadd.xlane.f32.xlu0 %v2252_v4 }
 0x3f3   :  { %v2905_v5 = vpop.f32.mrb[42].mxu1  ;;  %v5132_v2 = vadd.f32 %v2904_v57, %v2046_v56 }
 0x3f4   :  { %v2906_v7 = vpop.f32.mrb[43].mxu1 }
 0x3f5   :  { %v2907_v8 = vadd.f32 %v2906_v7, %v2905_v5  ;;  %v2255_v15 = vsel %vm541_vm0, %v5132_v2, 0.0 }
 0x3f6   :  { %2256 = vadd.xlane.f32.xlu1 %v2255_v15 }
 0x3f7   :  { %v2908_v52 = vpop.f32.mrb[44].mxu1  ;;  %v5138_v36 = vadd.f32 %v2907_v8, %v2051_v53 }
 0x3f8   :  { %v2909_v13 = vpop.f32.mrb[45].mxu1 }
 0x3f9   :  { %v2910_v21 = vadd.f32 %v2909_v13, %v2908_v52  ;;  %v2258_v16 = vsel %vm541_vm0, %v5138_v36, 0.0 }
 0x3fa   :  { %2259 = vadd.xlane.f32.xlu0 %v2258_v16 }
 0x3fb   :  { %v2911_v61 = vpop.f32.mrb[46].mxu1  ;;  %v5144_v20 = vadd.f32 %v2910_v21, %v2056_v54 }
 0x3fc   :  { %v2912_v27 = vpop.f32.mrb[47].mxu1 }
 0x3fd   :  { %v2913_v47 = vadd.f32 %v2912_v27, %v2911_v61  ;;  %v2261_v48 = vsel %vm541_vm0, %v5144_v20, 0.0 }
 0x3fe   :  { %2262 = vadd.xlane.f32.xlu1 %v2261_v48 }
 0x3ff   :  { %v2914_v49 = vpop.f32.mrb[48].mxu1  ;;  %v5150_v50 = vadd.f32 %v2913_v47, %v2061_v46 }
 0x400   :  { %v2915_v38 = vpop.f32.mrb[49].mxu1 }
 0x401   :  { %v2916_v59 = vadd.f32 %v2915_v38, %v2914_v49  ;;  %v2264_v19 = vsel %vm541_vm0, %v5150_v50, 0.0 }
 0x402   :  { %2265 = vadd.xlane.f32.xlu0 %v2264_v19 }
 0x403   :  { %v2917_v3 = vpop.f32.mrb[50].mxu1  ;;  %v5156_v6 = vadd.f32 %v2916_v59, %v2066_v18 }
 0x404   :  { %v2918_v60 = vpop.f32.mrb[51].mxu1 }
 0x405   :  { %v2919_v29 = vadd.f32 %v2918_v60, %v2917_v3  ;;  %v2267_v1 = vsel %vm541_vm0, %v5156_v6, 0.0 }
 0x406   :  { %2268 = vadd.xlane.f32.xlu1 %v2267_v1 }
 0x407   :  { %v2920_v25 = vpop.f32.mrb[52].mxu1  ;;  %v5162_v55 = vadd.f32 %v2919_v29, %v2071_v24 }
 0x408   :  { %v2921_v62 = vpop.f32.mrb[53].mxu1 }
 0x409   :  { %v2922_v40 = vadd.f32 %v2921_v62, %v2920_v25  ;;  %v2270_v42 = vsel %vm541_vm0, %v5162_v55, 0.0 }
 0x40a   :  { %2271 = vadd.xlane.f32.xlu0 %v2270_v42 }
 0x40b   :  { %v2923_v43 = vpop.f32.mrb[54].mxu1  ;;  %v5168_v45 = vadd.f32 %v2922_v40, %v2076_v30 }
 0x40c   :  { %v2924_v51 = vpop.f32.mrb[55].mxu1 }
 0x40d   :  { %v2925_v10 = vadd.f32 %v2924_v51, %v2923_v43  ;;  %v2273_v12 = vsel %vm541_vm0, %v5168_v45, 0.0 }
 0x40e   :  { %2274 = vadd.xlane.f32.xlu1 %v2273_v12 }
 0x40f   :  { %v2926_v9 = vpop.f32.mrb[56].mxu1  ;;  %v5174_v11 = vadd.f32 %v2925_v10, %v2081_v41 }
 0x410   :  { %v2927_v14 = vpop.f32.mrb[57].mxu1 }
 0x411   :  { %v2928_v34 = vadd.f32 %v2927_v14, %v2926_v9  ;;  %v2276_v37 = vsel %vm541_vm0, %v5174_v11, 0.0 }
 0x412   :  { %2277 = vadd.xlane.f32.xlu0 %v2276_v37 }
 0x413   :  { %v5180_v33 = vadd.f32 %v2928_v34, %v2086_v44 }
 0x415   :  { %v2279_v26 = vsel %vm541_vm0, %v5180_v33, 0.0 }
 0x416   :  { %2280 = vadd.xlane.f32.xlu1 %v2279_v26 }
 0x467   :  { %v2236_v39 = vpop.xlane.xlu0 %2235 }
 0x468   :  { %v2283_v28 = vmul.f32 0.03125, %v2236_v39 }
 0x46a   :  { %v5185_v56 = vsub.f32 %v5093_v0, %v2283_v28 }
 0x46b   :  { %v2239_v57 = vpop.xlane.xlu1 %2238 }
 0x46c   :  { %v2284_v4 = vmul.f32 0.03125, %v2239_v57  ;;  %v2315_v17 = vmul.f32 %v5185_v56, %v5185_v56 }
 0x46e   :  { %v5190_v63 = vsub.f32 %v5098_v58, %v2284_v4  ;;  %v2331_v5 = vsel %vm541_vm0, %v2315_v17, 0.0 }
 0x46f   :  { %v2242_v7 = vpop.xlane.xlu1 %2241  ;;  %2332 = vadd.xlane.f32.xlu0 %v2331_v5 }
 0x470   :  { %v2285_v53 = vmul.f32 0.03125, %v2242_v7  ;;  %v2316_v8 = vmul.f32 %v5190_v63, %v5190_v63 }
 0x472   :  { %v5196_v15 = vsub.f32 %v5103_v23, %v2285_v53  ;;  %v2334_v0 = vsel %vm541_vm0, %v2316_v8, 0.0 }
 0x473   :  { %2335 = vadd.xlane.f32.xlu1 %v2334_v0  ;;  %v2245_v52 = vpop.xlane.xlu1 %2244 }
 0x474   :  { %v2286_v13 = vmul.f32 0.03125, %v2245_v52  ;;  %v2317_v58 = vmul.f32 %v5196_v15, %v5196_v15 }
 0x476   :  { %v5202_v54 = vsub.f32 %v5108_v22, %v2286_v13  ;;  %v2337_v21 = vsel %vm541_vm0, %v2317_v58, 0.0 }
 0x477   :  { %2338 = vadd.xlane.f32.xlu0 %v2337_v21  ;;  %v2248_v16 = vpop.xlane.xlu0 %2247 }
 0x478   :  { %v2287_v61 = vmul.f32 0.03125, %v2248_v16  ;;  %v2318_v23 = vmul.f32 %v5202_v54, %v5202_v54 }
 0x47a   :  { %v5208_v27 = vsub.f32 %v5114_v32, %v2287_v61  ;;  %v2340_v46 = vsel %vm541_vm0, %v2318_v23, 0.0 }
 0x47b   :  { %2341 = vadd.xlane.f32.xlu1 %v2340_v46  ;;  %v2251_v47 = vpop.xlane.xlu1 %2250 }
 0x47c   :  { %v2288_v48 = vmul.f32 0.03125, %v2251_v47  ;;  %v2319_v22 = vmul.f32 %v5208_v27, %v5208_v27 }
 0x47e   :  { %v5214_v49 = vsub.f32 %v5120_v31, %v2288_v48  ;;  %v2343_v38 = vsel %vm541_vm0, %v2319_v22, 0.0 }
 0x47f   :  { %2344 = vadd.xlane.f32.xlu0 %v2343_v38  ;;  %v2254_v18 = vpop.xlane.xlu0 %2253 }
 0x480   :  { %v2289_v59 = vmul.f32 0.03125, %v2254_v18  ;;  %v2320_v32 = vmul.f32 %v5214_v49, %v5214_v49 }
 0x482   :  { %v5220_v19 = vsub.f32 %v5126_v35, %v2289_v59  ;;  %v2346_v3 = vsel %vm541_vm0, %v2320_v32, 0.0 }
 0x483   :  { %2347 = vadd.xlane.f32.xlu1 %v2346_v3  ;;  %v2257_v60 = vpop.xlane.xlu1 %2256 }
 0x484   :  { %v2290_v24 = vmul.f32 0.03125, %v2257_v60  ;;  %v2321_v31 = vmul.f32 %v5220_v19, %v5220_v19 }
 0x486   :  { %v5226_v29 = vsub.f32 %v5132_v2, %v2290_v24  ;;  %v2349_v1 = vsel %vm541_vm0, %v2321_v31, 0.0  ;;  %v5283_v31 = vld [vmem:[%s5412_s10] ss:$0 sm:$0xff] }
 0x487   :  { %2350 = vadd.xlane.f32.xlu0 %v2349_v1  ;;  %v2260_v25 = vpop.xlane.xlu0 %2259 }
 0x488   :  { %v2291_v62 = vmul.f32 0.03125, %v2260_v25  ;;  %v2322_v35 = vmul.f32 %v5226_v29, %v5226_v29 }
 0x48a   :  { %v5232_v30 = vsub.f32 %v5138_v36, %v2291_v62  ;;  %v2352_v40 = vsel %vm541_vm0, %v2322_v35, 0.0  ;;  %v5289_v35 = vld [vmem:[%s5413_s11] ss:$0 sm:$0xff] }
 0x48b   :  { %2353 = vadd.xlane.f32.xlu1 %v2352_v40  ;;  %v2263_v42 = vpop.xlane.xlu1 %2262 }
 0x48c   :  { %v2292_v43 = vmul.f32 0.03125, %v2263_v42  ;;  %v2323_v2 = vmul.f32 %v5232_v30, %v5232_v30 }
 0x48e   :  { %v5238_v51 = vsub.f32 %v5144_v20, %v2292_v43  ;;  %v2355_v41 = vsel %vm541_vm0, %v2323_v2, 0.0 }
 0x48f   :  { %2356 = vadd.xlane.f32.xlu0 %v2355_v41  ;;  %v2266_v10 = vpop.xlane.xlu0 %2265 }
 0x490   :  { %v2293_v12 = vmul.f32 0.03125, %v2266_v10  ;;  %v2324_v36 = vmul.f32 %v5238_v51, %v5238_v51 }
 0x492   :  { %v5244_v9 = vsub.f32 %v5150_v50, %v2293_v12  ;;  %v2358_v14 = vsel %vm541_vm0, %v2324_v36, 0.0 }
 0x493   :  { %2359 = vadd.xlane.f32.xlu1 %v2358_v14  ;;  %v2269_v44 = vpop.xlane.xlu1 %2268 }
 0x494   :  { %v2294_v34 = vmul.f32 0.03125, %v2269_v44  ;;  %v2325_v20 = vmul.f32 %v5244_v9, %v5244_v9 }
 0x496   :  { %v5250_v37 = vsub.f32 %v5156_v6, %v2294_v34  ;;  %v2361_v26 = vsel %vm541_vm0, %v2325_v20, 0.0 }
 0x497   :  { %2362 = vadd.xlane.f32.xlu0 %v2361_v26  ;;  %v2272_v39 = vpop.xlane.xlu0 %2271 }
 0x498   :  { %v2295_v28 = vmul.f32 0.03125, %v2272_v39  ;;  %v2326_v50 = vmul.f32 %v5250_v37, %v5250_v37 }
 0x49a   :  { %v5256_v57 = vsub.f32 %v5162_v55, %v2295_v28  ;;  %v2364_v4 = vsel %vm541_vm0, %v2326_v50, 0.0 }
 0x49b   :  { %2365 = vadd.xlane.f32.xlu1 %v2364_v4  ;;  %v2275_v17 = vpop.xlane.xlu1 %2274 }
 0x49c   :  { %v2296_v5 = vmul.f32 0.03125, %v2275_v17  ;;  %v2327_v6 = vmul.f32 %v5256_v57, %v5256_v57 }
 0x49e   :  { %v5262_v7 = vsub.f32 %v5168_v45, %v2296_v5  ;;  %v2367_v53 = vsel %vm541_vm0, %v2327_v6, 0.0 }
 0x49f   :  { %2368 = vadd.xlane.f32.xlu0 %v2367_v53  ;;  %v2278_v8 = vpop.xlane.xlu0 %2277 }
 0x4a0   :  { %v2297_v0 = vmul.f32 0.03125, %v2278_v8  ;;  %v2328_v55 = vmul.f32 %v5262_v7, %v5262_v7 }
 0x4a2   :  { %v5268_v52 = vsub.f32 %v5174_v11, %v2297_v0  ;;  %v2370_v13 = vsel %vm541_vm0, %v2328_v55, 0.0 }
 0x4a3   :  { %2371 = vadd.xlane.f32.xlu1 %v2370_v13  ;;  %v2281_v58 = vpop.xlane.xlu1 %2280 }
 0x4a4   :  { %v2298_v21 = vmul.f32 0.03125, %v2281_v58  ;;  %v2329_v45 = vmul.f32 %v5268_v52, %v5268_v52 }
 0x4a6   :  { %v5274_v16 = vsub.f32 %v5180_v33, %v2298_v21  ;;  %v2373_v61 = vsel %vm541_vm0, %v2329_v45, 0.0 }
 0x4a7   :  { %2374 = vadd.xlane.f32.xlu0 %v2373_v61 }
 0x4a8   :  { %v2330_v23 = vmul.f32 %v5274_v16, %v5274_v16 }
 0x4aa   :  { %v2376_v11 = vsel %vm541_vm0, %v2330_v23, 0.0 }
 0x4ab   :  { %2377 = vadd.xlane.f32.xlu1 %v2376_v11 }
 0x4fc   :  { %v2333_v46 = vpop.xlane.xlu0 %2332 }
 0x4fd   :  { %v2379_v47 = vmul.f32 0.03125, %v2333_v46 }
 0x4ff   :  { %v2395_v48 = vadd.f32 1e-05, %v2379_v47 }
 0x500   :  { %v2336_v22 = vpop.xlane.xlu1 %2335 }
 0x501   :  { %3547 = vrsqrt.f32 %v2395_v48  ;;  %v2380_v38 = vmul.f32 0.03125, %v2336_v22 }
 0x503   :  { %v2396_v18 = vadd.f32 1e-05, %v2380_v38 }
 0x504   :  { %v2339_v59 = vpop.xlane.xlu0 %2338 }
 0x505   :  { %3549 = vrsqrt.f32 %v2396_v18  ;;  %v2381_v33 = vmul.f32 0.03125, %v2339_v59 }
 0x507   :  { %v2397_v32 = vadd.f32 1e-05, %v2381_v33 }
 0x508   :  { %v2342_v3 = vpop.xlane.xlu1 %2341 }
 0x509   :  { %3551 = vrsqrt.f32 %v2397_v32  ;;  %v2382_v60 = vmul.f32 0.03125, %v2342_v3 }
 0x50b   :  { %v3548_v24 = vpop.eup %3547  ;;  %v2398_v1 = vadd.f32 1e-05, %v2382_v60 }
 0x50c   :  { %v2427_v25 = vmul.f32 %v3548_v24, %v5185_v56  ;;  %v2345_v62 = vpop.xlane.xlu0 %2344 }
 0x50d   :  { %3553 = vrsqrt.f32 %v2398_v1  ;;  %v2383_v40 = vmul.f32 0.03125, %v2345_v62 }
 0x50e   :  { %v2450_v42 = vmul.f32 %v5283_v31, %v2427_v25 }
 0x50f   :  { %v3550_v43 = vpop.eup %3549  ;;  %v2399_v2 = vadd.f32 1e-05, %v2383_v40 }
 0x510   :  { %v2473_v41 = vadd.f32 %v5289_v35, %v2450_v42  ;;  %v2428_v10 = vmul.f32 %v3550_v43, %v5190_v63  ;;  %v2348_v12 = vpop.xlane.xlu1 %2347 }
 0x511   :  { %3555 = vrsqrt.f32 %v2399_v2  ;;  %v2384_v36 = vmul.f32 0.03125, %v2348_v12 }
 0x512   :  { %v2489_v56 = vmax.f32 %v2473_v41, 0.0  ;;  %v2451_v14 = vmul.f32 %v5283_v31, %v2428_v10 }
 0x513   :  { %v3552_v44 = vpop.eup %3551  ;;  %v2400_v34 = vadd.f32 1e-05, %v2384_v36 }
 0x514   :  { %2505 = vst.msk [vmem:[%s5414_s12] sm:$0xff] %vm541_vm0, %v2489_v56  ;;  %v2474_v20 = vadd.f32 %v5289_v35, %v2451_v14  ;;  %v2429_v26 = vmul.f32 %v3552_v44, %v5196_v15  ;;  %v2351_v39 = vpop.xlane.xlu0 %2350 }
 0x515   :  { %3557 = vrsqrt.f32 %v2400_v34  ;;  %v2385_v63 = vmul.f32 0.03125, %v2351_v39 }
 0x516   :  { %v2490_v28 = vmax.f32 %v2474_v20, 0.0  ;;  %v2452_v50 = vmul.f32 %v5283_v31, %v2429_v26 }
 0x517   :  { %v3554_v4 = vpop.eup %3553  ;;  %v2401_v17 = vadd.f32 1e-05, %v2385_v63 }
 0x518   :  { %2506 = vst.msk [vmem:[%s5414_s12 + $0x8] sm:$0xff] %vm541_vm0, %v2490_v28  ;;  %v2475_v5 = vadd.f32 %v5289_v35, %v2452_v50  ;;  %v2430_v6 = vmul.f32 %v3554_v4, %v5202_v54  ;;  %v2354_v53 = vpop.xlane.xlu1 %2353 }
 0x519   :  { %3559 = vrsqrt.f32 %v2401_v17  ;;  %v2386_v15 = vmul.f32 0.03125, %v2354_v53 }
 0x51a   :  { %v2491_v8 = vmax.f32 %v2475_v5, 0.0  ;;  %v2453_v0 = vmul.f32 %v5283_v31, %v2430_v6 }
 0x51b   :  { %v3556_v55 = vpop.eup %3555  ;;  %v2402_v13 = vadd.f32 1e-05, %v2386_v15 }
 0x51c   :  { %2507 = vst.msk [vmem:[%s5414_s12 + $0x10] sm:$0xff] %vm541_vm0, %v2491_v8  ;;  %v2476_v58 = vadd.f32 %v5289_v35, %v2453_v0  ;;  %v2431_v21 = vmul.f32 %v3556_v55, %v5208_v27  ;;  %v2357_v45 = vpop.xlane.xlu0 %2356 }
 0x51d   :  { %3561 = vrsqrt.f32 %v2402_v13  ;;  %v2387_v54 = vmul.f32 0.03125, %v2357_v45 }
 0x51e   :  { %v2492_v61 = vmax.f32 %v2476_v58, 0.0  ;;  %v2454_v23 = vmul.f32 %v5283_v31, %v2431_v21 }
 0x51f   :  { %v3558_v11 = vpop.eup %3557  ;;  %v2403_v46 = vadd.f32 1e-05, %v2387_v54 }
 0x520   :  { %2508 = vst.msk [vmem:[%s5414_s12 + $0x18] sm:$0xff] %vm541_vm0, %v2492_v61  ;;  %v2477_v47 = vadd.f32 %v5289_v35, %v2454_v23  ;;  %v2432_v48 = vmul.f32 %v3558_v11, %v5214_v49  ;;  %v2360_v22 = vpop.xlane.xlu1 %2359 }
 0x521   :  { %3563 = vrsqrt.f32 %v2403_v46  ;;  %v2388_v27 = vmul.f32 0.03125, %v2360_v22 }
 0x522   :  { %v2493_v38 = vmax.f32 %v2477_v47, 0.0  ;;  %v2455_v18 = vmul.f32 %v5283_v31, %v2432_v48 }
 0x523   :  { %v3560_v59 = vpop.eup %3559  ;;  %v2404_v33 = vadd.f32 1e-05, %v2388_v27 }
 0x524   :  { %2509 = vst.msk [vmem:[%s5414_s12 + $0x20] sm:$0xff] %vm541_vm0, %v2493_v38  ;;  %v2478_v32 = vadd.f32 %v5289_v35, %v2455_v18  ;;  %v2433_v3 = vmul.f32 %v3560_v59, %v5220_v19  ;;  %v2363_v60 = vpop.xlane.xlu0 %2362 }
 0x525   :  { %3565 = vrsqrt.f32 %v2404_v33  ;;  %v2389_v49 = vmul.f32 0.03125, %v2363_v60 }
 0x526   :  { %v2494_v24 = vmax.f32 %v2478_v32, 0.0  ;;  %v2456_v1 = vmul.f32 %v5283_v31, %v2433_v3 }
 0x527   :  { %v3562_v25 = vpop.eup %3561  ;;  %v2405_v62 = vadd.f32 1e-05, %v2389_v49 }
 0x528   :  { %2510 = vst.msk [vmem:[%s5414_s12 + $0x28] sm:$0xff] %vm541_vm0, %v2494_v24  ;;  %v2479_v40 = vadd.f32 %v5289_v35, %v2456_v1  ;;  %v2434_v42 = vmul.f32 %v3562_v25, %v5226_v29  ;;  %v2366_v43 = vpop.xlane.xlu1 %2365 }
 0x529   :  { %3567 = vrsqrt.f32 %v2405_v62  ;;  %v2390_v19 = vmul.f32 0.03125, %v2366_v43 }
 0x52a   :  { %v2495_v2 = vmax.f32 %v2479_v40, 0.0  ;;  %v2457_v41 = vmul.f32 %v5283_v31, %v2434_v42 }
 0x52b   :  { %v3564_v10 = vpop.eup %3563  ;;  %v2406_v12 = vadd.f32 1e-05, %v2390_v19 }
 0x52c   :  { %2511 = vst.msk [vmem:[%s5414_s12 + $0x30] sm:$0xff] %vm541_vm0, %v2495_v2  ;;  %v2480_v36 = vadd.f32 %v5289_v35, %v2457_v41  ;;  %v2435_v56 = vmul.f32 %v3564_v10, %v5232_v30  ;;  %v2369_v14 = vpop.xlane.xlu0 %2368 }
 0x52d   :  { %3569 = vrsqrt.f32 %v2406_v12  ;;  %v2391_v29 = vmul.f32 0.03125, %v2369_v14 }
 0x52e   :  { %v2496_v44 = vmax.f32 %v2480_v36, 0.0  ;;  %v2458_v34 = vmul.f32 %v5283_v31, %v2435_v56 }
 0x52f   :  { %v3566_v20 = vpop.eup %3565  ;;  %v2407_v26 = vadd.f32 1e-05, %v2391_v29 }
 0x530   :  { %2512 = vst.msk [vmem:[%s5414_s12 + $0x38] sm:$0xff] %vm541_vm0, %v2496_v44  ;;  %v2481_v39 = vadd.f32 %v5289_v35, %v2458_v34  ;;  %v2436_v63 = vmul.f32 %v3566_v20, %v5238_v51  ;;  %v2372_v28 = vpop.xlane.xlu1 %2371 }
 0x531   :  { %3571 = vrsqrt.f32 %v2407_v26  ;;  %v2392_v30 = vmul.f32 0.03125, %v2372_v28 }
 0x532   :  { %v2497_v50 = vmax.f32 %v2481_v39, 0.0  ;;  %v2459_v4 = vmul.f32 %v5283_v31, %v2436_v63 }
 0x533   :  { %v3568_v17 = vpop.eup %3567  ;;  %v2408_v5 = vadd.f32 1e-05, %v2392_v30 }
 0x534   :  { %2513 = vst.msk [vmem:[%s5414_s12 + $0x40] sm:$0xff] %vm541_vm0, %v2497_v50  ;;  %v2482_v6 = vadd.f32 %v5289_v35, %v2459_v4  ;;  %v2437_v53 = vmul.f32 %v3568_v17, %v5244_v9  ;;  %v2375_v15 = vpop.xlane.xlu0 %2374 }
 0x535   :  { %3573 = vrsqrt.f32 %v2408_v5  ;;  %v2393_v51 = vmul.f32 0.03125, %v2375_v15 }
 0x536   :  { %v2498_v8 = vmax.f32 %v2482_v6, 0.0  ;;  %v2460_v0 = vmul.f32 %v5283_v31, %v2437_v53 }
 0x537   :  { %v3570_v55 = vpop.eup %3569  ;;  %v2409_v13 = vadd.f32 1e-05, %v2393_v51 }
 0x538   :  { %2514 = vst.msk [vmem:[%s5414_s12 + $0x48] sm:$0xff] %vm541_vm0, %v2498_v8  ;;  %v2483_v58 = vadd.f32 %v5289_v35, %v2460_v0  ;;  %v2438_v21 = vmul.f32 %v3570_v55, %v5250_v37  ;;  %v2378_v45 = vpop.xlane.xlu1 %2377 }
 0x539   :  { %3575 = vrsqrt.f32 %v2409_v13  ;;  %v2394_v9 = vmul.f32 0.03125, %v2378_v45 }
 0x53a   :  { %v2499_v54 = vmax.f32 %v2483_v58, 0.0  ;;  %v2461_v61 = vmul.f32 %v5283_v31, %v2438_v21 }
 0x53b   :  { %v3572_v23 = vpop.eup %3571  ;;  %v2410_v11 = vadd.f32 1e-05, %v2394_v9 }
 0x53c   :  { %2515 = vst.msk [vmem:[%s5414_s12 + $0x50] sm:$0xff] %vm541_vm0, %v2499_v54  ;;  %v2484_v46 = vadd.f32 %v5289_v35, %v2461_v61  ;;  %v2439_v47 = vmul.f32 %v3572_v23, %v5256_v57 }
 0x53d   :  { %3577 = vrsqrt.f32 %v2410_v11 }
 0x53e   :  { %v2500_v48 = vmax.f32 %v2484_v46, 0.0  ;;  %v2462_v37 = vmul.f32 %v5283_v31, %v2439_v47 }
 0x53f   :  { %v3574_v22 = vpop.eup %3573 }
 0x540   :  { %2516 = vst.msk [vmem:[%s5414_s12 + $0x58] sm:$0xff] %vm541_vm0, %v2500_v48  ;;  %v2485_v27 = vadd.f32 %v5289_v35, %v2462_v37  ;;  %v2440_v38 = vmul.f32 %v3574_v22, %v5262_v7 }
 0x542   :  { %v2501_v18 = vmax.f32 %v2485_v27, 0.0  ;;  %v2463_v59 = vmul.f32 %v5283_v31, %v2440_v38 }
 0x543   :  { %v3576_v33 = vpop.eup %3575 }
 0x544   :  { %2517 = vst.msk [vmem:[%s5414_s12 + $0x60] sm:$0xff] %vm541_vm0, %v2501_v18  ;;  %v2486_v57 = vadd.f32 %v5289_v35, %v2463_v59  ;;  %v2441_v32 = vmul.f32 %v3576_v33, %v5268_v52 }
 0x546   :  { %v2502_v3 = vmax.f32 %v2486_v57, 0.0  ;;  %v2464_v60 = vmul.f32 %v5283_v31, %v2441_v32 }
 0x547   :  { %v3578_v49 = vpop.eup %3577 }
 0x548   :  { %2518 = vst.msk [vmem:[%s5414_s12 + $0x68] sm:$0xff] %vm541_vm0, %v2502_v3  ;;  %v2487_v7 = vadd.f32 %v5289_v35, %v2464_v60  ;;  %v2442_v24 = vmul.f32 %v3578_v49, %v5274_v16 }
 0x54a   :  { %v2503_v1 = vmax.f32 %v2487_v7, 0.0  ;;  %v2465_v25 = vmul.f32 %v5283_v31, %v2442_v24 }
 0x54c   :  { %2519 = vst.msk [vmem:[%s5414_s12 + $0x70] sm:$0xff] %vm541_vm0, %v2503_v1  ;;  %v2488_v52 = vadd.f32 %v5289_v35, %v2465_v25 }
 0x54e   :  { %v2504_v62 = vmax.f32 %v2488_v52, 0.0 }
 0x550   :  { %2520 = vst.msk [vmem:[%s5414_s12 + $0x78] sm:$0xff] %vm541_vm0, %v2504_v62 }
 0x551   :  { %2525 = vsyncpa [#allocation5], 1 }
 0x552   :  { %2526 = vsyncpa [#allocation7], 1 }
 0x553   :  { %2527 = vsyncpa [#allocation10], 1 }

</bundles_post_ra>
